<compile_context>
chip_gen: v7x
topology: tpu7x:2x2x1
jax: 0.10.0
libtpu: 0.0.40
codegen_flags: <defaults>
</compile_context>

<pallas_src>
import numpy as np
import jax
import jax.numpy as jnp
from jax import lax
from jax.experimental import pallas as pl
from jax.experimental.pallas import tpu as pltpu

# ----------------------- tiny T5 config (synthetic) -----------------------
VOCAB = 128
D_MODEL = 32
N_HEADS = 4
D_KV = 8
INNER = N_HEADS * D_KV          # 32
D_FF = 64
N_LAYERS = 2
NUM_BUCKETS = 32
MAX_DISTANCE = 128
EPS = 1e-6
NEG = -1e9


# --------------------------- in-kernel helpers ---------------------------


def _rms(x, w):
    """T5 LayerNorm: RMS norm, no mean subtraction, no bias.  x:(T,D)  w:(1,D)."""
    var = jnp.mean(x * x, axis=-1, keepdims=True)
    return x * lax.rsqrt(var + EPS) * w


def _embed(ids, emb):
    """Embedding lookup via one-hot matmul (MXU-friendly, stays in VMEM).
    ids:(T,1) int32, emb:(VOCAB,D) -> (T,D)."""
    t = ids.shape[0]
    iota = lax.broadcasted_iota(jnp.int32, (t, VOCAB), 1)
    onehot = (iota == ids).astype(jnp.float32)
    return jnp.dot(onehot, emb, preferred_element_type=jnp.float32)


def _mha(q, k, v, bias, wo):
    """Multi-head attention + output projection, per-head via static lane slices.
    q:(Tq,INNER) k,v:(Tk,INNER) bias:(H,Tq,Tk) or broadcastable 2-D, wo:(INNER,D).
    T5 attention has NO 1/sqrt(d) scaling.  Returns (Tq, D)."""
    acc = None
    for hd in range(N_HEADS):
        lo, hi = hd * D_KV, (hd + 1) * D_KV
        qh = q[:, lo:hi]
        kh = k[:, lo:hi]
        vh = v[:, lo:hi]
        s = lax.dot_general(qh, kh, (((1,), (1,)), ((), ())),
                            preferred_element_type=jnp.float32)   # (Tq,Tk) = q @ k.T
        b_h = bias[hd] if bias.ndim == 3 else bias
        s = s + b_h
        m = jnp.max(s, axis=-1, keepdims=True)
        p = jnp.exp(s - m)
        denom = jnp.sum(p, axis=-1, keepdims=True)
        p = p * pl.reciprocal(denom, approx=True)                  # EUP slot, frees VALU
        o = jnp.dot(p, vh, preferred_element_type=jnp.float32)     # (Tq, D_KV)
        # concat over heads folded into the output projection: sum_h o_h @ wo[h-rows]
        contrib = jnp.dot(o, wo[lo:hi, :], preferred_element_type=jnp.float32)
        acc = contrib if acc is None else acc + contrib
    return acc


# --------------------------- fused stack kernels ---------------------------


def _encoder_kernel(ids_ref, mask_ref, emb_ref, posb_ref,
                    ln1_ref, wqkv_ref, wo_ref, ln2_ref, wi_ref, wff_ref, fln_ref,
                    out_ref):
    emb = emb_ref[...]                                   # (VOCAB, D)
    h = _embed(ids_ref[...], emb)                        # (Te, D)
    mask_bias = (1.0 - mask_ref[0]) * NEG                # (1, Te)
    bias = posb_ref[...] + mask_bias[None]               # (H, Te, Te)
    for l in range(N_LAYERS):
        # self attention (fused QKV GEMM, per-head lane slices, bias added in-kernel)
        n = _rms(h, ln1_ref[l])
        qkv = jnp.dot(n, wqkv_ref[l], preferred_element_type=jnp.float32)  # (Te, 3*INNER)
        h = h + _mha(qkv[:, :INNER], qkv[:, INNER:2 * INNER], qkv[:, 2 * INNER:],
                     bias, wo_ref[l])
        # feed forward (ReLU), intermediate stays in VMEM
        n = _rms(h, ln2_ref[l])
        f = jnp.maximum(jnp.dot(n, wi_ref[l], preferred_element_type=jnp.float32), 0.0)
        h = h + jnp.dot(f, wff_ref[l], preferred_element_type=jnp.float32)
    out_ref[...] = _rms(h, fln_ref[...])


def _decoder_kernel(ids_ref, mask_ref, enc_out_ref, emb_ref, selfb_ref,
                    ln1_ref, wqkv_ref, wos_ref, ln2_ref, wq_ref, wkv_ref, woc_ref,
                    ln3_ref, wi_ref, wff_ref, fln_ref,
                    hid_ref, logits_ref):
    emb = emb_ref[...]                                   # (VOCAB, D)
    h = _embed(ids_ref[...], emb)                        # (Td, D)
    enc_out = enc_out_ref[...]                           # (Te, D)
    self_bias = selfb_ref[...]                           # (H, Td, Td)  pos + causal
    cross_bias = (1.0 - mask_ref[0]) * NEG               # (1, Te) -> broadcast over Td
    for l in range(N_LAYERS):
        # causal self attention
        n = _rms(h, ln1_ref[l])
        qkv = jnp.dot(n, wqkv_ref[l], preferred_element_type=jnp.float32)  # (Td, 3*INNER)
        h = h + _mha(qkv[:, :INNER], qkv[:, INNER:2 * INNER], qkv[:, 2 * INNER:],
                     self_bias, wos_ref[l])
        # cross attention (K/V from encoder output, fused KV GEMM)
        n = _rms(h, ln2_ref[l])
        qc = jnp.dot(n, wq_ref[l], preferred_element_type=jnp.float32)      # (Td, INNER)
        kv = jnp.dot(enc_out, wkv_ref[l], preferred_element_type=jnp.float32)  # (Te, 2*INNER)
        h = h + _mha(qc, kv[:, :INNER], kv[:, INNER:], cross_bias, woc_ref[l])
        # feed forward
        n = _rms(h, ln3_ref[l])
        f = jnp.maximum(jnp.dot(n, wi_ref[l], preferred_element_type=jnp.float32), 0.0)
        h = h + jnp.dot(f, wff_ref[l], preferred_element_type=jnp.float32)
    h = _rms(h, fln_ref[...])
    hid_ref[...] = h
    # tied lm_head: d_model**-0.5 scale folded in; untransposed embedding contracted on
    # its feature axis (no XLA transpose); output lane axis = VOCAB = 128 (lane dense).
    logits_ref[...] = lax.dot_general(h * (D_MODEL ** -0.5), emb,
                                      (((1,), (1,)), ((), ())),
                                      preferred_element_type=jnp.float32)


# ------------------------------ pallas wrappers ------------------------------


def _full(shape):
    nd = len(shape)
    return pl.BlockSpec(shape, lambda b, _n=nd: (0,) * _n)


def encoder_forward(params, enc_ids, enc_mask):
    B, Te = enc_ids.shape
    p = params["encoder"]
    return pl.pallas_call(
        _encoder_kernel,
        out_shape=jax.ShapeDtypeStruct((B * Te, D_MODEL), jnp.float32),
        grid=(B,),
        in_specs=[
            pl.BlockSpec((Te, 1), lambda b: (b, 0)),               # ids
            pl.BlockSpec((1, 1, Te), lambda b: (b, 0, 0)),         # mask
            _full((VOCAB, D_MODEL)),                               # embedding
            _full((N_HEADS, Te, Te)),                              # pos bias
            _full((N_LAYERS, 1, D_MODEL)),                         # ln1
            _full((N_LAYERS, D_MODEL, 3 * INNER)),                 # wqkv (fused)
            _full((N_LAYERS, INNER, D_MODEL)),                     # wo
            _full((N_LAYERS, 1, D_MODEL)),                         # ln2
            _full((N_LAYERS, D_MODEL, D_FF)),                      # wi
            _full((N_LAYERS, D_FF, D_MODEL)),                      # wff
            _full((1, D_MODEL)),                                   # final ln
        ],
        out_specs=pl.BlockSpec((Te, D_MODEL), lambda b: (b, 0)),
        compiler_params=pltpu.CompilerParams(dimension_semantics=("parallel",)),
    )(enc_ids.reshape(B * Te, 1),
      enc_mask.astype(jnp.float32).reshape(B, 1, Te),
      params["embedding"], p["pos_bias"],
      p["ln1"], p["wqkv"], p["wo"], p["ln2"], p["wi"], p["wff"], p["final_ln"])


def decoder_forward(params, dec_ids, enc_out_flat, enc_mask):
    B, Td = dec_ids.shape
    Te = enc_out_flat.shape[0] // B
    p = params["decoder"]
    return pl.pallas_call(
        _decoder_kernel,
        out_shape=(jax.ShapeDtypeStruct((B * Td, D_MODEL), jnp.float32),
                   jax.ShapeDtypeStruct((B * Td, VOCAB), jnp.float32)),
        grid=(B,),
        in_specs=[
            pl.BlockSpec((Td, 1), lambda b: (b, 0)),               # dec ids
            pl.BlockSpec((1, 1, Te), lambda b: (b, 0, 0)),         # encoder mask
            pl.BlockSpec((Te, D_MODEL), lambda b: (b, 0)),         # encoder output
            _full((VOCAB, D_MODEL)),                               # embedding (tied)
            _full((N_HEADS, Td, Td)),                              # self bias (pos+causal)
            _full((N_LAYERS, 1, D_MODEL)),                         # ln1
            _full((N_LAYERS, D_MODEL, 3 * INNER)),                 # wqkv self (fused)
            _full((N_LAYERS, INNER, D_MODEL)),                     # wo self
            _full((N_LAYERS, 1, D_MODEL)),                         # ln2
            _full((N_LAYERS, D_MODEL, INNER)),                     # wq cross
            _full((N_LAYERS, D_MODEL, 2 * INNER)),                 # wkv cross (fused)
            _full((N_LAYERS, INNER, D_MODEL)),                     # wo cross
            _full((N_LAYERS, 1, D_MODEL)),                         # ln3
            _full((N_LAYERS, D_MODEL, D_FF)),                      # wi
            _full((N_LAYERS, D_FF, D_MODEL)),                      # wff
            _full((1, D_MODEL)),                                   # final ln
        ],
        out_specs=[pl.BlockSpec((Td, D_MODEL), lambda b: (b, 0)),
                   pl.BlockSpec((Td, VOCAB), lambda b: (b, 0))],
        compiler_params=pltpu.CompilerParams(dimension_semantics=("parallel",)),
    )(dec_ids.reshape(B * Td, 1),
      enc_mask.astype(jnp.float32).reshape(B, 1, Te),
      enc_out_flat, params["embedding"], p["self_bias"],
      p["ln1"], p["wqkv"], p["wo_self"], p["ln2"], p["wq"], p["wkv"], p["wo_cross"],
      p["ln3"], p["wi"], p["wff"], p["final_ln"])


def simctg_t5_forward(params, encoder_inputs, encoder_mask, decoder_inputs,
                      decoder_labels=None):
    # decoder_labels only feed the (unreturned) loss inside HF T5; forward() returns
    # (decoder_hidden_states[-1], logits), so labels are accepted but unused here.
    B, _ = encoder_inputs.shape
    Td = decoder_inputs.shape[1]
    enc_out = encoder_forward(params, encoder_inputs, encoder_mask)        # (B*Te, D)
    hid, logits = decoder_forward(params, decoder_inputs, enc_out, encoder_mask)
    return hid.reshape(B, Td, D_MODEL), logits.reshape(B, Td, VOCAB)


# --------------- static relative-position bias (precomputed at init) ---------------


def _rel_pos_bucket_np(relative_position, bidirectional, num_buckets, max_distance):
    rp = np.asarray(relative_position, dtype=np.int64)
    buckets = np.zeros_like(rp)
    if bidirectional:
        num_buckets //= 2
        buckets = buckets + (rp > 0).astype(np.int64) * num_buckets
        rp = np.abs(rp)
    else:
        rp = -np.minimum(rp, 0)
    max_exact = num_buckets // 2
    is_small = rp < max_exact
    rp_f = np.maximum(rp, 1).astype(np.float64)
    large = max_exact + (np.log(rp_f / max_exact) / np.log(max_distance / max_exact)
                         * (num_buckets - max_exact)).astype(np.int64)
    large = np.minimum(large, num_buckets - 1)
    return buckets + np.where(is_small, rp, large)


def _make_pos_bias(rel_emb, q_len, k_len, bidirectional):
    ctx = np.arange(q_len)[:, None]
    mem = np.arange(k_len)[None, :]
    buckets = _rel_pos_bucket_np(mem - ctx, bidirectional, NUM_BUCKETS, MAX_DISTANCE)
    vals = jnp.take(rel_emb, jnp.asarray(buckets, jnp.int32), axis=0)   # (q, k, H)
    return jnp.transpose(vals, (2, 0, 1)).astype(jnp.float32)           # (H, q, k)


# ------------------------- deterministic parameters -------------------------


def init_params(key, te, td):
    keys = iter(jax.random.split(key, 64))

    def dense(shape, scale=0.05):
        return jax.random.normal(next(keys), shape, jnp.float32) * scale

    def stack(shape, scale=0.05):
        return dense((N_LAYERS,) + shape, scale)

    def ones_stack():
        return jnp.ones((N_LAYERS, 1, D_MODEL), jnp.float32)

    emb = dense((VOCAB, D_MODEL), 1.0)
    enc_rel = dense((NUM_BUCKETS, N_HEADS), 0.1)
    dec_rel = dense((NUM_BUCKETS, N_HEADS), 0.1)
    causal = jnp.asarray(
        np.where(np.arange(td)[None, :] <= np.arange(td)[:, None], 0.0, NEG),
        jnp.float32)

    return {
        "embedding": emb,
        "encoder": {
            "pos_bias": _make_pos_bias(enc_rel, te, te, True),            # (H, Te, Te)
            "ln1": ones_stack(),
            "wqkv": stack((D_MODEL, 3 * INNER)),                          # fused Q|K|V
            "wo": stack((INNER, D_MODEL)),
            "ln2": ones_stack(),
            "wi": stack((D_MODEL, D_FF)),
            "wff": stack((D_FF, D_MODEL)),
            "final_ln": jnp.ones((1, D_MODEL), jnp.float32),
        },
        "decoder": {
            "self_bias": _make_pos_bias(dec_rel, td, td, False) + causal[None],
            "ln1": ones_stack(),
            "wqkv": stack((D_MODEL, 3 * INNER)),                          # fused Q|K|V
            "wo_self": stack((INNER, D_MODEL)),
            "ln2": ones_stack(),
            "wq": stack((D_MODEL, INNER)),
            "wkv": stack((D_MODEL, 2 * INNER)),                           # fused K|V
            "wo_cross": stack((INNER, D_MODEL)),
            "ln3": ones_stack(),
            "wi": stack((D_MODEL, D_FF)),
            "wff": stack((D_FF, D_MODEL)),
            "final_ln": jnp.ones((1, D_MODEL), jnp.float32),
        },
    }


# ------------------------------------ main ------------------------------------

if __name__ == "__main__":
    key = jax.random.PRNGKey(0)
    pkey, k1, k2 = jax.random.split(key, 3)

    B, Te, Td = 2, 8, 8
    params = init_params(pkey, Te, Td)

    encoder_inputs = jax.random.randint(k1, (B, Te), 0, VOCAB, dtype=jnp.int32)
    encoder_mask = jnp.array([[1] * Te, [1] * (Te - 3) + [0] * 3], dtype=jnp.int32)
    decoder_inputs = jax.random.randint(k2, (B, Td), 0, VOCAB, dtype=jnp.int32)
    decoder_labels = decoder_inputs  # unused by forward(), kept for signature parity

    fwd = jax.jit(simctg_t5_forward)
    last_hidden, logits = fwd(params, encoder_inputs, encoder_mask,
                              decoder_inputs, decoder_labels)
    jax.block_until_ready((last_hidden, logits))

    assert last_hidden.shape == (B, Td, D_MODEL)
    assert logits.shape == (B, Td, VOCAB)
    assert bool(jnp.all(jnp.isfinite(last_hidden))) and bool(jnp.all(jnp.isfinite(logits)))
    print("KERNEL_OK")
</pallas_src>

<mosaic_0001>
module attributes {stable_mosaic.version = 11 : i64} {
  func.func @_decoder_kernel(%arg0: i32, %arg1: memref<8x1xi32, #tpu.memory_space<vmem>>, %arg2: memref<1x1x8xf32, #tpu.memory_space<vmem>>, %arg3: memref<8x32xf32, #tpu.memory_space<vmem>>, %arg4: memref<128x32xf32, #tpu.memory_space<vmem>>, %arg5: memref<4x8x8xf32, #tpu.memory_space<vmem>>, %arg6: memref<2x1x32xf32, #tpu.memory_space<vmem>>, %arg7: memref<2x32x96xf32, #tpu.memory_space<vmem>>, %arg8: memref<2x32x32xf32, #tpu.memory_space<vmem>>, %arg9: memref<2x1x32xf32, #tpu.memory_space<vmem>>, %arg10: memref<2x32x32xf32, #tpu.memory_space<vmem>>, %arg11: memref<2x32x64xf32, #tpu.memory_space<vmem>>, %arg12: memref<2x32x32xf32, #tpu.memory_space<vmem>>, %arg13: memref<2x1x32xf32, #tpu.memory_space<vmem>>, %arg14: memref<2x32x64xf32, #tpu.memory_space<vmem>>, %arg15: memref<2x64x32xf32, #tpu.memory_space<vmem>>, %arg16: memref<1x32xf32, #tpu.memory_space<vmem>>, %arg17: memref<8x32xf32, #tpu.memory_space<vmem>>, %arg18: memref<8x128xf32, #tpu.memory_space<vmem>>) attributes {dimension_semantics = [#tpu.dimension_semantics<parallel>], iteration_bounds = array<i64: 2>, scalar_prefetch = 0 : i64, scratch_operands = 0 : i64, tpu.core_type = #tpu.core_type<tc>, window_params = [{transform_indices = @transform_0, window_bounds = array<i64: 8, 1>}, {transform_indices = @transform_1, window_bounds = array<i64: 1, 1, 8>}, {transform_indices = @transform_2, window_bounds = array<i64: 8, 32>}, {pipeline_mode = #tpu.pipeline_mode<synchronous>, transform_indices = @transform_3, window_bounds = array<i64: 128, 32>}, {pipeline_mode = #tpu.pipeline_mode<synchronous>, transform_indices = @transform_4, window_bounds = array<i64: 4, 8, 8>}, {pipeline_mode = #tpu.pipeline_mode<synchronous>, transform_indices = @transform_5, window_bounds = array<i64: 2, 1, 32>}, {pipeline_mode = #tpu.pipeline_mode<synchronous>, transform_indices = @transform_6, window_bounds = array<i64: 2, 32, 96>}, {pipeline_mode = #tpu.pipeline_mode<synchronous>, transform_indices = @transform_7, window_bounds = array<i64: 2, 32, 32>}, {pipeline_mode = #tpu.pipeline_mode<synchronous>, transform_indices = @transform_8, window_bounds = array<i64: 2, 1, 32>}, {pipeline_mode = #tpu.pipeline_mode<synchronous>, transform_indices = @transform_9, window_bounds = array<i64: 2, 32, 32>}, {pipeline_mode = #tpu.pipeline_mode<synchronous>, transform_indices = @transform_10, window_bounds = array<i64: 2, 32, 64>}, {pipeline_mode = #tpu.pipeline_mode<synchronous>, transform_indices = @transform_11, window_bounds = array<i64: 2, 32, 32>}, {pipeline_mode = #tpu.pipeline_mode<synchronous>, transform_indices = @transform_12, window_bounds = array<i64: 2, 1, 32>}, {pipeline_mode = #tpu.pipeline_mode<synchronous>, transform_indices = @transform_13, window_bounds = array<i64: 2, 32, 64>}, {pipeline_mode = #tpu.pipeline_mode<synchronous>, transform_indices = @transform_14, window_bounds = array<i64: 2, 64, 32>}, {pipeline_mode = #tpu.pipeline_mode<synchronous>, transform_indices = @transform_15, window_bounds = array<i64: 1, 32>}, {transform_indices = @transform_16, window_bounds = array<i64: 8, 32>}, {transform_indices = @transform_17, window_bounds = array<i64: 8, 128>}]} {
    %c0 = arith.constant 0 : index
    %c0_0 = arith.constant 0 : index
    %0 = vector.load %arg4[%c0, %c0_0] : memref<128x32xf32, #tpu.memory_space<vmem>>, vector<128x32xf32>
    %c0_1 = arith.constant 0 : index
    %c0_2 = arith.constant 0 : index
    %1 = vector.load %arg1[%c0_1, %c0_2] : memref<8x1xi32, #tpu.memory_space<vmem>>, vector<8x1xi32>
    %2 = tpu.iota {dimensions = array<i32: 1>} : vector<8x128xi32>
    %3 = vector.broadcast %1 : vector<8x1xi32> to vector<8x128xi32>
    %4 = arith.cmpi eq, %2, %3 : vector<8x128xi32>
    %5 = arith.extui %4 : vector<8x128xi1> to vector<8x128xi32>
    %6 = arith.sitofp %5 : vector<8x128xi32> to vector<8x128xf32>
    %cst = arith.constant dense<0.000000e+00> : vector<8x32xf32>
    %7 = tpu.matmul %6, %0, %cst {dimension_numbers = #tpu.dot_dimension_numbers<[1], [0], [0], [1], [0, 0, 1, 1], [], []>} : vector<8x128xf32>, vector<128x32xf32>, vector<8x32xf32> -> vector<8x32xf32>
    %c0_3 = arith.constant 0 : index
    %c0_4 = arith.constant 0 : index
    %8 = vector.load %arg3[%c0_3, %c0_4] : memref<8x32xf32, #tpu.memory_space<vmem>>, vector<8x32xf32>
    %c0_5 = arith.constant 0 : index
    %c0_6 = arith.constant 0 : index
    %c0_7 = arith.constant 0 : index
    %9 = vector.load %arg5[%c0_5, %c0_6, %c0_7] : memref<4x8x8xf32, #tpu.memory_space<vmem>>, vector<4x8x8xf32>
    %c0_8 = arith.constant 0 : index
    %c0_9 = arith.constant 0 : index
    %c0_10 = arith.constant 0 : index
    %10 = vector.load %arg2[%c0_8, %c0_9, %c0_10] : memref<1x1x8xf32, #tpu.memory_space<vmem>>, vector<1x1x8xf32>
    %11 = vector.shape_cast %10 : vector<1x1x8xf32> to vector<1x8xf32>
    %cst_11 = arith.constant 1.000000e+00 : f32
    %12 = vector.broadcast %cst_11 : f32 to vector<1x8xf32>
    %13 = arith.subf %12, %11 : vector<1x8xf32>
    %cst_12 = arith.constant -1.000000e+09 : f32
    %14 = vector.broadcast %cst_12 : f32 to vector<1x8xf32>
    %15 = arith.mulf %13, %14 : vector<1x8xf32>
    %c0_13 = arith.constant 0 : index
    %c0_14 = arith.constant 0 : index
    %c0_15 = arith.constant 0 : index
    %16 = vector.load %arg6[%c0_13, %c0_14, %c0_15] : memref<2x1x32xf32, #tpu.memory_space<vmem>>, vector<1x1x32xf32>
    %17 = vector.shape_cast %16 : vector<1x1x32xf32> to vector<1x32xf32>
    %18 = arith.mulf %7, %7 : vector<8x32xf32>
    %cst_16 = arith.constant dense<0.000000e+00> : vector<8xf32>
    %19 = vector.multi_reduction <add>, %18, %cst_16 [1] : vector<8x32xf32> to vector<8xf32>
    %20 = vector.shape_cast %19 : vector<8xf32> to vector<8x1xf32>
    %cst_17 = arith.constant 3.200000e+01 : f32
    %21 = vector.broadcast %cst_17 : f32 to vector<8x1xf32>
    %22 = arith.divf %20, %21 : vector<8x1xf32>
    %cst_18 = arith.constant 9.99999997E-7 : f32
    %23 = vector.broadcast %cst_18 : f32 to vector<8x1xf32>
    %24 = arith.addf %22, %23 : vector<8x1xf32>
    %25 = math.rsqrt %24 : vector<8x1xf32>
    %26 = vector.broadcast %25 : vector<8x1xf32> to vector<8x32xf32>
    %27 = arith.mulf %7, %26 : vector<8x32xf32>
    %28 = vector.broadcast %17 : vector<1x32xf32> to vector<8x32xf32>
    %29 = arith.mulf %27, %28 : vector<8x32xf32>
    %c0_19 = arith.constant 0 : index
    %c0_20 = arith.constant 0 : index
    %c0_21 = arith.constant 0 : index
    %30 = vector.load %arg7[%c0_19, %c0_20, %c0_21] : memref<2x32x96xf32, #tpu.memory_space<vmem>>, vector<1x32x96xf32>
    %31 = vector.shape_cast %30 : vector<1x32x96xf32> to vector<32x96xf32>
    %cst_22 = arith.constant dense<0.000000e+00> : vector<8x96xf32>
    %32 = tpu.matmul %29, %31, %cst_22 {dimension_numbers = #tpu.dot_dimension_numbers<[1], [0], [0], [1], [0, 0, 1, 1], [], []>} : vector<8x32xf32>, vector<32x96xf32>, vector<8x96xf32> -> vector<8x96xf32>
    %33 = vector.extract_strided_slice %32 {offsets = [0, 0], sizes = [8, 32], strides = [1, 1]} : vector<8x96xf32> to vector<8x32xf32>
    %34 = vector.extract_strided_slice %32 {offsets = [0, 32], sizes = [8, 32], strides = [1, 1]} : vector<8x96xf32> to vector<8x32xf32>
    %35 = vector.extract_strided_slice %32 {offsets = [0, 64], sizes = [8, 32], strides = [1, 1]} : vector<8x96xf32> to vector<8x32xf32>
    %c0_23 = arith.constant 0 : index
    %c0_24 = arith.constant 0 : index
    %c0_25 = arith.constant 0 : index
    %36 = vector.load %arg8[%c0_23, %c0_24, %c0_25] : memref<2x32x32xf32, #tpu.memory_space<vmem>>, vector<1x32x32xf32>
    %37 = vector.shape_cast %36 : vector<1x32x32xf32> to vector<32x32xf32>
    %38 = vector.extract_strided_slice %33 {offsets = [0, 0], sizes = [8, 8], strides = [1, 1]} : vector<8x32xf32> to vector<8x8xf32>
    %39 = vector.extract_strided_slice %34 {offsets = [0, 0], sizes = [8, 8], strides = [1, 1]} : vector<8x32xf32> to vector<8x8xf32>
    %40 = vector.extract_strided_slice %35 {offsets = [0, 0], sizes = [8, 8], strides = [1, 1]} : vector<8x32xf32> to vector<8x8xf32>
    %cst_26 = arith.constant dense<0.000000e+00> : vector<8x8xf32>
    %41 = tpu.matmul %38, %39, %cst_26 {dimension_numbers = #tpu.dot_dimension_numbers<[1], [1], [0], [0], [0, 0, 1, 0], [], []>} : vector<8x8xf32>, vector<8x8xf32>, vector<8x8xf32> -> vector<8x8xf32>
    %42 = vector.extract_strided_slice %9 {offsets = [0, 0, 0], sizes = [1, 8, 8], strides = [1, 1, 1]} : vector<4x8x8xf32> to vector<1x8x8xf32>
    %43 = vector.shape_cast %42 : vector<1x8x8xf32> to vector<8x8xf32>
    %44 = arith.addf %41, %43 : vector<8x8xf32>
    %cst_27 = arith.constant dense<0xFF800000> : vector<8xf32>
    %45 = vector.multi_reduction <maximumf>, %44, %cst_27 [1] : vector<8x8xf32> to vector<8xf32>
    %46 = vector.shape_cast %45 : vector<8xf32> to vector<8x1xf32>
    %47 = vector.broadcast %46 : vector<8x1xf32> to vector<8x8xf32>
    %48 = arith.subf %44, %47 : vector<8x8xf32>
    %49 = math.exp %48 : vector<8x8xf32>
    %cst_28 = arith.constant dense<0.000000e+00> : vector<8xf32>
    %50 = vector.multi_reduction <add>, %49, %cst_28 [1] : vector<8x8xf32> to vector<8xf32>
    %51 = vector.shape_cast %50 : vector<8xf32> to vector<8x1xf32>
    %52 = tpu.reciprocal %51 {approx = true} : vector<8x1xf32> -> vector<8x1xf32>
    %53 = vector.broadcast %52 : vector<8x1xf32> to vector<8x8xf32>
    %54 = arith.mulf %49, %53 : vector<8x8xf32>
    %cst_29 = arith.constant dense<0.000000e+00> : vector<8x8xf32>
    %55 = tpu.matmul %54, %40, %cst_29 {dimension_numbers = #tpu.dot_dimension_numbers<[1], [0], [0], [1], [0, 0, 1, 1], [], []>} : vector<8x8xf32>, vector<8x8xf32>, vector<8x8xf32> -> vector<8x8xf32>
    %56 = vector.extract_strided_slice %37 {offsets = [0, 0], sizes = [8, 32], strides = [1, 1]} : vector<32x32xf32> to vector<8x32xf32>
    %cst_30 = arith.constant dense<0.000000e+00> : vector<8x32xf32>
    %57 = tpu.matmul %55, %56, %cst_30 {dimension_numbers = #tpu.dot_dimension_numbers<[1], [0], [0], [1], [0, 0, 1, 1], [], []>} : vector<8x8xf32>, vector<8x32xf32>, vector<8x32xf32> -> vector<8x32xf32>
    %58 = vector.extract_strided_slice %33 {offsets = [0, 8], sizes = [8, 8], strides = [1, 1]} : vector<8x32xf32> to vector<8x8xf32>
    %59 = vector.extract_strided_slice %34 {offsets = [0, 8], sizes = [8, 8], strides = [1, 1]} : vector<8x32xf32> to vector<8x8xf32>
    %60 = vector.extract_strided_slice %35 {offsets = [0, 8], sizes = [8, 8], strides = [1, 1]} : vector<8x32xf32> to vector<8x8xf32>
    %cst_31 = arith.constant dense<0.000000e+00> : vector<8x8xf32>
    %61 = tpu.matmul %58, %59, %cst_31 {dimension_numbers = #tpu.dot_dimension_numbers<[1], [1], [0], [0], [0, 0, 1, 0], [], []>} : vector<8x8xf32>, vector<8x8xf32>, vector<8x8xf32> -> vector<8x8xf32>
    %62 = vector.extract_strided_slice %9 {offsets = [1, 0, 0], sizes = [1, 8, 8], strides = [1, 1, 1]} : vector<4x8x8xf32> to vector<1x8x8xf32>
    %63 = vector.shape_cast %62 : vector<1x8x8xf32> to vector<8x8xf32>
    %64 = arith.addf %61, %63 : vector<8x8xf32>
    %cst_32 = arith.constant dense<0xFF800000> : vector<8xf32>
    %65 = vector.multi_reduction <maximumf>, %64, %cst_32 [1] : vector<8x8xf32> to vector<8xf32>
    %66 = vector.shape_cast %65 : vector<8xf32> to vector<8x1xf32>
    %67 = vector.broadcast %66 : vector<8x1xf32> to vector<8x8xf32>
    %68 = arith.subf %64, %67 : vector<8x8xf32>
    %69 = math.exp %68 : vector<8x8xf32>
    %cst_33 = arith.constant dense<0.000000e+00> : vector<8xf32>
    %70 = vector.multi_reduction <add>, %69, %cst_33 [1] : vector<8x8xf32> to vector<8xf32>
    %71 = vector.shape_cast %70 : vector<8xf32> to vector<8x1xf32>
    %72 = tpu.reciprocal %71 {approx = true} : vector<8x1xf32> -> vector<8x1xf32>
    %73 = vector.broadcast %72 : vector<8x1xf32> to vector<8x8xf32>
    %74 = arith.mulf %69, %73 : vector<8x8xf32>
    %cst_34 = arith.constant dense<0.000000e+00> : vector<8x8xf32>
    %75 = tpu.matmul %74, %60, %cst_34 {dimension_numbers = #tpu.dot_dimension_numbers<[1], [0], [0], [1], [0, 0, 1, 1], [], []>} : vector<8x8xf32>, vector<8x8xf32>, vector<8x8xf32> -> vector<8x8xf32>
    %76 = vector.extract_strided_slice %37 {offsets = [8, 0], sizes = [8, 32], strides = [1, 1]} : vector<32x32xf32> to vector<8x32xf32>
    %cst_35 = arith.constant dense<0.000000e+00> : vector<8x32xf32>
    %77 = tpu.matmul %75, %76, %cst_35 {dimension_numbers = #tpu.dot_dimension_numbers<[1], [0], [0], [1], [0, 0, 1, 1], [], []>} : vector<8x8xf32>, vector<8x32xf32>, vector<8x32xf32> -> vector<8x32xf32>
    %78 = arith.addf %57, %77 : vector<8x32xf32>
    %79 = vector.extract_strided_slice %33 {offsets = [0, 16], sizes = [8, 8], strides = [1, 1]} : vector<8x32xf32> to vector<8x8xf32>
    %80 = vector.extract_strided_slice %34 {offsets = [0, 16], sizes = [8, 8], strides = [1, 1]} : vector<8x32xf32> to vector<8x8xf32>
    %81 = vector.extract_strided_slice %35 {offsets = [0, 16], sizes = [8, 8], strides = [1, 1]} : vector<8x32xf32> to vector<8x8xf32>
    %cst_36 = arith.constant dense<0.000000e+00> : vector<8x8xf32>
    %82 = tpu.matmul %79, %80, %cst_36 {dimension_numbers = #tpu.dot_dimension_numbers<[1], [1], [0], [0], [0, 0, 1, 0], [], []>} : vector<8x8xf32>, vector<8x8xf32>, vector<8x8xf32> -> vector<8x8xf32>
    %83 = vector.extract_strided_slice %9 {offsets = [2, 0, 0], sizes = [1, 8, 8], strides = [1, 1, 1]} : vector<4x8x8xf32> to vector<1x8x8xf32>
    %84 = vector.shape_cast %83 : vector<1x8x8xf32> to vector<8x8xf32>
    %85 = arith.addf %82, %84 : vector<8x8xf32>
    %cst_37 = arith.constant dense<0xFF800000> : vector<8xf32>
    %86 = vector.multi_reduction <maximumf>, %85, %cst_37 [1] : vector<8x8xf32> to vector<8xf32>
    %87 = vector.shape_cast %86 : vector<8xf32> to vector<8x1xf32>
    %88 = vector.broadcast %87 : vector<8x1xf32> to vector<8x8xf32>
    %89 = arith.subf %85, %88 : vector<8x8xf32>
    %90 = math.exp %89 : vector<8x8xf32>
    %cst_38 = arith.constant dense<0.000000e+00> : vector<8xf32>
    %91 = vector.multi_reduction <add>, %90, %cst_38 [1] : vector<8x8xf32> to vector<8xf32>
    %92 = vector.shape_cast %91 : vector<8xf32> to vector<8x1xf32>
    %93 = tpu.reciprocal %92 {approx = true} : vector<8x1xf32> -> vector<8x1xf32>
    %94 = vector.broadcast %93 : vector<8x1xf32> to vector<8x8xf32>
    %95 = arith.mulf %90, %94 : vector<8x8xf32>
    %cst_39 = arith.constant dense<0.000000e+00> : vector<8x8xf32>
    %96 = tpu.matmul %95, %81, %cst_39 {dimension_numbers = #tpu.dot_dimension_numbers<[1], [0], [0], [1], [0, 0, 1, 1], [], []>} : vector<8x8xf32>, vector<8x8xf32>, vector<8x8xf32> -> vector<8x8xf32>
    %97 = vector.extract_strided_slice %37 {offsets = [16, 0], sizes = [8, 32], strides = [1, 1]} : vector<32x32xf32> to vector<8x32xf32>
    %cst_40 = arith.constant dense<0.000000e+00> : vector<8x32xf32>
    %98 = tpu.matmul %96, %97, %cst_40 {dimension_numbers = #tpu.dot_dimension_numbers<[1], [0], [0], [1], [0, 0, 1, 1], [], []>} : vector<8x8xf32>, vector<8x32xf32>, vector<8x32xf32> -> vector<8x32xf32>
    %99 = arith.addf %78, %98 : vector<8x32xf32>
    %100 = vector.extract_strided_slice %33 {offsets = [0, 24], sizes = [8, 8], strides = [1, 1]} : vector<8x32xf32> to vector<8x8xf32>
    %101 = vector.extract_strided_slice %34 {offsets = [0, 24], sizes = [8, 8], strides = [1, 1]} : vector<8x32xf32> to vector<8x8xf32>
    %102 = vector.extract_strided_slice %35 {offsets = [0, 24], sizes = [8, 8], strides = [1, 1]} : vector<8x32xf32> to vector<8x8xf32>
    %cst_41 = arith.constant dense<0.000000e+00> : vector<8x8xf32>
    %103 = tpu.matmul %100, %101, %cst_41 {dimension_numbers = #tpu.dot_dimension_numbers<[1], [1], [0], [0], [0, 0, 1, 0], [], []>} : vector<8x8xf32>, vector<8x8xf32>, vector<8x8xf32> -> vector<8x8xf32>
    %104 = vector.extract_strided_slice %9 {offsets = [3, 0, 0], sizes = [1, 8, 8], strides = [1, 1, 1]} : vector<4x8x8xf32> to vector<1x8x8xf32>
    %105 = vector.shape_cast %104 : vector<1x8x8xf32> to vector<8x8xf32>
    %106 = arith.addf %103, %105 : vector<8x8xf32>
    %cst_42 = arith.constant dense<0xFF800000> : vector<8xf32>
    %107 = vector.multi_reduction <maximumf>, %106, %cst_42 [1] : vector<8x8xf32> to vector<8xf32>
    %108 = vector.shape_cast %107 : vector<8xf32> to vector<8x1xf32>
    %109 = vector.broadcast %108 : vector<8x1xf32> to vector<8x8xf32>
    %110 = arith.subf %106, %109 : vector<8x8xf32>
    %111 = math.exp %110 : vector<8x8xf32>
    %cst_43 = arith.constant dense<0.000000e+00> : vector<8xf32>
    %112 = vector.multi_reduction <add>, %111, %cst_43 [1] : vector<8x8xf32> to vector<8xf32>
    %113 = vector.shape_cast %112 : vector<8xf32> to vector<8x1xf32>
    %114 = tpu.reciprocal %113 {approx = true} : vector<8x1xf32> -> vector<8x1xf32>
    %115 = vector.broadcast %114 : vector<8x1xf32> to vector<8x8xf32>
    %116 = arith.mulf %111, %115 : vector<8x8xf32>
    %cst_44 = arith.constant dense<0.000000e+00> : vector<8x8xf32>
    %117 = tpu.matmul %116, %102, %cst_44 {dimension_numbers = #tpu.dot_dimension_numbers<[1], [0], [0], [1], [0, 0, 1, 1], [], []>} : vector<8x8xf32>, vector<8x8xf32>, vector<8x8xf32> -> vector<8x8xf32>
    %118 = vector.extract_strided_slice %37 {offsets = [24, 0], sizes = [8, 32], strides = [1, 1]} : vector<32x32xf32> to vector<8x32xf32>
    %cst_45 = arith.constant dense<0.000000e+00> : vector<8x32xf32>
    %119 = tpu.matmul %117, %118, %cst_45 {dimension_numbers = #tpu.dot_dimension_numbers<[1], [0], [0], [1], [0, 0, 1, 1], [], []>} : vector<8x8xf32>, vector<8x32xf32>, vector<8x32xf32> -> vector<8x32xf32>
    %120 = arith.addf %99, %119 : vector<8x32xf32>
    %121 = arith.addf %7, %120 : vector<8x32xf32>
    %c0_46 = arith.constant 0 : index
    %c0_47 = arith.constant 0 : index
    %c0_48 = arith.constant 0 : index
    %122 = vector.load %arg9[%c0_46, %c0_47, %c0_48] : memref<2x1x32xf32, #tpu.memory_space<vmem>>, vector<1x1x32xf32>
    %123 = vector.shape_cast %122 : vector<1x1x32xf32> to vector<1x32xf32>
    %124 = arith.mulf %121, %121 : vector<8x32xf32>
    %cst_49 = arith.constant dense<0.000000e+00> : vector<8xf32>
    %125 = vector.multi_reduction <add>, %124, %cst_49 [1] : vector<8x32xf32> to vector<8xf32>
    %126 = vector.shape_cast %125 : vector<8xf32> to vector<8x1xf32>
    %cst_50 = arith.constant 3.200000e+01 : f32
    %127 = vector.broadcast %cst_50 : f32 to vector<8x1xf32>
    %128 = arith.divf %126, %127 : vector<8x1xf32>
    %cst_51 = arith.constant 9.99999997E-7 : f32
    %129 = vector.broadcast %cst_51 : f32 to vector<8x1xf32>
    %130 = arith.addf %128, %129 : vector<8x1xf32>
    %131 = math.rsqrt %130 : vector<8x1xf32>
    %132 = vector.broadcast %131 : vector<8x1xf32> to vector<8x32xf32>
    %133 = arith.mulf %121, %132 : vector<8x32xf32>
    %134 = vector.broadcast %123 : vector<1x32xf32> to vector<8x32xf32>
    %135 = arith.mulf %133, %134 : vector<8x32xf32>
    %c0_52 = arith.constant 0 : index
    %c0_53 = arith.constant 0 : index
    %c0_54 = arith.constant 0 : index
    %136 = vector.load %arg10[%c0_52, %c0_53, %c0_54] : memref<2x32x32xf32, #tpu.memory_space<vmem>>, vector<1x32x32xf32>
    %137 = vector.shape_cast %136 : vector<1x32x32xf32> to vector<32x32xf32>
    %cst_55 = arith.constant dense<0.000000e+00> : vector<8x32xf32>
    %138 = tpu.matmul %135, %137, %cst_55 {dimension_numbers = #tpu.dot_dimension_numbers<[1], [0], [0], [1], [0, 0, 1, 1], [], []>} : vector<8x32xf32>, vector<32x32xf32>, vector<8x32xf32> -> vector<8x32xf32>
    %c0_56 = arith.constant 0 : index
    %c0_57 = arith.constant 0 : index
    %c0_58 = arith.constant 0 : index
    %139 = vector.load %arg11[%c0_56, %c0_57, %c0_58] : memref<2x32x64xf32, #tpu.memory_space<vmem>>, vector<1x32x64xf32>
    %140 = vector.shape_cast %139 : vector<1x32x64xf32> to vector<32x64xf32>
    %cst_59 = arith.constant dense<0.000000e+00> : vector<8x64xf32>
    %141 = tpu.matmul %8, %140, %cst_59 {dimension_numbers = #tpu.dot_dimension_numbers<[1], [0], [0], [1], [0, 0, 1, 1], [], []>} : vector<8x32xf32>, vector<32x64xf32>, vector<8x64xf32> -> vector<8x64xf32>
    %142 = vector.extract_strided_slice %141 {offsets = [0, 0], sizes = [8, 32], strides = [1, 1]} : vector<8x64xf32> to vector<8x32xf32>
    %143 = vector.extract_strided_slice %141 {offsets = [0, 32], sizes = [8, 32], strides = [1, 1]} : vector<8x64xf32> to vector<8x32xf32>
    %c0_60 = arith.constant 0 : index
    %c0_61 = arith.constant 0 : index
    %c0_62 = arith.constant 0 : index
    %144 = vector.load %arg12[%c0_60, %c0_61, %c0_62] : memref<2x32x32xf32, #tpu.memory_space<vmem>>, vector<1x32x32xf32>
    %145 = vector.shape_cast %144 : vector<1x32x32xf32> to vector<32x32xf32>
    %146 = vector.extract_strided_slice %138 {offsets = [0, 0], sizes = [8, 8], strides = [1, 1]} : vector<8x32xf32> to vector<8x8xf32>
    %147 = vector.extract_strided_slice %142 {offsets = [0, 0], sizes = [8, 8], strides = [1, 1]} : vector<8x32xf32> to vector<8x8xf32>
    %148 = vector.extract_strided_slice %143 {offsets = [0, 0], sizes = [8, 8], strides = [1, 1]} : vector<8x32xf32> to vector<8x8xf32>
    %cst_63 = arith.constant dense<0.000000e+00> : vector<8x8xf32>
    %149 = tpu.matmul %146, %147, %cst_63 {dimension_numbers = #tpu.dot_dimension_numbers<[1], [1], [0], [0], [0, 0, 1, 0], [], []>} : vector<8x8xf32>, vector<8x8xf32>, vector<8x8xf32> -> vector<8x8xf32>
    %150 = vector.broadcast %15 : vector<1x8xf32> to vector<8x8xf32>
    %151 = arith.addf %149, %150 : vector<8x8xf32>
    %cst_64 = arith.constant dense<0xFF800000> : vector<8xf32>
    %152 = vector.multi_reduction <maximumf>, %151, %cst_64 [1] : vector<8x8xf32> to vector<8xf32>
    %153 = vector.shape_cast %152 : vector<8xf32> to vector<8x1xf32>
    %154 = vector.broadcast %153 : vector<8x1xf32> to vector<8x8xf32>
    %155 = arith.subf %151, %154 : vector<8x8xf32>
    %156 = math.exp %155 : vector<8x8xf32>
    %cst_65 = arith.constant dense<0.000000e+00> : vector<8xf32>
    %157 = vector.multi_reduction <add>, %156, %cst_65 [1] : vector<8x8xf32> to vector<8xf32>
    %158 = vector.shape_cast %157 : vector<8xf32> to vector<8x1xf32>
    %159 = tpu.reciprocal %158 {approx = true} : vector<8x1xf32> -> vector<8x1xf32>
    %160 = vector.broadcast %159 : vector<8x1xf32> to vector<8x8xf32>
    %161 = arith.mulf %156, %160 : vector<8x8xf32>
    %cst_66 = arith.constant dense<0.000000e+00> : vector<8x8xf32>
    %162 = tpu.matmul %161, %148, %cst_66 {dimension_numbers = #tpu.dot_dimension_numbers<[1], [0], [0], [1], [0, 0, 1, 1], [], []>} : vector<8x8xf32>, vector<8x8xf32>, vector<8x8xf32> -> vector<8x8xf32>
    %163 = vector.extract_strided_slice %145 {offsets = [0, 0], sizes = [8, 32], strides = [1, 1]} : vector<32x32xf32> to vector<8x32xf32>
    %cst_67 = arith.constant dense<0.000000e+00> : vector<8x32xf32>
    %164 = tpu.matmul %162, %163, %cst_67 {dimension_numbers = #tpu.dot_dimension_numbers<[1], [0], [0], [1], [0, 0, 1, 1], [], []>} : vector<8x8xf32>, vector<8x32xf32>, vector<8x32xf32> -> vector<8x32xf32>
    %165 = vector.extract_strided_slice %138 {offsets = [0, 8], sizes = [8, 8], strides = [1, 1]} : vector<8x32xf32> to vector<8x8xf32>
    %166 = vector.extract_strided_slice %142 {offsets = [0, 8], sizes = [8, 8], strides = [1, 1]} : vector<8x32xf32> to vector<8x8xf32>
    %167 = vector.extract_strided_slice %143 {offsets = [0, 8], sizes = [8, 8], strides = [1, 1]} : vector<8x32xf32> to vector<8x8xf32>
    %cst_68 = arith.constant dense<0.000000e+00> : vector<8x8xf32>
    %168 = tpu.matmul %165, %166, %cst_68 {dimension_numbers = #tpu.dot_dimension_numbers<[1], [1], [0], [0], [0, 0, 1, 0], [], []>} : vector<8x8xf32>, vector<8x8xf32>, vector<8x8xf32> -> vector<8x8xf32>
    %169 = vector.broadcast %15 : vector<1x8xf32> to vector<8x8xf32>
    %170 = arith.addf %168, %169 : vector<8x8xf32>
    %cst_69 = arith.constant dense<0xFF800000> : vector<8xf32>
    %171 = vector.multi_reduction <maximumf>, %170, %cst_69 [1] : vector<8x8xf32> to vector<8xf32>
    %172 = vector.shape_cast %171 : vector<8xf32> to vector<8x1xf32>
    %173 = vector.broadcast %172 : vector<8x1xf32> to vector<8x8xf32>
    %174 = arith.subf %170, %173 : vector<8x8xf32>
    %175 = math.exp %174 : vector<8x8xf32>
    %cst_70 = arith.constant dense<0.000000e+00> : vector<8xf32>
    %176 = vector.multi_reduction <add>, %175, %cst_70 [1] : vector<8x8xf32> to vector<8xf32>
    %177 = vector.shape_cast %176 : vector<8xf32> to vector<8x1xf32>
    %178 = tpu.reciprocal %177 {approx = true} : vector<8x1xf32> -> vector<8x1xf32>
    %179 = vector.broadcast %178 : vector<8x1xf32> to vector<8x8xf32>
    %180 = arith.mulf %175, %179 : vector<8x8xf32>
    %cst_71 = arith.constant dense<0.000000e+00> : vector<8x8xf32>
    %181 = tpu.matmul %180, %167, %cst_71 {dimension_numbers = #tpu.dot_dimension_numbers<[1], [0], [0], [1], [0, 0, 1, 1], [], []>} : vector<8x8xf32>, vector<8x8xf32>, vector<8x8xf32> -> vector<8x8xf32>
    %182 = vector.extract_strided_slice %145 {offsets = [8, 0], sizes = [8, 32], strides = [1, 1]} : vector<32x32xf32> to vector<8x32xf32>
    %cst_72 = arith.constant dense<0.000000e+00> : vector<8x32xf32>
    %183 = tpu.matmul %181, %182, %cst_72 {dimension_numbers = #tpu.dot_dimension_numbers<[1], [0], [0], [1], [0, 0, 1, 1], [], []>} : vector<8x8xf32>, vector<8x32xf32>, vector<8x32xf32> -> vector<8x32xf32>
    %184 = arith.addf %164, %183 : vector<8x32xf32>
    %185 = vector.extract_strided_slice %138 {offsets = [0, 16], sizes = [8, 8], strides = [1, 1]} : vector<8x32xf32> to vector<8x8xf32>
    %186 = vector.extract_strided_slice %142 {offsets = [0, 16], sizes = [8, 8], strides = [1, 1]} : vector<8x32xf32> to vector<8x8xf32>
    %187 = vector.extract_strided_slice %143 {offsets = [0, 16], sizes = [8, 8], strides = [1, 1]} : vector<8x32xf32> to vector<8x8xf32>
    %cst_73 = arith.constant dense<0.000000e+00> : vector<8x8xf32>
    %188 = tpu.matmul %185, %186, %cst_73 {dimension_numbers = #tpu.dot_dimension_numbers<[1], [1], [0], [0], [0, 0, 1, 0], [], []>} : vector<8x8xf32>, vector<8x8xf32>, vector<8x8xf32> -> vector<8x8xf32>
    %189 = vector.broadcast %15 : vector<1x8xf32> to vector<8x8xf32>
    %190 = arith.addf %188, %189 : vector<8x8xf32>
    %cst_74 = arith.constant dense<0xFF800000> : vector<8xf32>
    %191 = vector.multi_reduction <maximumf>, %190, %cst_74 [1] : vector<8x8xf32> to vector<8xf32>
    %192 = vector.shape_cast %191 : vector<8xf32> to vector<8x1xf32>
    %193 = vector.broadcast %192 : vector<8x1xf32> to vector<8x8xf32>
    %194 = arith.subf %190, %193 : vector<8x8xf32>
    %195 = math.exp %194 : vector<8x8xf32>
    %cst_75 = arith.constant dense<0.000000e+00> : vector<8xf32>
    %196 = vector.multi_reduction <add>, %195, %cst_75 [1] : vector<8x8xf32> to vector<8xf32>
    %197 = vector.shape_cast %196 : vector<8xf32> to vector<8x1xf32>
    %198 = tpu.reciprocal %197 {approx = true} : vector<8x1xf32> -> vector<8x1xf32>
    %199 = vector.broadcast %198 : vector<8x1xf32> to vector<8x8xf32>
    %200 = arith.mulf %195, %199 : vector<8x8xf32>
    %cst_76 = arith.constant dense<0.000000e+00> : vector<8x8xf32>
    %201 = tpu.matmul %200, %187, %cst_76 {dimension_numbers = #tpu.dot_dimension_numbers<[1], [0], [0], [1], [0, 0, 1, 1], [], []>} : vector<8x8xf32>, vector<8x8xf32>, vector<8x8xf32> -> vector<8x8xf32>
    %202 = vector.extract_strided_slice %145 {offsets = [16, 0], sizes = [8, 32], strides = [1, 1]} : vector<32x32xf32> to vector<8x32xf32>
    %cst_77 = arith.constant dense<0.000000e+00> : vector<8x32xf32>
    %203 = tpu.matmul %201, %202, %cst_77 {dimension_numbers = #tpu.dot_dimension_numbers<[1], [0], [0], [1], [0, 0, 1, 1], [], []>} : vector<8x8xf32>, vector<8x32xf32>, vector<8x32xf32> -> vector<8x32xf32>
    %204 = arith.addf %184, %203 : vector<8x32xf32>
    %205 = vector.extract_strided_slice %138 {offsets = [0, 24], sizes = [8, 8], strides = [1, 1]} : vector<8x32xf32> to vector<8x8xf32>
    %206 = vector.extract_strided_slice %142 {offsets = [0, 24], sizes = [8, 8], strides = [1, 1]} : vector<8x32xf32> to vector<8x8xf32>
    %207 = vector.extract_strided_slice %143 {offsets = [0, 24], sizes = [8, 8], strides = [1, 1]} : vector<8x32xf32> to vector<8x8xf32>
    %cst_78 = arith.constant dense<0.000000e+00> : vector<8x8xf32>
    %208 = tpu.matmul %205, %206, %cst_78 {dimension_numbers = #tpu.dot_dimension_numbers<[1], [1], [0], [0], [0, 0, 1, 0], [], []>} : vector<8x8xf32>, vector<8x8xf32>, vector<8x8xf32> -> vector<8x8xf32>
    %209 = vector.broadcast %15 : vector<1x8xf32> to vector<8x8xf32>
    %210 = arith.addf %208, %209 : vector<8x8xf32>
    %cst_79 = arith.constant dense<0xFF800000> : vector<8xf32>
    %211 = vector.multi_reduction <maximumf>, %210, %cst_79 [1] : vector<8x8xf32> to vector<8xf32>
    %212 = vector.shape_cast %211 : vector<8xf32> to vector<8x1xf32>
    %213 = vector.broadcast %212 : vector<8x1xf32> to vector<8x8xf32>
    %214 = arith.subf %210, %213 : vector<8x8xf32>
    %215 = math.exp %214 : vector<8x8xf32>
    %cst_80 = arith.constant dense<0.000000e+00> : vector<8xf32>
    %216 = vector.multi_reduction <add>, %215, %cst_80 [1] : vector<8x8xf32> to vector<8xf32>
    %217 = vector.shape_cast %216 : vector<8xf32> to vector<8x1xf32>
    %218 = tpu.reciprocal %217 {approx = true} : vector<8x1xf32> -> vector<8x1xf32>
    %219 = vector.broadcast %218 : vector<8x1xf32> to vector<8x8xf32>
    %220 = arith.mulf %215, %219 : vector<8x8xf32>
    %cst_81 = arith.constant dense<0.000000e+00> : vector<8x8xf32>
    %221 = tpu.matmul %220, %207, %cst_81 {dimension_numbers = #tpu.dot_dimension_numbers<[1], [0], [0], [1], [0, 0, 1, 1], [], []>} : vector<8x8xf32>, vector<8x8xf32>, vector<8x8xf32> -> vector<8x8xf32>
    %222 = vector.extract_strided_slice %145 {offsets = [24, 0], sizes = [8, 32], strides = [1, 1]} : vector<32x32xf32> to vector<8x32xf32>
    %cst_82 = arith.constant dense<0.000000e+00> : vector<8x32xf32>
    %223 = tpu.matmul %221, %222, %cst_82 {dimension_numbers = #tpu.dot_dimension_numbers<[1], [0], [0], [1], [0, 0, 1, 1], [], []>} : vector<8x8xf32>, vector<8x32xf32>, vector<8x32xf32> -> vector<8x32xf32>
    %224 = arith.addf %204, %223 : vector<8x32xf32>
    %225 = arith.addf %121, %224 : vector<8x32xf32>
    %c0_83 = arith.constant 0 : index
    %c0_84 = arith.constant 0 : index
    %c0_85 = arith.constant 0 : index
    %226 = vector.load %arg13[%c0_83, %c0_84, %c0_85] : memref<2x1x32xf32, #tpu.memory_space<vmem>>, vector<1x1x32xf32>
    %227 = vector.shape_cast %226 : vector<1x1x32xf32> to vector<1x32xf32>
    %228 = arith.mulf %225, %225 : vector<8x32xf32>
    %cst_86 = arith.constant dense<0.000000e+00> : vector<8xf32>
    %229 = vector.multi_reduction <add>, %228, %cst_86 [1] : vector<8x32xf32> to vector<8xf32>
    %230 = vector.shape_cast %229 : vector<8xf32> to vector<8x1xf32>
    %cst_87 = arith.constant 3.200000e+01 : f32
    %231 = vector.broadcast %cst_87 : f32 to vector<8x1xf32>
    %232 = arith.divf %230, %231 : vector<8x1xf32>
    %cst_88 = arith.constant 9.99999997E-7 : f32
    %233 = vector.broadcast %cst_88 : f32 to vector<8x1xf32>
    %234 = arith.addf %232, %233 : vector<8x1xf32>
    %235 = math.rsqrt %234 : vector<8x1xf32>
    %236 = vector.broadcast %235 : vector<8x1xf32> to vector<8x32xf32>
    %237 = arith.mulf %225, %236 : vector<8x32xf32>
    %238 = vector.broadcast %227 : vector<1x32xf32> to vector<8x32xf32>
    %239 = arith.mulf %237, %238 : vector<8x32xf32>
    %c0_89 = arith.constant 0 : index
    %c0_90 = arith.constant 0 : index
    %c0_91 = arith.constant 0 : index
    %240 = vector.load %arg14[%c0_89, %c0_90, %c0_91] : memref<2x32x64xf32, #tpu.memory_space<vmem>>, vector<1x32x64xf32>
    %241 = vector.shape_cast %240 : vector<1x32x64xf32> to vector<32x64xf32>
    %cst_92 = arith.constant dense<0.000000e+00> : vector<8x64xf32>
    %242 = tpu.matmul %239, %241, %cst_92 {dimension_numbers = #tpu.dot_dimension_numbers<[1], [0], [0], [1], [0, 0, 1, 1], [], []>} : vector<8x32xf32>, vector<32x64xf32>, vector<8x64xf32> -> vector<8x64xf32>
    %cst_93 = arith.constant 0.000000e+00 : f32
    %243 = vector.broadcast %cst_93 : f32 to vector<8x64xf32>
    %244 = arith.maximumf %242, %243 : vector<8x64xf32>
    %c0_94 = arith.constant 0 : index
    %c0_95 = arith.constant 0 : index
    %c0_96 = arith.constant 0 : index
    %245 = vector.load %arg15[%c0_94, %c0_95, %c0_96] : memref<2x64x32xf32, #tpu.memory_space<vmem>>, vector<1x64x32xf32>
    %246 = vector.shape_cast %245 : vector<1x64x32xf32> to vector<64x32xf32>
    %cst_97 = arith.constant dense<0.000000e+00> : vector<8x32xf32>
    %247 = tpu.matmul %244, %246, %cst_97 {dimension_numbers = #tpu.dot_dimension_numbers<[1], [0], [0], [1], [0, 0, 1, 1], [], []>} : vector<8x64xf32>, vector<64x32xf32>, vector<8x32xf32> -> vector<8x32xf32>
    %248 = arith.addf %225, %247 : vector<8x32xf32>
    %c1 = arith.constant 1 : index
    %c0_98 = arith.constant 0 : index
    %c0_99 = arith.constant 0 : index
    %249 = vector.load %arg6[%c1, %c0_98, %c0_99] : memref<2x1x32xf32, #tpu.memory_space<vmem>>, vector<1x1x32xf32>
    %250 = vector.shape_cast %249 : vector<1x1x32xf32> to vector<1x32xf32>
    %251 = arith.mulf %248, %248 : vector<8x32xf32>
    %cst_100 = arith.constant dense<0.000000e+00> : vector<8xf32>
    %252 = vector.multi_reduction <add>, %251, %cst_100 [1] : vector<8x32xf32> to vector<8xf32>
    %253 = vector.shape_cast %252 : vector<8xf32> to vector<8x1xf32>
    %cst_101 = arith.constant 3.200000e+01 : f32
    %254 = vector.broadcast %cst_101 : f32 to vector<8x1xf32>
    %255 = arith.divf %253, %254 : vector<8x1xf32>
    %cst_102 = arith.constant 9.99999997E-7 : f32
    %256 = vector.broadcast %cst_102 : f32 to vector<8x1xf32>
    %257 = arith.addf %255, %256 : vector<8x1xf32>
    %258 = math.rsqrt %257 : vector<8x1xf32>
    %259 = vector.broadcast %258 : vector<8x1xf32> to vector<8x32xf32>
    %260 = arith.mulf %248, %259 : vector<8x32xf32>
    %261 = vector.broadcast %250 : vector<1x32xf32> to vector<8x32xf32>
    %262 = arith.mulf %260, %261 : vector<8x32xf32>
    %c1_103 = arith.constant 1 : index
    %c0_104 = arith.constant 0 : index
    %c0_105 = arith.constant 0 : index
    %263 = vector.load %arg7[%c1_103, %c0_104, %c0_105] : memref<2x32x96xf32, #tpu.memory_space<vmem>>, vector<1x32x96xf32>
    %264 = vector.shape_cast %263 : vector<1x32x96xf32> to vector<32x96xf32>
    %cst_106 = arith.constant dense<0.000000e+00> : vector<8x96xf32>
    %265 = tpu.matmul %262, %264, %cst_106 {dimension_numbers = #tpu.dot_dimension_numbers<[1], [0], [0], [1], [0, 0, 1, 1], [], []>} : vector<8x32xf32>, vector<32x96xf32>, vector<8x96xf32> -> vector<8x96xf32>
    %266 = vector.extract_strided_slice %265 {offsets = [0, 0], sizes = [8, 32], strides = [1, 1]} : vector<8x96xf32> to vector<8x32xf32>
    %267 = vector.extract_strided_slice %265 {offsets = [0, 32], sizes = [8, 32], strides = [1, 1]} : vector<8x96xf32> to vector<8x32xf32>
    %268 = vector.extract_strided_slice %265 {offsets = [0, 64], sizes = [8, 32], strides = [1, 1]} : vector<8x96xf32> to vector<8x32xf32>
    %c1_107 = arith.constant 1 : index
    %c0_108 = arith.constant 0 : index
    %c0_109 = arith.constant 0 : index
    %269 = vector.load %arg8[%c1_107, %c0_108, %c0_109] : memref<2x32x32xf32, #tpu.memory_space<vmem>>, vector<1x32x32xf32>
    %270 = vector.shape_cast %269 : vector<1x32x32xf32> to vector<32x32xf32>
    %271 = vector.extract_strided_slice %266 {offsets = [0, 0], sizes = [8, 8], strides = [1, 1]} : vector<8x32xf32> to vector<8x8xf32>
    %272 = vector.extract_strided_slice %267 {offsets = [0, 0], sizes = [8, 8], strides = [1, 1]} : vector<8x32xf32> to vector<8x8xf32>
    %273 = vector.extract_strided_slice %268 {offsets = [0, 0], sizes = [8, 8], strides = [1, 1]} : vector<8x32xf32> to vector<8x8xf32>
    %cst_110 = arith.constant dense<0.000000e+00> : vector<8x8xf32>
    %274 = tpu.matmul %271, %272, %cst_110 {dimension_numbers = #tpu.dot_dimension_numbers<[1], [1], [0], [0], [0, 0, 1, 0], [], []>} : vector<8x8xf32>, vector<8x8xf32>, vector<8x8xf32> -> vector<8x8xf32>
    %275 = vector.extract_strided_slice %9 {offsets = [0, 0, 0], sizes = [1, 8, 8], strides = [1, 1, 1]} : vector<4x8x8xf32> to vector<1x8x8xf32>
    %276 = vector.shape_cast %275 : vector<1x8x8xf32> to vector<8x8xf32>
    %277 = arith.addf %274, %276 : vector<8x8xf32>
    %cst_111 = arith.constant dense<0xFF800000> : vector<8xf32>
    %278 = vector.multi_reduction <maximumf>, %277, %cst_111 [1] : vector<8x8xf32> to vector<8xf32>
    %279 = vector.shape_cast %278 : vector<8xf32> to vector<8x1xf32>
    %280 = vector.broadcast %279 : vector<8x1xf32> to vector<8x8xf32>
    %281 = arith.subf %277, %280 : vector<8x8xf32>
    %282 = math.exp %281 : vector<8x8xf32>
    %cst_112 = arith.constant dense<0.000000e+00> : vector<8xf32>
    %283 = vector.multi_reduction <add>, %282, %cst_112 [1] : vector<8x8xf32> to vector<8xf32>
    %284 = vector.shape_cast %283 : vector<8xf32> to vector<8x1xf32>
    %285 = tpu.reciprocal %284 {approx = true} : vector<8x1xf32> -> vector<8x1xf32>
    %286 = vector.broadcast %285 : vector<8x1xf32> to vector<8x8xf32>
    %287 = arith.mulf %282, %286 : vector<8x8xf32>
    %cst_113 = arith.constant dense<0.000000e+00> : vector<8x8xf32>
    %288 = tpu.matmul %287, %273, %cst_113 {dimension_numbers = #tpu.dot_dimension_numbers<[1], [0], [0], [1], [0, 0, 1, 1], [], []>} : vector<8x8xf32>, vector<8x8xf32>, vector<8x8xf32> -> vector<8x8xf32>
    %289 = vector.extract_strided_slice %270 {offsets = [0, 0], sizes = [8, 32], strides = [1, 1]} : vector<32x32xf32> to vector<8x32xf32>
    %cst_114 = arith.constant dense<0.000000e+00> : vector<8x32xf32>
    %290 = tpu.matmul %288, %289, %cst_114 {dimension_numbers = #tpu.dot_dimension_numbers<[1], [0], [0], [1], [0, 0, 1, 1], [], []>} : vector<8x8xf32>, vector<8x32xf32>, vector<8x32xf32> -> vector<8x32xf32>
    %291 = vector.extract_strided_slice %266 {offsets = [0, 8], sizes = [8, 8], strides = [1, 1]} : vector<8x32xf32> to vector<8x8xf32>
    %292 = vector.extract_strided_slice %267 {offsets = [0, 8], sizes = [8, 8], strides = [1, 1]} : vector<8x32xf32> to vector<8x8xf32>
    %293 = vector.extract_strided_slice %268 {offsets = [0, 8], sizes = [8, 8], strides = [1, 1]} : vector<8x32xf32> to vector<8x8xf32>
    %cst_115 = arith.constant dense<0.000000e+00> : vector<8x8xf32>
    %294 = tpu.matmul %291, %292, %cst_115 {dimension_numbers = #tpu.dot_dimension_numbers<[1], [1], [0], [0], [0, 0, 1, 0], [], []>} : vector<8x8xf32>, vector<8x8xf32>, vector<8x8xf32> -> vector<8x8xf32>
    %295 = vector.extract_strided_slice %9 {offsets = [1, 0, 0], sizes = [1, 8, 8], strides = [1, 1, 1]} : vector<4x8x8xf32> to vector<1x8x8xf32>
    %296 = vector.shape_cast %295 : vector<1x8x8xf32> to vector<8x8xf32>
    %297 = arith.addf %294, %296 : vector<8x8xf32>
    %cst_116 = arith.constant dense<0xFF800000> : vector<8xf32>
    %298 = vector.multi_reduction <maximumf>, %297, %cst_116 [1] : vector<8x8xf32> to vector<8xf32>
    %299 = vector.shape_cast %298 : vector<8xf32> to vector<8x1xf32>
    %300 = vector.broadcast %299 : vector<8x1xf32> to vector<8x8xf32>
    %301 = arith.subf %297, %300 : vector<8x8xf32>
    %302 = math.exp %301 : vector<8x8xf32>
    %cst_117 = arith.constant dense<0.000000e+00> : vector<8xf32>
    %303 = vector.multi_reduction <add>, %302, %cst_117 [1] : vector<8x8xf32> to vector<8xf32>
    %304 = vector.shape_cast %303 : vector<8xf32> to vector<8x1xf32>
    %305 = tpu.reciprocal %304 {approx = true} : vector<8x1xf32> -> vector<8x1xf32>
    %306 = vector.broadcast %305 : vector<8x1xf32> to vector<8x8xf32>
    %307 = arith.mulf %302, %306 : vector<8x8xf32>
    %cst_118 = arith.constant dense<0.000000e+00> : vector<8x8xf32>
    %308 = tpu.matmul %307, %293, %cst_118 {dimension_numbers = #tpu.dot_dimension_numbers<[1], [0], [0], [1], [0, 0, 1, 1], [], []>} : vector<8x8xf32>, vector<8x8xf32>, vector<8x8xf32> -> vector<8x8xf32>
    %309 = vector.extract_strided_slice %270 {offsets = [8, 0], sizes = [8, 32], strides = [1, 1]} : vector<32x32xf32> to vector<8x32xf32>
    %cst_119 = arith.constant dense<0.000000e+00> : vector<8x32xf32>
    %310 = tpu.matmul %308, %309, %cst_119 {dimension_numbers = #tpu.dot_dimension_numbers<[1], [0], [0], [1], [0, 0, 1, 1], [], []>} : vector<8x8xf32>, vector<8x32xf32>, vector<8x32xf32> -> vector<8x32xf32>
    %311 = arith.addf %290, %310 : vector<8x32xf32>
    %312 = vector.extract_strided_slice %266 {offsets = [0, 16], sizes = [8, 8], strides = [1, 1]} : vector<8x32xf32> to vector<8x8xf32>
    %313 = vector.extract_strided_slice %267 {offsets = [0, 16], sizes = [8, 8], strides = [1, 1]} : vector<8x32xf32> to vector<8x8xf32>
    %314 = vector.extract_strided_slice %268 {offsets = [0, 16], sizes = [8, 8], strides = [1, 1]} : vector<8x32xf32> to vector<8x8xf32>
    %cst_120 = arith.constant dense<0.000000e+00> : vector<8x8xf32>
    %315 = tpu.matmul %312, %313, %cst_120 {dimension_numbers = #tpu.dot_dimension_numbers<[1], [1], [0], [0], [0, 0, 1, 0], [], []>} : vector<8x8xf32>, vector<8x8xf32>, vector<8x8xf32> -> vector<8x8xf32>
    %316 = vector.extract_strided_slice %9 {offsets = [2, 0, 0], sizes = [1, 8, 8], strides = [1, 1, 1]} : vector<4x8x8xf32> to vector<1x8x8xf32>
    %317 = vector.shape_cast %316 : vector<1x8x8xf32> to vector<8x8xf32>
    %318 = arith.addf %315, %317 : vector<8x8xf32>
    %cst_121 = arith.constant dense<0xFF800000> : vector<8xf32>
    %319 = vector.multi_reduction <maximumf>, %318, %cst_121 [1] : vector<8x8xf32> to vector<8xf32>
    %320 = vector.shape_cast %319 : vector<8xf32> to vector<8x1xf32>
    %321 = vector.broadcast %320 : vector<8x1xf32> to vector<8x8xf32>
    %322 = arith.subf %318, %321 : vector<8x8xf32>
    %323 = math.exp %322 : vector<8x8xf32>
    %cst_122 = arith.constant dense<0.000000e+00> : vector<8xf32>
    %324 = vector.multi_reduction <add>, %323, %cst_122 [1] : vector<8x8xf32> to vector<8xf32>
    %325 = vector.shape_cast %324 : vector<8xf32> to vector<8x1xf32>
    %326 = tpu.reciprocal %325 {approx = true} : vector<8x1xf32> -> vector<8x1xf32>
    %327 = vector.broadcast %326 : vector<8x1xf32> to vector<8x8xf32>
    %328 = arith.mulf %323, %327 : vector<8x8xf32>
    %cst_123 = arith.constant dense<0.000000e+00> : vector<8x8xf32>
    %329 = tpu.matmul %328, %314, %cst_123 {dimension_numbers = #tpu.dot_dimension_numbers<[1], [0], [0], [1], [0, 0, 1, 1], [], []>} : vector<8x8xf32>, vector<8x8xf32>, vector<8x8xf32> -> vector<8x8xf32>
    %330 = vector.extract_strided_slice %270 {offsets = [16, 0], sizes = [8, 32], strides = [1, 1]} : vector<32x32xf32> to vector<8x32xf32>
    %cst_124 = arith.constant dense<0.000000e+00> : vector<8x32xf32>
    %331 = tpu.matmul %329, %330, %cst_124 {dimension_numbers = #tpu.dot_dimension_numbers<[1], [0], [0], [1], [0, 0, 1, 1], [], []>} : vector<8x8xf32>, vector<8x32xf32>, vector<8x32xf32> -> vector<8x32xf32>
    %332 = arith.addf %311, %331 : vector<8x32xf32>
    %333 = vector.extract_strided_slice %266 {offsets = [0, 24], sizes = [8, 8], strides = [1, 1]} : vector<8x32xf32> to vector<8x8xf32>
    %334 = vector.extract_strided_slice %267 {offsets = [0, 24], sizes = [8, 8], strides = [1, 1]} : vector<8x32xf32> to vector<8x8xf32>
    %335 = vector.extract_strided_slice %268 {offsets = [0, 24], sizes = [8, 8], strides = [1, 1]} : vector<8x32xf32> to vector<8x8xf32>
    %cst_125 = arith.constant dense<0.000000e+00> : vector<8x8xf32>
    %336 = tpu.matmul %333, %334, %cst_125 {dimension_numbers = #tpu.dot_dimension_numbers<[1], [1], [0], [0], [0, 0, 1, 0], [], []>} : vector<8x8xf32>, vector<8x8xf32>, vector<8x8xf32> -> vector<8x8xf32>
    %337 = vector.extract_strided_slice %9 {offsets = [3, 0, 0], sizes = [1, 8, 8], strides = [1, 1, 1]} : vector<4x8x8xf32> to vector<1x8x8xf32>
    %338 = vector.shape_cast %337 : vector<1x8x8xf32> to vector<8x8xf32>
    %339 = arith.addf %336, %338 : vector<8x8xf32>
    %cst_126 = arith.constant dense<0xFF800000> : vector<8xf32>
    %340 = vector.multi_reduction <maximumf>, %339, %cst_126 [1] : vector<8x8xf32> to vector<8xf32>
    %341 = vector.shape_cast %340 : vector<8xf32> to vector<8x1xf32>
    %342 = vector.broadcast %341 : vector<8x1xf32> to vector<8x8xf32>
    %343 = arith.subf %339, %342 : vector<8x8xf32>
    %344 = math.exp %343 : vector<8x8xf32>
    %cst_127 = arith.constant dense<0.000000e+00> : vector<8xf32>
    %345 = vector.multi_reduction <add>, %344, %cst_127 [1] : vector<8x8xf32> to vector<8xf32>
    %346 = vector.shape_cast %345 : vector<8xf32> to vector<8x1xf32>
    %347 = tpu.reciprocal %346 {approx = true} : vector<8x1xf32> -> vector<8x1xf32>
    %348 = vector.broadcast %347 : vector<8x1xf32> to vector<8x8xf32>
    %349 = arith.mulf %344, %348 : vector<8x8xf32>
    %cst_128 = arith.constant dense<0.000000e+00> : vector<8x8xf32>
    %350 = tpu.matmul %349, %335, %cst_128 {dimension_numbers = #tpu.dot_dimension_numbers<[1], [0], [0], [1], [0, 0, 1, 1], [], []>} : vector<8x8xf32>, vector<8x8xf32>, vector<8x8xf32> -> vector<8x8xf32>
    %351 = vector.extract_strided_slice %270 {offsets = [24, 0], sizes = [8, 32], strides = [1, 1]} : vector<32x32xf32> to vector<8x32xf32>
    %cst_129 = arith.constant dense<0.000000e+00> : vector<8x32xf32>
    %352 = tpu.matmul %350, %351, %cst_129 {dimension_numbers = #tpu.dot_dimension_numbers<[1], [0], [0], [1], [0, 0, 1, 1], [], []>} : vector<8x8xf32>, vector<8x32xf32>, vector<8x32xf32> -> vector<8x32xf32>
    %353 = arith.addf %332, %352 : vector<8x32xf32>
    %354 = arith.addf %248, %353 : vector<8x32xf32>
    %c1_130 = arith.constant 1 : index
    %c0_131 = arith.constant 0 : index
    %c0_132 = arith.constant 0 : index
    %355 = vector.load %arg9[%c1_130, %c0_131, %c0_132] : memref<2x1x32xf32, #tpu.memory_space<vmem>>, vector<1x1x32xf32>
    %356 = vector.shape_cast %355 : vector<1x1x32xf32> to vector<1x32xf32>
    %357 = arith.mulf %354, %354 : vector<8x32xf32>
    %cst_133 = arith.constant dense<0.000000e+00> : vector<8xf32>
    %358 = vector.multi_reduction <add>, %357, %cst_133 [1] : vector<8x32xf32> to vector<8xf32>
    %359 = vector.shape_cast %358 : vector<8xf32> to vector<8x1xf32>
    %cst_134 = arith.constant 3.200000e+01 : f32
    %360 = vector.broadcast %cst_134 : f32 to vector<8x1xf32>
    %361 = arith.divf %359, %360 : vector<8x1xf32>
    %cst_135 = arith.constant 9.99999997E-7 : f32
    %362 = vector.broadcast %cst_135 : f32 to vector<8x1xf32>
    %363 = arith.addf %361, %362 : vector<8x1xf32>
    %364 = math.rsqrt %363 : vector<8x1xf32>
    %365 = vector.broadcast %364 : vector<8x1xf32> to vector<8x32xf32>
    %366 = arith.mulf %354, %365 : vector<8x32xf32>
    %367 = vector.broadcast %356 : vector<1x32xf32> to vector<8x32xf32>
    %368 = arith.mulf %366, %367 : vector<8x32xf32>
    %c1_136 = arith.constant 1 : index
    %c0_137 = arith.constant 0 : index
    %c0_138 = arith.constant 0 : index
    %369 = vector.load %arg10[%c1_136, %c0_137, %c0_138] : memref<2x32x32xf32, #tpu.memory_space<vmem>>, vector<1x32x32xf32>
    %370 = vector.shape_cast %369 : vector<1x32x32xf32> to vector<32x32xf32>
    %cst_139 = arith.constant dense<0.000000e+00> : vector<8x32xf32>
    %371 = tpu.matmul %368, %370, %cst_139 {dimension_numbers = #tpu.dot_dimension_numbers<[1], [0], [0], [1], [0, 0, 1, 1], [], []>} : vector<8x32xf32>, vector<32x32xf32>, vector<8x32xf32> -> vector<8x32xf32>
    %c1_140 = arith.constant 1 : index
    %c0_141 = arith.constant 0 : index
    %c0_142 = arith.constant 0 : index
    %372 = vector.load %arg11[%c1_140, %c0_141, %c0_142] : memref<2x32x64xf32, #tpu.memory_space<vmem>>, vector<1x32x64xf32>
    %373 = vector.shape_cast %372 : vector<1x32x64xf32> to vector<32x64xf32>
    %cst_143 = arith.constant dense<0.000000e+00> : vector<8x64xf32>
    %374 = tpu.matmul %8, %373, %cst_143 {dimension_numbers = #tpu.dot_dimension_numbers<[1], [0], [0], [1], [0, 0, 1, 1], [], []>} : vector<8x32xf32>, vector<32x64xf32>, vector<8x64xf32> -> vector<8x64xf32>
    %375 = vector.extract_strided_slice %374 {offsets = [0, 0], sizes = [8, 32], strides = [1, 1]} : vector<8x64xf32> to vector<8x32xf32>
    %376 = vector.extract_strided_slice %374 {offsets = [0, 32], sizes = [8, 32], strides = [1, 1]} : vector<8x64xf32> to vector<8x32xf32>
    %c1_144 = arith.constant 1 : index
    %c0_145 = arith.constant 0 : index
    %c0_146 = arith.constant 0 : index
    %377 = vector.load %arg12[%c1_144, %c0_145, %c0_146] : memref<2x32x32xf32, #tpu.memory_space<vmem>>, vector<1x32x32xf32>
    %378 = vector.shape_cast %377 : vector<1x32x32xf32> to vector<32x32xf32>
    %379 = vector.extract_strided_slice %371 {offsets = [0, 0], sizes = [8, 8], strides = [1, 1]} : vector<8x32xf32> to vector<8x8xf32>
    %380 = vector.extract_strided_slice %375 {offsets = [0, 0], sizes = [8, 8], strides = [1, 1]} : vector<8x32xf32> to vector<8x8xf32>
    %381 = vector.extract_strided_slice %376 {offsets = [0, 0], sizes = [8, 8], strides = [1, 1]} : vector<8x32xf32> to vector<8x8xf32>
    %cst_147 = arith.constant dense<0.000000e+00> : vector<8x8xf32>
    %382 = tpu.matmul %379, %380, %cst_147 {dimension_numbers = #tpu.dot_dimension_numbers<[1], [1], [0], [0], [0, 0, 1, 0], [], []>} : vector<8x8xf32>, vector<8x8xf32>, vector<8x8xf32> -> vector<8x8xf32>
    %383 = vector.broadcast %15 : vector<1x8xf32> to vector<8x8xf32>
    %384 = arith.addf %382, %383 : vector<8x8xf32>
    %cst_148 = arith.constant dense<0xFF800000> : vector<8xf32>
    %385 = vector.multi_reduction <maximumf>, %384, %cst_148 [1] : vector<8x8xf32> to vector<8xf32>
    %386 = vector.shape_cast %385 : vector<8xf32> to vector<8x1xf32>
    %387 = vector.broadcast %386 : vector<8x1xf32> to vector<8x8xf32>
    %388 = arith.subf %384, %387 : vector<8x8xf32>
    %389 = math.exp %388 : vector<8x8xf32>
    %cst_149 = arith.constant dense<0.000000e+00> : vector<8xf32>
    %390 = vector.multi_reduction <add>, %389, %cst_149 [1] : vector<8x8xf32> to vector<8xf32>
    %391 = vector.shape_cast %390 : vector<8xf32> to vector<8x1xf32>
    %392 = tpu.reciprocal %391 {approx = true} : vector<8x1xf32> -> vector<8x1xf32>
    %393 = vector.broadcast %392 : vector<8x1xf32> to vector<8x8xf32>
    %394 = arith.mulf %389, %393 : vector<8x8xf32>
    %cst_150 = arith.constant dense<0.000000e+00> : vector<8x8xf32>
    %395 = tpu.matmul %394, %381, %cst_150 {dimension_numbers = #tpu.dot_dimension_numbers<[1], [0], [0], [1], [0, 0, 1, 1], [], []>} : vector<8x8xf32>, vector<8x8xf32>, vector<8x8xf32> -> vector<8x8xf32>
    %396 = vector.extract_strided_slice %378 {offsets = [0, 0], sizes = [8, 32], strides = [1, 1]} : vector<32x32xf32> to vector<8x32xf32>
    %cst_151 = arith.constant dense<0.000000e+00> : vector<8x32xf32>
    %397 = tpu.matmul %395, %396, %cst_151 {dimension_numbers = #tpu.dot_dimension_numbers<[1], [0], [0], [1], [0, 0, 1, 1], [], []>} : vector<8x8xf32>, vector<8x32xf32>, vector<8x32xf32> -> vector<8x32xf32>
    %398 = vector.extract_strided_slice %371 {offsets = [0, 8], sizes = [8, 8], strides = [1, 1]} : vector<8x32xf32> to vector<8x8xf32>
    %399 = vector.extract_strided_slice %375 {offsets = [0, 8], sizes = [8, 8], strides = [1, 1]} : vector<8x32xf32> to vector<8x8xf32>
    %400 = vector.extract_strided_slice %376 {offsets = [0, 8], sizes = [8, 8], strides = [1, 1]} : vector<8x32xf32> to vector<8x8xf32>
    %cst_152 = arith.constant dense<0.000000e+00> : vector<8x8xf32>
    %401 = tpu.matmul %398, %399, %cst_152 {dimension_numbers = #tpu.dot_dimension_numbers<[1], [1], [0], [0], [0, 0, 1, 0], [], []>} : vector<8x8xf32>, vector<8x8xf32>, vector<8x8xf32> -> vector<8x8xf32>
    %402 = vector.broadcast %15 : vector<1x8xf32> to vector<8x8xf32>
    %403 = arith.addf %401, %402 : vector<8x8xf32>
    %cst_153 = arith.constant dense<0xFF800000> : vector<8xf32>
    %404 = vector.multi_reduction <maximumf>, %403, %cst_153 [1] : vector<8x8xf32> to vector<8xf32>
    %405 = vector.shape_cast %404 : vector<8xf32> to vector<8x1xf32>
    %406 = vector.broadcast %405 : vector<8x1xf32> to vector<8x8xf32>
    %407 = arith.subf %403, %406 : vector<8x8xf32>
    %408 = math.exp %407 : vector<8x8xf32>
    %cst_154 = arith.constant dense<0.000000e+00> : vector<8xf32>
    %409 = vector.multi_reduction <add>, %408, %cst_154 [1] : vector<8x8xf32> to vector<8xf32>
    %410 = vector.shape_cast %409 : vector<8xf32> to vector<8x1xf32>
    %411 = tpu.reciprocal %410 {approx = true} : vector<8x1xf32> -> vector<8x1xf32>
    %412 = vector.broadcast %411 : vector<8x1xf32> to vector<8x8xf32>
    %413 = arith.mulf %408, %412 : vector<8x8xf32>
    %cst_155 = arith.constant dense<0.000000e+00> : vector<8x8xf32>
    %414 = tpu.matmul %413, %400, %cst_155 {dimension_numbers = #tpu.dot_dimension_numbers<[1], [0], [0], [1], [0, 0, 1, 1], [], []>} : vector<8x8xf32>, vector<8x8xf32>, vector<8x8xf32> -> vector<8x8xf32>
    %415 = vector.extract_strided_slice %378 {offsets = [8, 0], sizes = [8, 32], strides = [1, 1]} : vector<32x32xf32> to vector<8x32xf32>
    %cst_156 = arith.constant dense<0.000000e+00> : vector<8x32xf32>
    %416 = tpu.matmul %414, %415, %cst_156 {dimension_numbers = #tpu.dot_dimension_numbers<[1], [0], [0], [1], [0, 0, 1, 1], [], []>} : vector<8x8xf32>, vector<8x32xf32>, vector<8x32xf32> -> vector<8x32xf32>
    %417 = arith.addf %397, %416 : vector<8x32xf32>
    %418 = vector.extract_strided_slice %371 {offsets = [0, 16], sizes = [8, 8], strides = [1, 1]} : vector<8x32xf32> to vector<8x8xf32>
    %419 = vector.extract_strided_slice %375 {offsets = [0, 16], sizes = [8, 8], strides = [1, 1]} : vector<8x32xf32> to vector<8x8xf32>
    %420 = vector.extract_strided_slice %376 {offsets = [0, 16], sizes = [8, 8], strides = [1, 1]} : vector<8x32xf32> to vector<8x8xf32>
    %cst_157 = arith.constant dense<0.000000e+00> : vector<8x8xf32>
    %421 = tpu.matmul %418, %419, %cst_157 {dimension_numbers = #tpu.dot_dimension_numbers<[1], [1], [0], [0], [0, 0, 1, 0], [], []>} : vector<8x8xf32>, vector<8x8xf32>, vector<8x8xf32> -> vector<8x8xf32>
    %422 = vector.broadcast %15 : vector<1x8xf32> to vector<8x8xf32>
    %423 = arith.addf %421, %422 : vector<8x8xf32>
    %cst_158 = arith.constant dense<0xFF800000> : vector<8xf32>
    %424 = vector.multi_reduction <maximumf>, %423, %cst_158 [1] : vector<8x8xf32> to vector<8xf32>
    %425 = vector.shape_cast %424 : vector<8xf32> to vector<8x1xf32>
    %426 = vector.broadcast %425 : vector<8x1xf32> to vector<8x8xf32>
    %427 = arith.subf %423, %426 : vector<8x8xf32>
    %428 = math.exp %427 : vector<8x8xf32>
    %cst_159 = arith.constant dense<0.000000e+00> : vector<8xf32>
    %429 = vector.multi_reduction <add>, %428, %cst_159 [1] : vector<8x8xf32> to vector<8xf32>
    %430 = vector.shape_cast %429 : vector<8xf32> to vector<8x1xf32>
    %431 = tpu.reciprocal %430 {approx = true} : vector<8x1xf32> -> vector<8x1xf32>
    %432 = vector.broadcast %431 : vector<8x1xf32> to vector<8x8xf32>
    %433 = arith.mulf %428, %432 : vector<8x8xf32>
    %cst_160 = arith.constant dense<0.000000e+00> : vector<8x8xf32>
    %434 = tpu.matmul %433, %420, %cst_160 {dimension_numbers = #tpu.dot_dimension_numbers<[1], [0], [0], [1], [0, 0, 1, 1], [], []>} : vector<8x8xf32>, vector<8x8xf32>, vector<8x8xf32> -> vector<8x8xf32>
    %435 = vector.extract_strided_slice %378 {offsets = [16, 0], sizes = [8, 32], strides = [1, 1]} : vector<32x32xf32> to vector<8x32xf32>
    %cst_161 = arith.constant dense<0.000000e+00> : vector<8x32xf32>
    %436 = tpu.matmul %434, %435, %cst_161 {dimension_numbers = #tpu.dot_dimension_numbers<[1], [0], [0], [1], [0, 0, 1, 1], [], []>} : vector<8x8xf32>, vector<8x32xf32>, vector<8x32xf32> -> vector<8x32xf32>
    %437 = arith.addf %417, %436 : vector<8x32xf32>
    %438 = vector.extract_strided_slice %371 {offsets = [0, 24], sizes = [8, 8], strides = [1, 1]} : vector<8x32xf32> to vector<8x8xf32>
    %439 = vector.extract_strided_slice %375 {offsets = [0, 24], sizes = [8, 8], strides = [1, 1]} : vector<8x32xf32> to vector<8x8xf32>
    %440 = vector.extract_strided_slice %376 {offsets = [0, 24], sizes = [8, 8], strides = [1, 1]} : vector<8x32xf32> to vector<8x8xf32>
    %cst_162 = arith.constant dense<0.000000e+00> : vector<8x8xf32>
    %441 = tpu.matmul %438, %439, %cst_162 {dimension_numbers = #tpu.dot_dimension_numbers<[1], [1], [0], [0], [0, 0, 1, 0], [], []>} : vector<8x8xf32>, vector<8x8xf32>, vector<8x8xf32> -> vector<8x8xf32>
    %442 = vector.broadcast %15 : vector<1x8xf32> to vector<8x8xf32>
    %443 = arith.addf %441, %442 : vector<8x8xf32>
    %cst_163 = arith.constant dense<0xFF800000> : vector<8xf32>
    %444 = vector.multi_reduction <maximumf>, %443, %cst_163 [1] : vector<8x8xf32> to vector<8xf32>
    %445 = vector.shape_cast %444 : vector<8xf32> to vector<8x1xf32>
    %446 = vector.broadcast %445 : vector<8x1xf32> to vector<8x8xf32>
    %447 = arith.subf %443, %446 : vector<8x8xf32>
    %448 = math.exp %447 : vector<8x8xf32>
    %cst_164 = arith.constant dense<0.000000e+00> : vector<8xf32>
    %449 = vector.multi_reduction <add>, %448, %cst_164 [1] : vector<8x8xf32> to vector<8xf32>
    %450 = vector.shape_cast %449 : vector<8xf32> to vector<8x1xf32>
    %451 = tpu.reciprocal %450 {approx = true} : vector<8x1xf32> -> vector<8x1xf32>
    %452 = vector.broadcast %451 : vector<8x1xf32> to vector<8x8xf32>
    %453 = arith.mulf %448, %452 : vector<8x8xf32>
    %cst_165 = arith.constant dense<0.000000e+00> : vector<8x8xf32>
    %454 = tpu.matmul %453, %440, %cst_165 {dimension_numbers = #tpu.dot_dimension_numbers<[1], [0], [0], [1], [0, 0, 1, 1], [], []>} : vector<8x8xf32>, vector<8x8xf32>, vector<8x8xf32> -> vector<8x8xf32>
    %455 = vector.extract_strided_slice %378 {offsets = [24, 0], sizes = [8, 32], strides = [1, 1]} : vector<32x32xf32> to vector<8x32xf32>
    %cst_166 = arith.constant dense<0.000000e+00> : vector<8x32xf32>
    %456 = tpu.matmul %454, %455, %cst_166 {dimension_numbers = #tpu.dot_dimension_numbers<[1], [0], [0], [1], [0, 0, 1, 1], [], []>} : vector<8x8xf32>, vector<8x32xf32>, vector<8x32xf32> -> vector<8x32xf32>
    %457 = arith.addf %437, %456 : vector<8x32xf32>
    %458 = arith.addf %354, %457 : vector<8x32xf32>
    %c1_167 = arith.constant 1 : index
    %c0_168 = arith.constant 0 : index
    %c0_169 = arith.constant 0 : index
    %459 = vector.load %arg13[%c1_167, %c0_168, %c0_169] : memref<2x1x32xf32, #tpu.memory_space<vmem>>, vector<1x1x32xf32>
    %460 = vector.shape_cast %459 : vector<1x1x32xf32> to vector<1x32xf32>
    %461 = arith.mulf %458, %458 : vector<8x32xf32>
    %cst_170 = arith.constant dense<0.000000e+00> : vector<8xf32>
    %462 = vector.multi_reduction <add>, %461, %cst_170 [1] : vector<8x32xf32> to vector<8xf32>
    %463 = vector.shape_cast %462 : vector<8xf32> to vector<8x1xf32>
    %cst_171 = arith.constant 3.200000e+01 : f32
    %464 = vector.broadcast %cst_171 : f32 to vector<8x1xf32>
    %465 = arith.divf %463, %464 : vector<8x1xf32>
    %cst_172 = arith.constant 9.99999997E-7 : f32
    %466 = vector.broadcast %cst_172 : f32 to vector<8x1xf32>
    %467 = arith.addf %465, %466 : vector<8x1xf32>
    %468 = math.rsqrt %467 : vector<8x1xf32>
    %469 = vector.broadcast %468 : vector<8x1xf32> to vector<8x32xf32>
    %470 = arith.mulf %458, %469 : vector<8x32xf32>
    %471 = vector.broadcast %460 : vector<1x32xf32> to vector<8x32xf32>
    %472 = arith.mulf %470, %471 : vector<8x32xf32>
    %c1_173 = arith.constant 1 : index
    %c0_174 = arith.constant 0 : index
    %c0_175 = arith.constant 0 : index
    %473 = vector.load %arg14[%c1_173, %c0_174, %c0_175] : memref<2x32x64xf32, #tpu.memory_space<vmem>>, vector<1x32x64xf32>
    %474 = vector.shape_cast %473 : vector<1x32x64xf32> to vector<32x64xf32>
    %cst_176 = arith.constant dense<0.000000e+00> : vector<8x64xf32>
    %475 = tpu.matmul %472, %474, %cst_176 {dimension_numbers = #tpu.dot_dimension_numbers<[1], [0], [0], [1], [0, 0, 1, 1], [], []>} : vector<8x32xf32>, vector<32x64xf32>, vector<8x64xf32> -> vector<8x64xf32>
    %cst_177 = arith.constant 0.000000e+00 : f32
    %476 = vector.broadcast %cst_177 : f32 to vector<8x64xf32>
    %477 = arith.maximumf %475, %476 : vector<8x64xf32>
    %c1_178 = arith.constant 1 : index
    %c0_179 = arith.constant 0 : index
    %c0_180 = arith.constant 0 : index
    %478 = vector.load %arg15[%c1_178, %c0_179, %c0_180] : memref<2x64x32xf32, #tpu.memory_space<vmem>>, vector<1x64x32xf32>
    %479 = vector.shape_cast %478 : vector<1x64x32xf32> to vector<64x32xf32>
    %cst_181 = arith.constant dense<0.000000e+00> : vector<8x32xf32>
    %480 = tpu.matmul %477, %479, %cst_181 {dimension_numbers = #tpu.dot_dimension_numbers<[1], [0], [0], [1], [0, 0, 1, 1], [], []>} : vector<8x64xf32>, vector<64x32xf32>, vector<8x32xf32> -> vector<8x32xf32>
    %481 = arith.addf %458, %480 : vector<8x32xf32>
    %c0_182 = arith.constant 0 : index
    %c0_183 = arith.constant 0 : index
    %482 = vector.load %arg16[%c0_182, %c0_183] : memref<1x32xf32, #tpu.memory_space<vmem>>, vector<1x32xf32>
    %483 = arith.mulf %481, %481 : vector<8x32xf32>
    %cst_184 = arith.constant dense<0.000000e+00> : vector<8xf32>
    %484 = vector.multi_reduction <add>, %483, %cst_184 [1] : vector<8x32xf32> to vector<8xf32>
    %485 = vector.shape_cast %484 : vector<8xf32> to vector<8x1xf32>
    %cst_185 = arith.constant 3.200000e+01 : f32
    %486 = vector.broadcast %cst_185 : f32 to vector<8x1xf32>
    %487 = arith.divf %485, %486 : vector<8x1xf32>
    %cst_186 = arith.constant 9.99999997E-7 : f32
    %488 = vector.broadcast %cst_186 : f32 to vector<8x1xf32>
    %489 = arith.addf %487, %488 : vector<8x1xf32>
    %490 = math.rsqrt %489 : vector<8x1xf32>
    %491 = vector.broadcast %490 : vector<8x1xf32> to vector<8x32xf32>
    %492 = arith.mulf %481, %491 : vector<8x32xf32>
    %493 = vector.broadcast %482 : vector<1x32xf32> to vector<8x32xf32>
    %494 = arith.mulf %492, %493 : vector<8x32xf32>
    %c0_187 = arith.constant 0 : index
    %c0_188 = arith.constant 0 : index
    %495 = vector.load %arg17[%c0_187, %c0_188] : memref<8x32xf32, #tpu.memory_space<vmem>>, vector<8x32xf32>
    tpu.vector_store %arg17[%c0_187, %c0_188], %494 {strides = array<i32>} : memref<8x32xf32, #tpu.memory_space<vmem>>, vector<8x32xf32>,
    %cst_189 = arith.constant 0.176776692 : f32
    %496 = vector.broadcast %cst_189 : f32 to vector<8x32xf32>
    %497 = arith.mulf %494, %496 : vector<8x32xf32>
    %cst_190 = arith.constant dense<0.000000e+00> : vector<8x128xf32>
    %498 = tpu.matmul %497, %0, %cst_190 {dimension_numbers = #tpu.dot_dimension_numbers<[1], [1], [0], [0], [0, 0, 1, 0], [], []>} : vector<8x32xf32>, vector<128x32xf32>, vector<8x128xf32> -> vector<8x128xf32>
    %c0_191 = arith.constant 0 : index
    %c0_192 = arith.constant 0 : index
    %499 = vector.load %arg18[%c0_191, %c0_192] : memref<8x128xf32, #tpu.memory_space<vmem>>, vector<8x128xf32>
    tpu.vector_store %arg18[%c0_191, %c0_192], %498 {strides = array<i32>} : memref<8x128xf32, #tpu.memory_space<vmem>>, vector<8x128xf32>,
    return
  }
  func.func @transform_0(%arg0: i32) -> (i32, i32) {
    %c0_i32 = arith.constant 0 : i32
    %c0_i32_0 = arith.constant 0 : i32
    return %arg0, %c0_i32 : i32, i32
  }
  func.func @transform_1(%arg0: i32) -> (i32, i32, i32) {
    %c0_i32 = arith.constant 0 : i32
    %c0_i32_0 = arith.constant 0 : i32
    %c0_i32_1 = arith.constant 0 : i32
    return %arg0, %c0_i32, %c0_i32_0 : i32, i32, i32
  }
  func.func @transform_2(%arg0: i32) -> (i32, i32) {
    %c0_i32 = arith.constant 0 : i32
    %c0_i32_0 = arith.constant 0 : i32
    return %arg0, %c0_i32 : i32, i32
  }
  func.func @transform_3(%arg0: i32) -> (i32, i32) {
    %c0_i32 = arith.constant 0 : i32
    %c0_i32_0 = arith.constant 0 : i32
    %c0_i32_1 = arith.constant 0 : i32
    return %c0_i32, %c0_i32_0 : i32, i32
  }
  func.func @transform_4(%arg0: i32) -> (i32, i32, i32) {
    %c0_i32 = arith.constant 0 : i32
    %c0_i32_0 = arith.constant 0 : i32
    %c0_i32_1 = arith.constant 0 : i32
    %c0_i32_2 = arith.constant 0 : i32
    return %c0_i32, %c0_i32_0, %c0_i32_1 : i32, i32, i32
  }
  func.func @transform_5(%arg0: i32) -> (i32, i32, i32) {
    %c0_i32 = arith.constant 0 : i32
    %c0_i32_0 = arith.constant 0 : i32
    %c0_i32_1 = arith.constant 0 : i32
    %c0_i32_2 = arith.constant 0 : i32
    return %c0_i32, %c0_i32_0, %c0_i32_1 : i32, i32, i32
  }
  func.func @transform_6(%arg0: i32) -> (i32, i32, i32) {
    %c0_i32 = arith.constant 0 : i32
    %c0_i32_0 = arith.constant 0 : i32
    %c0_i32_1 = arith.constant 0 : i32
    %c0_i32_2 = arith.constant 0 : i32
    return %c0_i32, %c0_i32_0, %c0_i32_1 : i32, i32, i32
  }
  func.func @transform_7(%arg0: i32) -> (i32, i32, i32) {
    %c0_i32 = arith.constant 0 : i32
    %c0_i32_0 = arith.constant 0 : i32
    %c0_i32_1 = arith.constant 0 : i32
    %c0_i32_2 = arith.constant 0 : i32
    return %c0_i32, %c0_i32_0, %c0_i32_1 : i32, i32, i32
  }
  func.func @transform_8(%arg0: i32) -> (i32, i32, i32) {
    %c0_i32 = arith.constant 0 : i32
    %c0_i32_0 = arith.constant 0 : i32
    %c0_i32_1 = arith.constant 0 : i32
    %c0_i32_2 = arith.constant 0 : i32
    return %c0_i32, %c0_i32_0, %c0_i32_1 : i32, i32, i32
  }
  func.func @transform_9(%arg0: i32) -> (i32, i32, i32) {
    %c0_i32 = arith.constant 0 : i32
    %c0_i32_0 = arith.constant 0 : i32
    %c0_i32_1 = arith.constant 0 : i32
    %c0_i32_2 = arith.constant 0 : i32
    return %c0_i32, %c0_i32_0, %c0_i32_1 : i32, i32, i32
  }
  func.func @transform_10(%arg0: i32) -> (i32, i32, i32) {
    %c0_i32 = arith.constant 0 : i32
    %c0_i32_0 = arith.constant 0 : i32
    %c0_i32_1 = arith.constant 0 : i32
    %c0_i32_2 = arith.constant 0 : i32
    return %c0_i32, %c0_i32_0, %c0_i32_1 : i32, i32, i32
  }
  func.func @transform_11(%arg0: i32) -> (i32, i32, i32) {
    %c0_i32 = arith.constant 0 : i32
    %c0_i32_0 = arith.constant 0 : i32
    %c0_i32_1 = arith.constant 0 : i32
    %c0_i32_2 = arith.constant 0 : i32
    return %c0_i32, %c0_i32_0, %c0_i32_1 : i32, i32, i32
  }
  func.func @transform_12(%arg0: i32) -> (i32, i32, i32) {
    %c0_i32 = arith.constant 0 : i32
    %c0_i32_0 = arith.constant 0 : i32
    %c0_i32_1 = arith.constant 0 : i32
    %c0_i32_2 = arith.constant 0 : i32
    return %c0_i32, %c0_i32_0, %c0_i32_1 : i32, i32, i32
  }
  func.func @transform_13(%arg0: i32) -> (i32, i32, i32) {
    %c0_i32 = arith.constant 0 : i32
    %c0_i32_0 = arith.constant 0 : i32
    %c0_i32_1 = arith.constant 0 : i32
    %c0_i32_2 = arith.constant 0 : i32
    return %c0_i32, %c0_i32_0, %c0_i32_1 : i32, i32, i32
  }
  func.func @transform_14(%arg0: i32) -> (i32, i32, i32) {
    %c0_i32 = arith.constant 0 : i32
    %c0_i32_0 = arith.constant 0 : i32
    %c0_i32_1 = arith.constant 0 : i32
    %c0_i32_2 = arith.constant 0 : i32
    return %c0_i32, %c0_i32_0, %c0_i32_1 : i32, i32, i32
  }
  func.func @transform_15(%arg0: i32) -> (i32, i32) {
    %c0_i32 = arith.constant 0 : i32
    %c0_i32_0 = arith.constant 0 : i32
    %c0_i32_1 = arith.constant 0 : i32
    return %c0_i32, %c0_i32_0 : i32, i32
  }
  func.func @transform_16(%arg0: i32) -> (i32, i32) {
    %c0_i32 = arith.constant 0 : i32
    %c0_i32_0 = arith.constant 0 : i32
    return %arg0, %c0_i32 : i32, i32
  }
  func.func @transform_17(%arg0: i32) -> (i32, i32) {
    %c0_i32 = arith.constant 0 : i32
    %c0_i32_0 = arith.constant 0 : i32
    return %arg0, %c0_i32 : i32, i32
  }
}

module attributes {stable_mosaic.version = 11 : i64} {
  func.func @_encoder_kernel(%arg0: i32, %arg1: memref<8x1xi32, #tpu.memory_space<vmem>>, %arg2: memref<1x1x8xf32, #tpu.memory_space<vmem>>, %arg3: memref<128x32xf32, #tpu.memory_space<vmem>>, %arg4: memref<4x8x8xf32, #tpu.memory_space<vmem>>, %arg5: memref<2x1x32xf32, #tpu.memory_space<vmem>>, %arg6: memref<2x32x96xf32, #tpu.memory_space<vmem>>, %arg7: memref<2x32x32xf32, #tpu.memory_space<vmem>>, %arg8: memref<2x1x32xf32, #tpu.memory_space<vmem>>, %arg9: memref<2x32x64xf32, #tpu.memory_space<vmem>>, %arg10: memref<2x64x32xf32, #tpu.memory_space<vmem>>, %arg11: memref<1x32xf32, #tpu.memory_space<vmem>>, %arg12: memref<8x32xf32, #tpu.memory_space<vmem>>) attributes {dimension_semantics = [#tpu.dimension_semantics<parallel>], iteration_bounds = array<i64: 2>, scalar_prefetch = 0 : i64, scratch_operands = 0 : i64, tpu.core_type = #tpu.core_type<tc>, window_params = [{transform_indices = @transform_0, window_bounds = array<i64: 8, 1>}, {transform_indices = @transform_1, window_bounds = array<i64: 1, 1, 8>}, {pipeline_mode = #tpu.pipeline_mode<synchronous>, transform_indices = @transform_2, window_bounds = array<i64: 128, 32>}, {pipeline_mode = #tpu.pipeline_mode<synchronous>, transform_indices = @transform_3, window_bounds = array<i64: 4, 8, 8>}, {pipeline_mode = #tpu.pipeline_mode<synchronous>, transform_indices = @transform_4, window_bounds = array<i64: 2, 1, 32>}, {pipeline_mode = #tpu.pipeline_mode<synchronous>, transform_indices = @transform_5, window_bounds = array<i64: 2, 32, 96>}, {pipeline_mode = #tpu.pipeline_mode<synchronous>, transform_indices = @transform_6, window_bounds = array<i64: 2, 32, 32>}, {pipeline_mode = #tpu.pipeline_mode<synchronous>, transform_indices = @transform_7, window_bounds = array<i64: 2, 1, 32>}, {pipeline_mode = #tpu.pipeline_mode<synchronous>, transform_indices = @transform_8, window_bounds = array<i64: 2, 32, 64>}, {pipeline_mode = #tpu.pipeline_mode<synchronous>, transform_indices = @transform_9, window_bounds = array<i64: 2, 64, 32>}, {pipeline_mode = #tpu.pipeline_mode<synchronous>, transform_indices = @transform_10, window_bounds = array<i64: 1, 32>}, {transform_indices = @transform_11, window_bounds = array<i64: 8, 32>}]} {
    %c0 = arith.constant 0 : index
    %c0_0 = arith.constant 0 : index
    %0 = vector.load %arg3[%c0, %c0_0] : memref<128x32xf32, #tpu.memory_space<vmem>>, vector<128x32xf32>
    %c0_1 = arith.constant 0 : index
    %c0_2 = arith.constant 0 : index
    %1 = vector.load %arg1[%c0_1, %c0_2] : memref<8x1xi32, #tpu.memory_space<vmem>>, vector<8x1xi32>
    %2 = tpu.iota {dimensions = array<i32: 1>} : vector<8x128xi32>
    %3 = vector.broadcast %1 : vector<8x1xi32> to vector<8x128xi32>
    %4 = arith.cmpi eq, %2, %3 : vector<8x128xi32>
    %5 = arith.extui %4 : vector<8x128xi1> to vector<8x128xi32>
    %6 = arith.sitofp %5 : vector<8x128xi32> to vector<8x128xf32>
    %cst = arith.constant dense<0.000000e+00> : vector<8x32xf32>
    %7 = tpu.matmul %6, %0, %cst {dimension_numbers = #tpu.dot_dimension_numbers<[1], [0], [0], [1], [0, 0, 1, 1], [], []>} : vector<8x128xf32>, vector<128x32xf32>, vector<8x32xf32> -> vector<8x32xf32>
    %c0_3 = arith.constant 0 : index
    %c0_4 = arith.constant 0 : index
    %c0_5 = arith.constant 0 : index
    %8 = vector.load %arg2[%c0_3, %c0_4, %c0_5] : memref<1x1x8xf32, #tpu.memory_space<vmem>>, vector<1x1x8xf32>
    %9 = vector.shape_cast %8 : vector<1x1x8xf32> to vector<1x8xf32>
    %cst_6 = arith.constant 1.000000e+00 : f32
    %10 = vector.broadcast %cst_6 : f32 to vector<1x8xf32>
    %11 = arith.subf %10, %9 : vector<1x8xf32>
    %cst_7 = arith.constant -1.000000e+09 : f32
    %12 = vector.broadcast %cst_7 : f32 to vector<1x8xf32>
    %13 = arith.mulf %11, %12 : vector<1x8xf32>
    %c0_8 = arith.constant 0 : index
    %c0_9 = arith.constant 0 : index
    %c0_10 = arith.constant 0 : index
    %14 = vector.load %arg4[%c0_8, %c0_9, %c0_10] : memref<4x8x8xf32, #tpu.memory_space<vmem>>, vector<4x8x8xf32>
    %15 = vector.shape_cast %13 : vector<1x8xf32> to vector<1x1x8xf32>
    %16 = vector.broadcast %15 : vector<1x1x8xf32> to vector<4x8x8xf32>
    %17 = arith.addf %14, %16 : vector<4x8x8xf32>
    %c0_11 = arith.constant 0 : index
    %c0_12 = arith.constant 0 : index
    %c0_13 = arith.constant 0 : index
    %18 = vector.load %arg5[%c0_11, %c0_12, %c0_13] : memref<2x1x32xf32, #tpu.memory_space<vmem>>, vector<1x1x32xf32>
    %19 = vector.shape_cast %18 : vector<1x1x32xf32> to vector<1x32xf32>
    %20 = arith.mulf %7, %7 : vector<8x32xf32>
    %cst_14 = arith.constant dense<0.000000e+00> : vector<8xf32>
    %21 = vector.multi_reduction <add>, %20, %cst_14 [1] : vector<8x32xf32> to vector<8xf32>
    %22 = vector.shape_cast %21 : vector<8xf32> to vector<8x1xf32>
    %cst_15 = arith.constant 3.200000e+01 : f32
    %23 = vector.broadcast %cst_15 : f32 to vector<8x1xf32>
    %24 = arith.divf %22, %23 : vector<8x1xf32>
    %cst_16 = arith.constant 9.99999997E-7 : f32
    %25 = vector.broadcast %cst_16 : f32 to vector<8x1xf32>
    %26 = arith.addf %24, %25 : vector<8x1xf32>
    %27 = math.rsqrt %26 : vector<8x1xf32>
    %28 = vector.broadcast %27 : vector<8x1xf32> to vector<8x32xf32>
    %29 = arith.mulf %7, %28 : vector<8x32xf32>
    %30 = vector.broadcast %19 : vector<1x32xf32> to vector<8x32xf32>
    %31 = arith.mulf %29, %30 : vector<8x32xf32>
    %c0_17 = arith.constant 0 : index
    %c0_18 = arith.constant 0 : index
    %c0_19 = arith.constant 0 : index
    %32 = vector.load %arg6[%c0_17, %c0_18, %c0_19] : memref<2x32x96xf32, #tpu.memory_space<vmem>>, vector<1x32x96xf32>
    %33 = vector.shape_cast %32 : vector<1x32x96xf32> to vector<32x96xf32>
    %cst_20 = arith.constant dense<0.000000e+00> : vector<8x96xf32>
    %34 = tpu.matmul %31, %33, %cst_20 {dimension_numbers = #tpu.dot_dimension_numbers<[1], [0], [0], [1], [0, 0, 1, 1], [], []>} : vector<8x32xf32>, vector<32x96xf32>, vector<8x96xf32> -> vector<8x96xf32>
    %35 = vector.extract_strided_slice %34 {offsets = [0, 0], sizes = [8, 32], strides = [1, 1]} : vector<8x96xf32> to vector<8x32xf32>
    %36 = vector.extract_strided_slice %34 {offsets = [0, 32], sizes = [8, 32], strides = [1, 1]} : vector<8x96xf32> to vector<8x32xf32>
    %37 = vector.extract_strided_slice %34 {offsets = [0, 64], sizes = [8, 32], strides = [1, 1]} : vector<8x96xf32> to vector<8x32xf32>
    %c0_21 = arith.constant 0 : index
    %c0_22 = arith.constant 0 : index
    %c0_23 = arith.constant 0 : index
    %38 = vector.load %arg7[%c0_21, %c0_22, %c0_23] : memref<2x32x32xf32, #tpu.memory_space<vmem>>, vector<1x32x32xf32>
    %39 = vector.shape_cast %38 : vector<1x32x32xf32> to vector<32x32xf32>
    %40 = vector.extract_strided_slice %35 {offsets = [0, 0], sizes = [8, 8], strides = [1, 1]} : vector<8x32xf32> to vector<8x8xf32>
    %41 = vector.extract_strided_slice %36 {offsets = [0, 0], sizes = [8, 8], strides = [1, 1]} : vector<8x32xf32> to vector<8x8xf32>
    %42 = vector.extract_strided_slice %37 {offsets = [0, 0], sizes = [8, 8], strides = [1, 1]} : vector<8x32xf32> to vector<8x8xf32>
    %cst_24 = arith.constant dense<0.000000e+00> : vector<8x8xf32>
    %43 = tpu.matmul %40, %41, %cst_24 {dimension_numbers = #tpu.dot_dimension_numbers<[1], [1], [0], [0], [0, 0, 1, 0], [], []>} : vector<8x8xf32>, vector<8x8xf32>, vector<8x8xf32> -> vector<8x8xf32>
    %44 = vector.extract_strided_slice %17 {offsets = [0, 0, 0], sizes = [1, 8, 8], strides = [1, 1, 1]} : vector<4x8x8xf32> to vector<1x8x8xf32>
    %45 = vector.shape_cast %44 : vector<1x8x8xf32> to vector<8x8xf32>
    %46 = arith.addf %43, %45 : vector<8x8xf32>
    %cst_25 = arith.constant dense<0xFF800000> : vector<8xf32>
    %47 = vector.multi_reduction <maximumf>, %46, %cst_25 [1] : vector<8x8xf32> to vector<8xf32>
    %48 = vector.shape_cast %47 : vector<8xf32> to vector<8x1xf32>
    %49 = vector.broadcast %48 : vector<8x1xf32> to vector<8x8xf32>
    %50 = arith.subf %46, %49 : vector<8x8xf32>
    %51 = math.exp %50 : vector<8x8xf32>
    %cst_26 = arith.constant dense<0.000000e+00> : vector<8xf32>
    %52 = vector.multi_reduction <add>, %51, %cst_26 [1] : vector<8x8xf32> to vector<8xf32>
    %53 = vector.shape_cast %52 : vector<8xf32> to vector<8x1xf32>
    %54 = tpu.reciprocal %53 {approx = true} : vector<8x1xf32> -> vector<8x1xf32>
    %55 = vector.broadcast %54 : vector<8x1xf32> to vector<8x8xf32>
    %56 = arith.mulf %51, %55 : vector<8x8xf32>
    %cst_27 = arith.constant dense<0.000000e+00> : vector<8x8xf32>
    %57 = tpu.matmul %56, %42, %cst_27 {dimension_numbers = #tpu.dot_dimension_numbers<[1], [0], [0], [1], [0, 0, 1, 1], [], []>} : vector<8x8xf32>, vector<8x8xf32>, vector<8x8xf32> -> vector<8x8xf32>
    %58 = vector.extract_strided_slice %39 {offsets = [0, 0], sizes = [8, 32], strides = [1, 1]} : vector<32x32xf32> to vector<8x32xf32>
    %cst_28 = arith.constant dense<0.000000e+00> : vector<8x32xf32>
    %59 = tpu.matmul %57, %58, %cst_28 {dimension_numbers = #tpu.dot_dimension_numbers<[1], [0], [0], [1], [0, 0, 1, 1], [], []>} : vector<8x8xf32>, vector<8x32xf32>, vector<8x32xf32> -> vector<8x32xf32>
    %60 = vector.extract_strided_slice %35 {offsets = [0, 8], sizes = [8, 8], strides = [1, 1]} : vector<8x32xf32> to vector<8x8xf32>
    %61 = vector.extract_strided_slice %36 {offsets = [0, 8], sizes = [8, 8], strides = [1, 1]} : vector<8x32xf32> to vector<8x8xf32>
    %62 = vector.extract_strided_slice %37 {offsets = [0, 8], sizes = [8, 8], strides = [1, 1]} : vector<8x32xf32> to vector<8x8xf32>
    %cst_29 = arith.constant dense<0.000000e+00> : vector<8x8xf32>
    %63 = tpu.matmul %60, %61, %cst_29 {dimension_numbers = #tpu.dot_dimension_numbers<[1], [1], [0], [0], [0, 0, 1, 0], [], []>} : vector<8x8xf32>, vector<8x8xf32>, vector<8x8xf32> -> vector<8x8xf32>
    %64 = vector.extract_strided_slice %17 {offsets = [1, 0, 0], sizes = [1, 8, 8], strides = [1, 1, 1]} : vector<4x8x8xf32> to vector<1x8x8xf32>
    %65 = vector.shape_cast %64 : vector<1x8x8xf32> to vector<8x8xf32>
    %66 = arith.addf %63, %65 : vector<8x8xf32>
    %cst_30 = arith.constant dense<0xFF800000> : vector<8xf32>
    %67 = vector.multi_reduction <maximumf>, %66, %cst_30 [1] : vector<8x8xf32> to vector<8xf32>
    %68 = vector.shape_cast %67 : vector<8xf32> to vector<8x1xf32>
    %69 = vector.broadcast %68 : vector<8x1xf32> to vector<8x8xf32>
    %70 = arith.subf %66, %69 : vector<8x8xf32>
    %71 = math.exp %70 : vector<8x8xf32>
    %cst_31 = arith.constant dense<0.000000e+00> : vector<8xf32>
    %72 = vector.multi_reduction <add>, %71, %cst_31 [1] : vector<8x8xf32> to vector<8xf32>
    %73 = vector.shape_cast %72 : vector<8xf32> to vector<8x1xf32>
    %74 = tpu.reciprocal %73 {approx = true} : vector<8x1xf32> -> vector<8x1xf32>
    %75 = vector.broadcast %74 : vector<8x1xf32> to vector<8x8xf32>
    %76 = arith.mulf %71, %75 : vector<8x8xf32>
    %cst_32 = arith.constant dense<0.000000e+00> : vector<8x8xf32>
    %77 = tpu.matmul %76, %62, %cst_32 {dimension_numbers = #tpu.dot_dimension_numbers<[1], [0], [0], [1], [0, 0, 1, 1], [], []>} : vector<8x8xf32>, vector<8x8xf32>, vector<8x8xf32> -> vector<8x8xf32>
    %78 = vector.extract_strided_slice %39 {offsets = [8, 0], sizes = [8, 32], strides = [1, 1]} : vector<32x32xf32> to vector<8x32xf32>
    %cst_33 = arith.constant dense<0.000000e+00> : vector<8x32xf32>
    %79 = tpu.matmul %77, %78, %cst_33 {dimension_numbers = #tpu.dot_dimension_numbers<[1], [0], [0], [1], [0, 0, 1, 1], [], []>} : vector<8x8xf32>, vector<8x32xf32>, vector<8x32xf32> -> vector<8x32xf32>
    %80 = arith.addf %59, %79 : vector<8x32xf32>
    %81 = vector.extract_strided_slice %35 {offsets = [0, 16], sizes = [8, 8], strides = [1, 1]} : vector<8x32xf32> to vector<8x8xf32>
    %82 = vector.extract_strided_slice %36 {offsets = [0, 16], sizes = [8, 8], strides = [1, 1]} : vector<8x32xf32> to vector<8x8xf32>
    %83 = vector.extract_strided_slice %37 {offsets = [0, 16], sizes = [8, 8], strides = [1, 1]} : vector<8x32xf32> to vector<8x8xf32>
    %cst_34 = arith.constant dense<0.000000e+00> : vector<8x8xf32>
    %84 = tpu.matmul %81, %82, %cst_34 {dimension_numbers = #tpu.dot_dimension_numbers<[1], [1], [0], [0], [0, 0, 1, 0], [], []>} : vector<8x8xf32>, vector<8x8xf32>, vector<8x8xf32> -> vector<8x8xf32>
    %85 = vector.extract_strided_slice %17 {offsets = [2, 0, 0], sizes = [1, 8, 8], strides = [1, 1, 1]} : vector<4x8x8xf32> to vector<1x8x8xf32>
    %86 = vector.shape_cast %85 : vector<1x8x8xf32> to vector<8x8xf32>
    %87 = arith.addf %84, %86 : vector<8x8xf32>
    %cst_35 = arith.constant dense<0xFF800000> : vector<8xf32>
    %88 = vector.multi_reduction <maximumf>, %87, %cst_35 [1] : vector<8x8xf32> to vector<8xf32>
    %89 = vector.shape_cast %88 : vector<8xf32> to vector<8x1xf32>
    %90 = vector.broadcast %89 : vector<8x1xf32> to vector<8x8xf32>
    %91 = arith.subf %87, %90 : vector<8x8xf32>
    %92 = math.exp %91 : vector<8x8xf32>
    %cst_36 = arith.constant dense<0.000000e+00> : vector<8xf32>
    %93 = vector.multi_reduction <add>, %92, %cst_36 [1] : vector<8x8xf32> to vector<8xf32>
    %94 = vector.shape_cast %93 : vector<8xf32> to vector<8x1xf32>
    %95 = tpu.reciprocal %94 {approx = true} : vector<8x1xf32> -> vector<8x1xf32>
    %96 = vector.broadcast %95 : vector<8x1xf32> to vector<8x8xf32>
    %97 = arith.mulf %92, %96 : vector<8x8xf32>
    %cst_37 = arith.constant dense<0.000000e+00> : vector<8x8xf32>
    %98 = tpu.matmul %97, %83, %cst_37 {dimension_numbers = #tpu.dot_dimension_numbers<[1], [0], [0], [1], [0, 0, 1, 1], [], []>} : vector<8x8xf32>, vector<8x8xf32>, vector<8x8xf32> -> vector<8x8xf32>
    %99 = vector.extract_strided_slice %39 {offsets = [16, 0], sizes = [8, 32], strides = [1, 1]} : vector<32x32xf32> to vector<8x32xf32>
    %cst_38 = arith.constant dense<0.000000e+00> : vector<8x32xf32>
    %100 = tpu.matmul %98, %99, %cst_38 {dimension_numbers = #tpu.dot_dimension_numbers<[1], [0], [0], [1], [0, 0, 1, 1], [], []>} : vector<8x8xf32>, vector<8x32xf32>, vector<8x32xf32> -> vector<8x32xf32>
    %101 = arith.addf %80, %100 : vector<8x32xf32>
    %102 = vector.extract_strided_slice %35 {offsets = [0, 24], sizes = [8, 8], strides = [1, 1]} : vector<8x32xf32> to vector<8x8xf32>
    %103 = vector.extract_strided_slice %36 {offsets = [0, 24], sizes = [8, 8], strides = [1, 1]} : vector<8x32xf32> to vector<8x8xf32>
    %104 = vector.extract_strided_slice %37 {offsets = [0, 24], sizes = [8, 8], strides = [1, 1]} : vector<8x32xf32> to vector<8x8xf32>
    %cst_39 = arith.constant dense<0.000000e+00> : vector<8x8xf32>
    %105 = tpu.matmul %102, %103, %cst_39 {dimension_numbers = #tpu.dot_dimension_numbers<[1], [1], [0], [0], [0, 0, 1, 0], [], []>} : vector<8x8xf32>, vector<8x8xf32>, vector<8x8xf32> -> vector<8x8xf32>
    %106 = vector.extract_strided_slice %17 {offsets = [3, 0, 0], sizes = [1, 8, 8], strides = [1, 1, 1]} : vector<4x8x8xf32> to vector<1x8x8xf32>
    %107 = vector.shape_cast %106 : vector<1x8x8xf32> to vector<8x8xf32>
    %108 = arith.addf %105, %107 : vector<8x8xf32>
    %cst_40 = arith.constant dense<0xFF800000> : vector<8xf32>
    %109 = vector.multi_reduction <maximumf>, %108, %cst_40 [1] : vector<8x8xf32> to vector<8xf32>
    %110 = vector.shape_cast %109 : vector<8xf32> to vector<8x1xf32>
    %111 = vector.broadcast %110 : vector<8x1xf32> to vector<8x8xf32>
    %112 = arith.subf %108, %111 : vector<8x8xf32>
    %113 = math.exp %112 : vector<8x8xf32>
    %cst_41 = arith.constant dense<0.000000e+00> : vector<8xf32>
    %114 = vector.multi_reduction <add>, %113, %cst_41 [1] : vector<8x8xf32> to vector<8xf32>
    %115 = vector.shape_cast %114 : vector<8xf32> to vector<8x1xf32>
    %116 = tpu.reciprocal %115 {approx = true} : vector<8x1xf32> -> vector<8x1xf32>
    %117 = vector.broadcast %116 : vector<8x1xf32> to vector<8x8xf32>
    %118 = arith.mulf %113, %117 : vector<8x8xf32>
    %cst_42 = arith.constant dense<0.000000e+00> : vector<8x8xf32>
    %119 = tpu.matmul %118, %104, %cst_42 {dimension_numbers = #tpu.dot_dimension_numbers<[1], [0], [0], [1], [0, 0, 1, 1], [], []>} : vector<8x8xf32>, vector<8x8xf32>, vector<8x8xf32> -> vector<8x8xf32>
    %120 = vector.extract_strided_slice %39 {offsets = [24, 0], sizes = [8, 32], strides = [1, 1]} : vector<32x32xf32> to vector<8x32xf32>
    %cst_43 = arith.constant dense<0.000000e+00> : vector<8x32xf32>
    %121 = tpu.matmul %119, %120, %cst_43 {dimension_numbers = #tpu.dot_dimension_numbers<[1], [0], [0], [1], [0, 0, 1, 1], [], []>} : vector<8x8xf32>, vector<8x32xf32>, vector<8x32xf32> -> vector<8x32xf32>
    %122 = arith.addf %101, %121 : vector<8x32xf32>
    %123 = arith.addf %7, %122 : vector<8x32xf32>
    %c0_44 = arith.constant 0 : index
    %c0_45 = arith.constant 0 : index
    %c0_46 = arith.constant 0 : index
    %124 = vector.load %arg8[%c0_44, %c0_45, %c0_46] : memref<2x1x32xf32, #tpu.memory_space<vmem>>, vector<1x1x32xf32>
    %125 = vector.shape_cast %124 : vector<1x1x32xf32> to vector<1x32xf32>
    %126 = arith.mulf %123, %123 : vector<8x32xf32>
    %cst_47 = arith.constant dense<0.000000e+00> : vector<8xf32>
    %127 = vector.multi_reduction <add>, %126, %cst_47 [1] : vector<8x32xf32> to vector<8xf32>
    %128 = vector.shape_cast %127 : vector<8xf32> to vector<8x1xf32>
    %cst_48 = arith.constant 3.200000e+01 : f32
    %129 = vector.broadcast %cst_48 : f32 to vector<8x1xf32>
    %130 = arith.divf %128, %129 : vector<8x1xf32>
    %cst_49 = arith.constant 9.99999997E-7 : f32
    %131 = vector.broadcast %cst_49 : f32 to vector<8x1xf32>
    %132 = arith.addf %130, %131 : vector<8x1xf32>
    %133 = math.rsqrt %132 : vector<8x1xf32>
    %134 = vector.broadcast %133 : vector<8x1xf32> to vector<8x32xf32>
    %135 = arith.mulf %123, %134 : vector<8x32xf32>
    %136 = vector.broadcast %125 : vector<1x32xf32> to vector<8x32xf32>
    %137 = arith.mulf %135, %136 : vector<8x32xf32>
    %c0_50 = arith.constant 0 : index
    %c0_51 = arith.constant 0 : index
    %c0_52 = arith.constant 0 : index
    %138 = vector.load %arg9[%c0_50, %c0_51, %c0_52] : memref<2x32x64xf32, #tpu.memory_space<vmem>>, vector<1x32x64xf32>
    %139 = vector.shape_cast %138 : vector<1x32x64xf32> to vector<32x64xf32>
    %cst_53 = arith.constant dense<0.000000e+00> : vector<8x64xf32>
    %140 = tpu.matmul %137, %139, %cst_53 {dimension_numbers = #tpu.dot_dimension_numbers<[1], [0], [0], [1], [0, 0, 1, 1], [], []>} : vector<8x32xf32>, vector<32x64xf32>, vector<8x64xf32> -> vector<8x64xf32>
    %cst_54 = arith.constant 0.000000e+00 : f32
    %141 = vector.broadcast %cst_54 : f32 to vector<8x64xf32>
    %142 = arith.maximumf %140, %141 : vector<8x64xf32>
    %c0_55 = arith.constant 0 : index
    %c0_56 = arith.constant 0 : index
    %c0_57 = arith.constant 0 : index
    %143 = vector.load %arg10[%c0_55, %c0_56, %c0_57] : memref<2x64x32xf32, #tpu.memory_space<vmem>>, vector<1x64x32xf32>
    %144 = vector.shape_cast %143 : vector<1x64x32xf32> to vector<64x32xf32>
    %cst_58 = arith.constant dense<0.000000e+00> : vector<8x32xf32>
    %145 = tpu.matmul %142, %144, %cst_58 {dimension_numbers = #tpu.dot_dimension_numbers<[1], [0], [0], [1], [0, 0, 1, 1], [], []>} : vector<8x64xf32>, vector<64x32xf32>, vector<8x32xf32> -> vector<8x32xf32>
    %146 = arith.addf %123, %145 : vector<8x32xf32>
    %c1 = arith.constant 1 : index
    %c0_59 = arith.constant 0 : index
    %c0_60 = arith.constant 0 : index
    %147 = vector.load %arg5[%c1, %c0_59, %c0_60] : memref<2x1x32xf32, #tpu.memory_space<vmem>>, vector<1x1x32xf32>
    %148 = vector.shape_cast %147 : vector<1x1x32xf32> to vector<1x32xf32>
    %149 = arith.mulf %146, %146 : vector<8x32xf32>
    %cst_61 = arith.constant dense<0.000000e+00> : vector<8xf32>
    %150 = vector.multi_reduction <add>, %149, %cst_61 [1] : vector<8x32xf32> to vector<8xf32>
    %151 = vector.shape_cast %150 : vector<8xf32> to vector<8x1xf32>
    %cst_62 = arith.constant 3.200000e+01 : f32
    %152 = vector.broadcast %cst_62 : f32 to vector<8x1xf32>
    %153 = arith.divf %151, %152 : vector<8x1xf32>
    %cst_63 = arith.constant 9.99999997E-7 : f32
    %154 = vector.broadcast %cst_63 : f32 to vector<8x1xf32>
    %155 = arith.addf %153, %154 : vector<8x1xf32>
    %156 = math.rsqrt %155 : vector<8x1xf32>
    %157 = vector.broadcast %156 : vector<8x1xf32> to vector<8x32xf32>
    %158 = arith.mulf %146, %157 : vector<8x32xf32>
    %159 = vector.broadcast %148 : vector<1x32xf32> to vector<8x32xf32>
    %160 = arith.mulf %158, %159 : vector<8x32xf32>
    %c1_64 = arith.constant 1 : index
    %c0_65 = arith.constant 0 : index
    %c0_66 = arith.constant 0 : index
    %161 = vector.load %arg6[%c1_64, %c0_65, %c0_66] : memref<2x32x96xf32, #tpu.memory_space<vmem>>, vector<1x32x96xf32>
    %162 = vector.shape_cast %161 : vector<1x32x96xf32> to vector<32x96xf32>
    %cst_67 = arith.constant dense<0.000000e+00> : vector<8x96xf32>
    %163 = tpu.matmul %160, %162, %cst_67 {dimension_numbers = #tpu.dot_dimension_numbers<[1], [0], [0], [1], [0, 0, 1, 1], [], []>} : vector<8x32xf32>, vector<32x96xf32>, vector<8x96xf32> -> vector<8x96xf32>
    %164 = vector.extract_strided_slice %163 {offsets = [0, 0], sizes = [8, 32], strides = [1, 1]} : vector<8x96xf32> to vector<8x32xf32>
    %165 = vector.extract_strided_slice %163 {offsets = [0, 32], sizes = [8, 32], strides = [1, 1]} : vector<8x96xf32> to vector<8x32xf32>
    %166 = vector.extract_strided_slice %163 {offsets = [0, 64], sizes = [8, 32], strides = [1, 1]} : vector<8x96xf32> to vector<8x32xf32>
    %c1_68 = arith.constant 1 : index
    %c0_69 = arith.constant 0 : index
    %c0_70 = arith.constant 0 : index
    %167 = vector.load %arg7[%c1_68, %c0_69, %c0_70] : memref<2x32x32xf32, #tpu.memory_space<vmem>>, vector<1x32x32xf32>
    %168 = vector.shape_cast %167 : vector<1x32x32xf32> to vector<32x32xf32>
    %169 = vector.extract_strided_slice %164 {offsets = [0, 0], sizes = [8, 8], strides = [1, 1]} : vector<8x32xf32> to vector<8x8xf32>
    %170 = vector.extract_strided_slice %165 {offsets = [0, 0], sizes = [8, 8], strides = [1, 1]} : vector<8x32xf32> to vector<8x8xf32>
    %171 = vector.extract_strided_slice %166 {offsets = [0, 0], sizes = [8, 8], strides = [1, 1]} : vector<8x32xf32> to vector<8x8xf32>
    %cst_71 = arith.constant dense<0.000000e+00> : vector<8x8xf32>
    %172 = tpu.matmul %169, %170, %cst_71 {dimension_numbers = #tpu.dot_dimension_numbers<[1], [1], [0], [0], [0, 0, 1, 0], [], []>} : vector<8x8xf32>, vector<8x8xf32>, vector<8x8xf32> -> vector<8x8xf32>
    %173 = vector.extract_strided_slice %17 {offsets = [0, 0, 0], sizes = [1, 8, 8], strides = [1, 1, 1]} : vector<4x8x8xf32> to vector<1x8x8xf32>
    %174 = vector.shape_cast %173 : vector<1x8x8xf32> to vector<8x8xf32>
    %175 = arith.addf %172, %174 : vector<8x8xf32>
    %cst_72 = arith.constant dense<0xFF800000> : vector<8xf32>
    %176 = vector.multi_reduction <maximumf>, %175, %cst_72 [1] : vector<8x8xf32> to vector<8xf32>
    %177 = vector.shape_cast %176 : vector<8xf32> to vector<8x1xf32>
    %178 = vector.broadcast %177 : vector<8x1xf32> to vector<8x8xf32>
    %179 = arith.subf %175, %178 : vector<8x8xf32>
    %180 = math.exp %179 : vector<8x8xf32>
    %cst_73 = arith.constant dense<0.000000e+00> : vector<8xf32>
    %181 = vector.multi_reduction <add>, %180, %cst_73 [1] : vector<8x8xf32> to vector<8xf32>
    %182 = vector.shape_cast %181 : vector<8xf32> to vector<8x1xf32>
    %183 = tpu.reciprocal %182 {approx = true} : vector<8x1xf32> -> vector<8x1xf32>
    %184 = vector.broadcast %183 : vector<8x1xf32> to vector<8x8xf32>
    %185 = arith.mulf %180, %184 : vector<8x8xf32>
    %cst_74 = arith.constant dense<0.000000e+00> : vector<8x8xf32>
    %186 = tpu.matmul %185, %171, %cst_74 {dimension_numbers = #tpu.dot_dimension_numbers<[1], [0], [0], [1], [0, 0, 1, 1], [], []>} : vector<8x8xf32>, vector<8x8xf32>, vector<8x8xf32> -> vector<8x8xf32>
    %187 = vector.extract_strided_slice %168 {offsets = [0, 0], sizes = [8, 32], strides = [1, 1]} : vector<32x32xf32> to vector<8x32xf32>
    %cst_75 = arith.constant dense<0.000000e+00> : vector<8x32xf32>
    %188 = tpu.matmul %186, %187, %cst_75 {dimension_numbers = #tpu.dot_dimension_numbers<[1], [0], [0], [1], [0, 0, 1, 1], [], []>} : vector<8x8xf32>, vector<8x32xf32>, vector<8x32xf32> -> vector<8x32xf32>
    %189 = vector.extract_strided_slice %164 {offsets = [0, 8], sizes = [8, 8], strides = [1, 1]} : vector<8x32xf32> to vector<8x8xf32>
    %190 = vector.extract_strided_slice %165 {offsets = [0, 8], sizes = [8, 8], strides = [1, 1]} : vector<8x32xf32> to vector<8x8xf32>
    %191 = vector.extract_strided_slice %166 {offsets = [0, 8], sizes = [8, 8], strides = [1, 1]} : vector<8x32xf32> to vector<8x8xf32>
    %cst_76 = arith.constant dense<0.000000e+00> : vector<8x8xf32>
    %192 = tpu.matmul %189, %190, %cst_76 {dimension_numbers = #tpu.dot_dimension_numbers<[1], [1], [0], [0], [0, 0, 1, 0], [], []>} : vector<8x8xf32>, vector<8x8xf32>, vector<8x8xf32> -> vector<8x8xf32>
    %193 = vector.extract_strided_slice %17 {offsets = [1, 0, 0], sizes = [1, 8, 8], strides = [1, 1, 1]} : vector<4x8x8xf32> to vector<1x8x8xf32>
    %194 = vector.shape_cast %193 : vector<1x8x8xf32> to vector<8x8xf32>
    %195 = arith.addf %192, %194 : vector<8x8xf32>
    %cst_77 = arith.constant dense<0xFF800000> : vector<8xf32>
    %196 = vector.multi_reduction <maximumf>, %195, %cst_77 [1] : vector<8x8xf32> to vector<8xf32>
    %197 = vector.shape_cast %196 : vector<8xf32> to vector<8x1xf32>
    %198 = vector.broadcast %197 : vector<8x1xf32> to vector<8x8xf32>
    %199 = arith.subf %195, %198 : vector<8x8xf32>
    %200 = math.exp %199 : vector<8x8xf32>
    %cst_78 = arith.constant dense<0.000000e+00> : vector<8xf32>
    %201 = vector.multi_reduction <add>, %200, %cst_78 [1] : vector<8x8xf32> to vector<8xf32>
    %202 = vector.shape_cast %201 : vector<8xf32> to vector<8x1xf32>
    %203 = tpu.reciprocal %202 {approx = true} : vector<8x1xf32> -> vector<8x1xf32>
    %204 = vector.broadcast %203 : vector<8x1xf32> to vector<8x8xf32>
    %205 = arith.mulf %200, %204 : vector<8x8xf32>
    %cst_79 = arith.constant dense<0.000000e+00> : vector<8x8xf32>
    %206 = tpu.matmul %205, %191, %cst_79 {dimension_numbers = #tpu.dot_dimension_numbers<[1], [0], [0], [1], [0, 0, 1, 1], [], []>} : vector<8x8xf32>, vector<8x8xf32>, vector<8x8xf32> -> vector<8x8xf32>
    %207 = vector.extract_strided_slice %168 {offsets = [8, 0], sizes = [8, 32], strides = [1, 1]} : vector<32x32xf32> to vector<8x32xf32>
    %cst_80 = arith.constant dense<0.000000e+00> : vector<8x32xf32>
    %208 = tpu.matmul %206, %207, %cst_80 {dimension_numbers = #tpu.dot_dimension_numbers<[1], [0], [0], [1], [0, 0, 1, 1], [], []>} : vector<8x8xf32>, vector<8x32xf32>, vector<8x32xf32> -> vector<8x32xf32>
    %209 = arith.addf %188, %208 : vector<8x32xf32>
    %210 = vector.extract_strided_slice %164 {offsets = [0, 16], sizes = [8, 8], strides = [1, 1]} : vector<8x32xf32> to vector<8x8xf32>
    %211 = vector.extract_strided_slice %165 {offsets = [0, 16], sizes = [8, 8], strides = [1, 1]} : vector<8x32xf32> to vector<8x8xf32>
    %212 = vector.extract_strided_slice %166 {offsets = [0, 16], sizes = [8, 8], strides = [1, 1]} : vector<8x32xf32> to vector<8x8xf32>
    %cst_81 = arith.constant dense<0.000000e+00> : vector<8x8xf32>
    %213 = tpu.matmul %210, %211, %cst_81 {dimension_numbers = #tpu.dot_dimension_numbers<[1], [1], [0], [0], [0, 0, 1, 0], [], []>} : vector<8x8xf32>, vector<8x8xf32>, vector<8x8xf32> -> vector<8x8xf32>
    %214 = vector.extract_strided_slice %17 {offsets = [2, 0, 0], sizes = [1, 8, 8], strides = [1, 1, 1]} : vector<4x8x8xf32> to vector<1x8x8xf32>
    %215 = vector.shape_cast %214 : vector<1x8x8xf32> to vector<8x8xf32>
    %216 = arith.addf %213, %215 : vector<8x8xf32>
    %cst_82 = arith.constant dense<0xFF800000> : vector<8xf32>
    %217 = vector.multi_reduction <maximumf>, %216, %cst_82 [1] : vector<8x8xf32> to vector<8xf32>
    %218 = vector.shape_cast %217 : vector<8xf32> to vector<8x1xf32>
    %219 = vector.broadcast %218 : vector<8x1xf32> to vector<8x8xf32>
    %220 = arith.subf %216, %219 : vector<8x8xf32>
    %221 = math.exp %220 : vector<8x8xf32>
    %cst_83 = arith.constant dense<0.000000e+00> : vector<8xf32>
    %222 = vector.multi_reduction <add>, %221, %cst_83 [1] : vector<8x8xf32> to vector<8xf32>
    %223 = vector.shape_cast %222 : vector<8xf32> to vector<8x1xf32>
    %224 = tpu.reciprocal %223 {approx = true} : vector<8x1xf32> -> vector<8x1xf32>
    %225 = vector.broadcast %224 : vector<8x1xf32> to vector<8x8xf32>
    %226 = arith.mulf %221, %225 : vector<8x8xf32>
    %cst_84 = arith.constant dense<0.000000e+00> : vector<8x8xf32>
    %227 = tpu.matmul %226, %212, %cst_84 {dimension_numbers = #tpu.dot_dimension_numbers<[1], [0], [0], [1], [0, 0, 1, 1], [], []>} : vector<8x8xf32>, vector<8x8xf32>, vector<8x8xf32> -> vector<8x8xf32>
    %228 = vector.extract_strided_slice %168 {offsets = [16, 0], sizes = [8, 32], strides = [1, 1]} : vector<32x32xf32> to vector<8x32xf32>
    %cst_85 = arith.constant dense<0.000000e+00> : vector<8x32xf32>
    %229 = tpu.matmul %227, %228, %cst_85 {dimension_numbers = #tpu.dot_dimension_numbers<[1], [0], [0], [1], [0, 0, 1, 1], [], []>} : vector<8x8xf32>, vector<8x32xf32>, vector<8x32xf32> -> vector<8x32xf32>
    %230 = arith.addf %209, %229 : vector<8x32xf32>
    %231 = vector.extract_strided_slice %164 {offsets = [0, 24], sizes = [8, 8], strides = [1, 1]} : vector<8x32xf32> to vector<8x8xf32>
    %232 = vector.extract_strided_slice %165 {offsets = [0, 24], sizes = [8, 8], strides = [1, 1]} : vector<8x32xf32> to vector<8x8xf32>
    %233 = vector.extract_strided_slice %166 {offsets = [0, 24], sizes = [8, 8], strides = [1, 1]} : vector<8x32xf32> to vector<8x8xf32>
    %cst_86 = arith.constant dense<0.000000e+00> : vector<8x8xf32>
    %234 = tpu.matmul %231, %232, %cst_86 {dimension_numbers = #tpu.dot_dimension_numbers<[1], [1], [0], [0], [0, 0, 1, 0], [], []>} : vector<8x8xf32>, vector<8x8xf32>, vector<8x8xf32> -> vector<8x8xf32>
    %235 = vector.extract_strided_slice %17 {offsets = [3, 0, 0], sizes = [1, 8, 8], strides = [1, 1, 1]} : vector<4x8x8xf32> to vector<1x8x8xf32>
    %236 = vector.shape_cast %235 : vector<1x8x8xf32> to vector<8x8xf32>
    %237 = arith.addf %234, %236 : vector<8x8xf32>
    %cst_87 = arith.constant dense<0xFF800000> : vector<8xf32>
    %238 = vector.multi_reduction <maximumf>, %237, %cst_87 [1] : vector<8x8xf32> to vector<8xf32>
    %239 = vector.shape_cast %238 : vector<8xf32> to vector<8x1xf32>
    %240 = vector.broadcast %239 : vector<8x1xf32> to vector<8x8xf32>
    %241 = arith.subf %237, %240 : vector<8x8xf32>
    %242 = math.exp %241 : vector<8x8xf32>
    %cst_88 = arith.constant dense<0.000000e+00> : vector<8xf32>
    %243 = vector.multi_reduction <add>, %242, %cst_88 [1] : vector<8x8xf32> to vector<8xf32>
    %244 = vector.shape_cast %243 : vector<8xf32> to vector<8x1xf32>
    %245 = tpu.reciprocal %244 {approx = true} : vector<8x1xf32> -> vector<8x1xf32>
    %246 = vector.broadcast %245 : vector<8x1xf32> to vector<8x8xf32>
    %247 = arith.mulf %242, %246 : vector<8x8xf32>
    %cst_89 = arith.constant dense<0.000000e+00> : vector<8x8xf32>
    %248 = tpu.matmul %247, %233, %cst_89 {dimension_numbers = #tpu.dot_dimension_numbers<[1], [0], [0], [1], [0, 0, 1, 1], [], []>} : vector<8x8xf32>, vector<8x8xf32>, vector<8x8xf32> -> vector<8x8xf32>
    %249 = vector.extract_strided_slice %168 {offsets = [24, 0], sizes = [8, 32], strides = [1, 1]} : vector<32x32xf32> to vector<8x32xf32>
    %cst_90 = arith.constant dense<0.000000e+00> : vector<8x32xf32>
    %250 = tpu.matmul %248, %249, %cst_90 {dimension_numbers = #tpu.dot_dimension_numbers<[1], [0], [0], [1], [0, 0, 1, 1], [], []>} : vector<8x8xf32>, vector<8x32xf32>, vector<8x32xf32> -> vector<8x32xf32>
    %251 = arith.addf %230, %250 : vector<8x32xf32>
    %252 = arith.addf %146, %251 : vector<8x32xf32>
    %c1_91 = arith.constant 1 : index
    %c0_92 = arith.constant 0 : index
    %c0_93 = arith.constant 0 : index
    %253 = vector.load %arg8[%c1_91, %c0_92, %c0_93] : memref<2x1x32xf32, #tpu.memory_space<vmem>>, vector<1x1x32xf32>
    %254 = vector.shape_cast %253 : vector<1x1x32xf32> to vector<1x32xf32>
    %255 = arith.mulf %252, %252 : vector<8x32xf32>
    %cst_94 = arith.constant dense<0.000000e+00> : vector<8xf32>
    %256 = vector.multi_reduction <add>, %255, %cst_94 [1] : vector<8x32xf32> to vector<8xf32>
    %257 = vector.shape_cast %256 : vector<8xf32> to vector<8x1xf32>
    %cst_95 = arith.constant 3.200000e+01 : f32
    %258 = vector.broadcast %cst_95 : f32 to vector<8x1xf32>
    %259 = arith.divf %257, %258 : vector<8x1xf32>
    %cst_96 = arith.constant 9.99999997E-7 : f32
    %260 = vector.broadcast %cst_96 : f32 to vector<8x1xf32>
    %261 = arith.addf %259, %260 : vector<8x1xf32>
    %262 = math.rsqrt %261 : vector<8x1xf32>
    %263 = vector.broadcast %262 : vector<8x1xf32> to vector<8x32xf32>
    %264 = arith.mulf %252, %263 : vector<8x32xf32>
    %265 = vector.broadcast %254 : vector<1x32xf32> to vector<8x32xf32>
    %266 = arith.mulf %264, %265 : vector<8x32xf32>
    %c1_97 = arith.constant 1 : index
    %c0_98 = arith.constant 0 : index
    %c0_99 = arith.constant 0 : index
    %267 = vector.load %arg9[%c1_97, %c0_98, %c0_99] : memref<2x32x64xf32, #tpu.memory_space<vmem>>, vector<1x32x64xf32>
    %268 = vector.shape_cast %267 : vector<1x32x64xf32> to vector<32x64xf32>
    %cst_100 = arith.constant dense<0.000000e+00> : vector<8x64xf32>
    %269 = tpu.matmul %266, %268, %cst_100 {dimension_numbers = #tpu.dot_dimension_numbers<[1], [0], [0], [1], [0, 0, 1, 1], [], []>} : vector<8x32xf32>, vector<32x64xf32>, vector<8x64xf32> -> vector<8x64xf32>
    %cst_101 = arith.constant 0.000000e+00 : f32
    %270 = vector.broadcast %cst_101 : f32 to vector<8x64xf32>
    %271 = arith.maximumf %269, %270 : vector<8x64xf32>
    %c1_102 = arith.constant 1 : index
    %c0_103 = arith.constant 0 : index
    %c0_104 = arith.constant 0 : index
    %272 = vector.load %arg10[%c1_102, %c0_103, %c0_104] : memref<2x64x32xf32, #tpu.memory_space<vmem>>, vector<1x64x32xf32>
    %273 = vector.shape_cast %272 : vector<1x64x32xf32> to vector<64x32xf32>
    %cst_105 = arith.constant dense<0.000000e+00> : vector<8x32xf32>
    %274 = tpu.matmul %271, %273, %cst_105 {dimension_numbers = #tpu.dot_dimension_numbers<[1], [0], [0], [1], [0, 0, 1, 1], [], []>} : vector<8x64xf32>, vector<64x32xf32>, vector<8x32xf32> -> vector<8x32xf32>
    %275 = arith.addf %252, %274 : vector<8x32xf32>
    %c0_106 = arith.constant 0 : index
    %c0_107 = arith.constant 0 : index
    %276 = vector.load %arg11[%c0_106, %c0_107] : memref<1x32xf32, #tpu.memory_space<vmem>>, vector<1x32xf32>
    %277 = arith.mulf %275, %275 : vector<8x32xf32>
    %cst_108 = arith.constant dense<0.000000e+00> : vector<8xf32>
    %278 = vector.multi_reduction <add>, %277, %cst_108 [1] : vector<8x32xf32> to vector<8xf32>
    %279 = vector.shape_cast %278 : vector<8xf32> to vector<8x1xf32>
    %cst_109 = arith.constant 3.200000e+01 : f32
    %280 = vector.broadcast %cst_109 : f32 to vector<8x1xf32>
    %281 = arith.divf %279, %280 : vector<8x1xf32>
    %cst_110 = arith.constant 9.99999997E-7 : f32
    %282 = vector.broadcast %cst_110 : f32 to vector<8x1xf32>
    %283 = arith.addf %281, %282 : vector<8x1xf32>
    %284 = math.rsqrt %283 : vector<8x1xf32>
    %285 = vector.broadcast %284 : vector<8x1xf32> to vector<8x32xf32>
    %286 = arith.mulf %275, %285 : vector<8x32xf32>
    %287 = vector.broadcast %276 : vector<1x32xf32> to vector<8x32xf32>
    %288 = arith.mulf %286, %287 : vector<8x32xf32>
    %c0_111 = arith.constant 0 : index
    %c0_112 = arith.constant 0 : index
    %289 = vector.load %arg12[%c0_111, %c0_112] : memref<8x32xf32, #tpu.memory_space<vmem>>, vector<8x32xf32>
    tpu.vector_store %arg12[%c0_111, %c0_112], %288 {strides = array<i32>} : memref<8x32xf32, #tpu.memory_space<vmem>>, vector<8x32xf32>,
    return
  }
  func.func @transform_0(%arg0: i32) -> (i32, i32) {
    %c0_i32 = arith.constant 0 : i32
    %c0_i32_0 = arith.constant 0 : i32
    return %arg0, %c0_i32 : i32, i32
  }
  func.func @transform_1(%arg0: i32) -> (i32, i32, i32) {
    %c0_i32 = arith.constant 0 : i32
    %c0_i32_0 = arith.constant 0 : i32
    %c0_i32_1 = arith.constant 0 : i32
    return %arg0, %c0_i32, %c0_i32_0 : i32, i32, i32
  }
  func.func @transform_2(%arg0: i32) -> (i32, i32) {
    %c0_i32 = arith.constant 0 : i32
    %c0_i32_0 = arith.constant 0 : i32
    %c0_i32_1 = arith.constant 0 : i32
    return %c0_i32, %c0_i32_0 : i32, i32
  }
  func.func @transform_3(%arg0: i32) -> (i32, i32, i32) {
    %c0_i32 = arith.constant 0 : i32
    %c0_i32_0 = arith.constant 0 : i32
    %c0_i32_1 = arith.constant 0 : i32
    %c0_i32_2 = arith.constant 0 : i32
    return %c0_i32, %c0_i32_0, %c0_i32_1 : i32, i32, i32
  }
  func.func @transform_4(%arg0: i32) -> (i32, i32, i32) {
    %c0_i32 = arith.constant 0 : i32
    %c0_i32_0 = arith.constant 0 : i32
    %c0_i32_1 = arith.constant 0 : i32
    %c0_i32_2 = arith.constant 0 : i32
    return %c0_i32, %c0_i32_0, %c0_i32_1 : i32, i32, i32
  }
  func.func @transform_5(%arg0: i32) -> (i32, i32, i32) {
    %c0_i32 = arith.constant 0 : i32
    %c0_i32_0 = arith.constant 0 : i32
    %c0_i32_1 = arith.constant 0 : i32
    %c0_i32_2 = arith.constant 0 : i32
    return %c0_i32, %c0_i32_0, %c0_i32_1 : i32, i32, i32
  }
  func.func @transform_6(%arg0: i32) -> (i32, i32, i32) {
    %c0_i32 = arith.constant 0 : i32
    %c0_i32_0 = arith.constant 0 : i32
    %c0_i32_1 = arith.constant 0 : i32
    %c0_i32_2 = arith.constant 0 : i32
    return %c0_i32, %c0_i32_0, %c0_i32_1 : i32, i32, i32
  }
  func.func @transform_7(%arg0: i32) -> (i32, i32, i32) {
    %c0_i32 = arith.constant 0 : i32
    %c0_i32_0 = arith.constant 0 : i32
    %c0_i32_1 = arith.constant 0 : i32
    %c0_i32_2 = arith.constant 0 : i32
    return %c0_i32, %c0_i32_0, %c0_i32_1 : i32, i32, i32
  }
  func.func @transform_8(%arg0: i32) -> (i32, i32, i32) {
    %c0_i32 = arith.constant 0 : i32
    %c0_i32_0 = arith.constant 0 : i32
    %c0_i32_1 = arith.constant 0 : i32
    %c0_i32_2 = arith.constant 0 : i32
    return %c0_i32, %c0_i32_0, %c0_i32_1 : i32, i32, i32
  }
  func.func @transform_9(%arg0: i32) -> (i32, i32, i32) {
    %c0_i32 = arith.constant 0 : i32
    %c0_i32_0 = arith.constant 0 : i32
    %c0_i32_1 = arith.constant 0 : i32
    %c0_i32_2 = arith.constant 0 : i32
    return %c0_i32, %c0_i32_0, %c0_i32_1 : i32, i32, i32
  }
  func.func @transform_10(%arg0: i32) -> (i32, i32) {
    %c0_i32 = arith.constant 0 : i32
    %c0_i32_0 = arith.constant 0 : i32
    %c0_i32_1 = arith.constant 0 : i32
    return %c0_i32, %c0_i32_0 : i32, i32
  }
  func.func @transform_11(%arg0: i32) -> (i32, i32) {
    %c0_i32 = arith.constant 0 : i32
    %c0_i32_0 = arith.constant 0 : i32
    return %arg0, %c0_i32 : i32, i32
  }
}

</mosaic_0001>

<bundles_post_ra>
// kernel: simctg_t5_forward.2
= control target key start
LH: loop header
LB: loop body
LE: loop exit
PB: predicated region body
PF: predicated region fallthrough
CT: control target
= control target key end

     0   :  { %s3690_s17 = smov 0   ;;  %s4167_s0 = inlined_call_operand.vmem [shape: s32[16,1], index: 0, kind: input, shape index: {}]   ;;  %s4168_s1 = inlined_call_operand.vmem [shape: f32[2,1,8], index: 1, kind: input, shape index: {}]   ;;  %s4169_s2 = inlined_call_operand.vmem [shape: f32[128,32], index: 2, kind: input, shape index: {}]   ;;  %s4170_s3 = inlined_call_operand.vmem [shape: f32[4,8,8], index: 3, kind: input, shape index: {}]   ;;  %s4171_s4 = inlined_call_operand.vmem [shape: f32[2,1,32], index: 4, kind: input, shape index: {}]   ;;  %s4172_s5 = inlined_call_operand.vmem [shape: f32[2,32,96], index: 5, kind: input, shape index: {}]   ;;  %s4173_s6 = inlined_call_operand.vmem [shape: f32[2,32,32], index: 6, kind: input, shape index: {}]   ;;  %s4174_s7 = inlined_call_operand.vmem [shape: f32[2,1,32], index: 7, kind: input, shape index: {}]   ;;  %s4175_s8 = inlined_call_operand.vmem [shape: f32[2,32,64], index: 8, kind: input, shape index: {}]   ;;  %s4176_s9 = inlined_call_operand.vmem [shape: f32[2,64,32], index: 9, kind: input, shape index: {}]   ;;  %s4177_s10 = inlined_call_operand.vmem [shape: f32[1,32], index: 10, kind: input, shape index: {}]   ;;  %s4178_s11 = inlined_call_operand.vmem [shape: f32[16,32], index: 11, kind: output, shape index: {}]  }
   0x1 LB: > { %s3051_s18 = sadd.s32 4294967295, %s3612_s17   ;;  %p3055_p0 = scmp.ge.s32.totalorder %s3612_s17, 1  ;;  %s3612_s17 = sphi %s3690_s17, %s21_s17  }
   0x2   : > { %p344_p1 = scmp.lt.s32.totalorder %s3612_s17, 3 }
   0x4   : > { %p345_p2 = pnand %p3055_p0, %p344_p1 }
   0x5   : > { %p385_p3 = scmp.lt.s32.totalorder (!%p345_p2), %s3051_s18, 1  ;;  %v396_v0 = vld [vmem:[%s4169_s2] sm:$0xff] (!%p345_p2)  ;;  %v397_v1 = vld [vmem:[%s4169_s2 + $0x8] sm:$0xff] (!%p345_p2)  ;;  %v398_v2 = vld [vmem:[%s4169_s2 + $0x10] sm:$0xff] (!%p345_p2)  ;;  %v413_v3 = vlaneseq (!%p345_p2)  ;;  %v3614_v4 = vmov (!%p345_p2), 0   ;;  %v3615_v5 = vmov (!%p345_p2), 0.0|0.0  }
   0x6   : > { %348 = sbr.rel (%p345_p2) target bundleno = 7174 (0x1c06), region = 64  ;;  %3563 = vset.pattern.permute.xlu0 (!%p345_p2), %v3614_v4  ;;  %3467 = vmatprep.subr.bf16.mxu0 (!%p345_p2), %v3615_v5  ;;  %v3468_v6 = vpack.c.bf16 (!%p345_p2), %v397_v1, %v396_v0  ;;  %v399_v7 = vld [vmem:[%s4169_s2 + $0x18] sm:$0xff] (!%p345_p2)  ;;  %v400_v10 = vld [vmem:[%s4169_s2 + $0x20] sm:$0xff] (!%p345_p2)  ;;  %v401_v11 = vld [vmem:[%s4169_s2 + $0x28] sm:$0xff] (!%p345_p2)  ;;  %vm3616_vm0 = vmmov (!%p345_p2), 0   ;;  %v3617_v20 = vmov (!%p345_p2), 0.0  }
   0x7   : > { %v500_v8 = vshrl.u32 (!%p345_p2), %v413_v3, 7  ;;  %3491 = vmatprep.subr.bf16.mxu1 (!%p345_p2), %v3615_v5  ;;  %v3471_v9 = vpack.c.bf16 (!%p345_p2), %v399_v7, %v398_v2  ;;  %v3474_v16 = vpack.c.bf16 (!%p345_p2), %v401_v11, %v400_v10  ;;  %v402_v18 = vld [vmem:[%s4169_s2 + $0x30] sm:$0xff] (!%p345_p2)  ;;  %v403_v19 = vld [vmem:[%s4169_s2 + $0x38] sm:$0xff] (!%p345_p2)  ;;  %3262 = vmatprep.mubr.msk.f32.mxu0 (!%p345_p2), %vm3616_vm0, %v3617_v20  ;;  %v404_v23 = vld [vmem:[%s4169_s2 + $0x40] sm:$0xff] (!%p345_p2)  ;;  %v414_v35 = vand.u32 (!%p345_p2), 127, %v413_v3  ;;  %s3619_s19 = smov (!%p345_p2), 96  }
   0x8   : > { %3469 = vmatpush3.bf16.msra.mxu0 (!%p345_p2), %v3468_v6  ;;  %3273 = vmatprep.mubr.msk.f32.mxu1 (!%p345_p2), %vm3616_vm0, %v3617_v20  ;;  %v3477_v22 = vpack.c.bf16 (!%p345_p2), %v403_v19, %v402_v18  ;;  %v405_v24 = vld [vmem:[%s4169_s2 + $0x48] sm:$0xff] (!%p345_p2)  ;;  %v406_v26 = vld [vmem:[%s4169_s2 + $0x50] sm:$0xff] (!%p345_p2)  ;;  %v407_v27 = vld [vmem:[%s4169_s2 + $0x58] sm:$0xff] (!%p345_p2)  ;;  %v3618_v37 = vmov (!%p345_p2), 1.0   ;;  %vm510_vm2 = vcmask (!%p345_p2), 261120   ;;  %vm610_vm3 = vcmask (!%p345_p2), 64512  }
   0x9   : > { %3470 = vmatprep.subr.bf16.mxu0 (!%p345_p2), %v3615_v5  ;;  %v501_v15 = vsub.s32 (!%p345_p2), 0, %v500_v8  ;;  %v3480_v25 = vpack.c.bf16 (!%p345_p2), %v405_v24, %v404_v23  ;;  %v3483_v28 = vpack.c.bf16 (!%p345_p2), %v407_v27, %v406_v26  ;;  %v408_v29 = vld [vmem:[%s4169_s2 + $0x60] sm:$0xff] (!%p345_p2)  ;;  %v409_v30 = vld [vmem:[%s4169_s2 + $0x68] sm:$0xff] (!%p345_p2)  ;;  %v410_v32 = vld [vmem:[%s4169_s2 + $0x70] sm:$0xff] (!%p345_p2)  ;;  %s3620_s22 = smov (!%p345_p2), 88   ;;  %s3621_s23 = smov (!%p345_p2), 120  }
   0xa   : > { %v3486_v31 = vpack.c.bf16 (!%p345_p2), %v409_v30, %v408_v29  ;;  %v411_v33 = vld [vmem:[%s4169_s2 + $0x78] sm:$0xff] (!%p345_p2)  ;;  %v526_v42 = vld [vmem:[%s4172_s5] sm:$0xff] (!%p345_p2)  ;;  %v527_v43 = vld [vmem:[%s4172_s5 + $0x8] sm:$0xff] (!%p345_p2)  ;;  %s3622_s24 = smov (!%p345_p2), 112   ;;  %s3623_s25 = smov (!%p345_p2), 64   ;;  %vm1664_vm4 = vcmask (!%p345_p2), 523264  }
   0xb   : > { %v3489_v34 = vpack.c.bf16 (!%p345_p2), %v411_v33, %v410_v32  ;;  %v528_v44 = vld [vmem:[%s4172_s5 + $0x10] sm:$0xff] (!%p345_p2)  ;;  %v3492_v45 = vpack.c.bf16 (!%p345_p2), %v527_v43, %v526_v42  ;;  %v529_v46 = vld [vmem:[%s4172_s5 + $0x18] sm:$0xff] (!%p345_p2)  ;;  %v3060_v52 = vld [vmem:[%s4171_s4] ss:$0 sm:$0xff] (!%p345_p2)  ;;  %s3624_s26 = smov (!%p345_p2), 80   ;;  %s4181_s12 = smov (!%p345_p2), 72  }
   0xc   : > { %3472 = vmatpush3.bf16.msra.mxu0 (!%p345_p2), %v3471_v9  ;;  %v3495_v47 = vpack.c.bf16 (!%p345_p2), %v529_v46, %v528_v44  ;;  %v494_v58 = vld [vmem:[%s4170_s3] sm:$0xff] (!%p345_p2)  ;;  %s4182_s13 = smov (!%p345_p2), 104   ;;  %v496_v30 = vld [vmem:[%s4170_s3 + $0x10] sm:$0xff] (!%p345_p2)  ;;  %s4183_s16 = smov (!%p345_p2), 48  }
   0xd   : > { %s4190_s18 = smov (!%p385_p3, %s3051_s18), 1  ;;  %3473 = vmatprep.subr.bf16.mxu0 %v3615_v5  ;;  %3493 = vmatpush3.bf16.msra.mxu1 %v3492_v45  ;;  %v604_v45 = vld [vmem:[%s4173_s6 + $0x8] sm:$0xff]  ;;  %s4180_s28 = smov 40  }
   0xe   : > { %s4179_s27 = sshll.u32 %s4190_s18, 3  ;;  %s391_s30 = scalar_lea.vmem %s4168_s1, %s4190_s18  ;;  %3494 = vmatprep.subr.bf16.mxu1 %v3615_v5 }
   0xf   : > { %s388_s20 = scalar_lea.vmem %s4167_s0, %s4179_s27  ;;  %v491_v12 = vld [vmem:[%s391_s30] sm:$0x1]  ;;  %s3625_s30 = smov 56  }
  0x10   : > { %v412_v13 = vld [vmem:[%s388_s20] sm:$0xff]  ;;  %v492_v14 = vsub.f32 1.0, %v491_v12  ;;  %3475 = vmatpush3.bf16.msra.mxu0 %v3474_v16  ;;  %s4187_s15 = smov 40  }
  0x11   : > { %416 = vperm.xlu0 %3563, %v412_v13   ;;  %3476 = vmatprep.subr.bf16.mxu0 %v3615_v5 }
  0x12   : > { %v493_v17 = vmul.f32 -1e+09, %v492_v14  ;;  %3496 = vmatpush3.bf16.msra.mxu1 %v3495_v47  ;;  %v603_v47 = vld [vmem:[%s4173_s6] sm:$0xff] }
  0x13   : > { %3281 = vmatprep.subr.mxu1 %v3617_v20 }
  0x14   : > { %v3742_v21 = vrot.slane %v493_v17, %v501_v15  ;;  %3478 = vmatpush3.bf16.msra.mxu0 %v3477_v22  ;;  %v495_v15 = vld [vmem:[%s4170_s3 + $0x8] sm:$0xff] }
  0x15   : > { %3479 = vmatprep.subr.bf16.mxu0 %v3615_v5 }
  0x16   : > { %v3816_v59 = vadd.f32 %v3742_v21, %v494_v58  ;;  %v3849_v19 = vadd.f32 %v3742_v21, %v495_v15 }
  0x18   : > { %3481 = vmatpush3.bf16.msra.mxu0 %v3480_v25 }
  0x19   : > { %3482 = vmatprep.subr.bf16.mxu0 %v3615_v5 }
  0x1c   : > { %3484 = vmatpush3.bf16.msra.mxu0 %v3483_v28 }
  0x1d   : > { %3485 = vmatprep.subr.bf16.mxu0 %v3615_v5 }
  0x20   : > { %3487 = vmatpush3.bf16.msra.mxu0 %v3486_v31  ;;  %v3864_v31 = vadd.f32 %v3742_v21, %v496_v30  ;;  %v1578_v30 = vld [vmem:[%s4175_s8] sm:$0xff] }
  0x21   : > { %3488 = vmatprep.subr.bf16.mxu0 %v3615_v5 }
  0x24   : > { %3490 = vmatpush3.bf16.msra.mxu0 %v3489_v34 }
  0x25   : > { %3276 = vmatprep.subr.mxu0 %v3617_v20 }
  0x90   : > { %v417_v36 = vpop.permute.xlu0 %416 }
  0x91   : > { %vm418_vm1 = vcmp.eq.s32.totalorder %v414_v35, %v417_v36 }
  0x92   : > { %3263 = vmatmul.mubr.msk.f32.vlgmr.msra.gmra.mrb[0].mxu0 %vm418_vm1, %v3618_v37 }
  0x93   : > { %3278 = vmatprep.mubr.msk.f32.mxu0 %vm3616_vm0, %v3617_v20 }
 0x165   : > { %v3776_v38 = vpop.f32.mrb[0].mxu0 }
 0x166   : > { %v3264_v39 = vpop.f32.mrb[1].mxu0  ;;  %v509_v40 = vmul.f32 %v3776_v38, %v3776_v38 }
 0x168   : > { %v511_v41 = vsel %vm510_vm2, %v509_v40, 0.0 }
 0x169   : > { %512 = vadd.xlane.f32.xlu0 %v511_v41 }
 0x1f6   : > { %v513_v48 = vpop.xlane.xlu0 %512 }
 0x1f7   : > { %v515_v49 = vmul.f32 0.03125, %v513_v48 }
 0x1f9   : > { %v516_v50 = vadd.f32 1e-06, %v515_v49 }
 0x1fb   : > { %3564 = vrsqrt.f32 %v516_v50 }
 0x205   : > { %v3565_v51 = vpop.eup %3564 }
 0x206   : > { %v518_v53 = vmul.f32 %v3565_v51, %v3776_v38 }
 0x208   : > { %v525_v54 = vmul.f32 %v3060_v52, %v518_v53 }
 0x20a   : > { %3274 = vmatmul.mubr.msk.f32.vlgmr.msra.gmra.mrb[0].mxu1 %vm510_vm2, %v525_v54 }
 0x20b   : > { %3283 = vmatprep.mubr.msk.f32.mxu1 %vm3616_vm0, %v3617_v20 }
 0x2dd   : > { %v3802_v55 = vpop.f32.mrb[0].mxu1 }
 0x2de   : > { %608 = vrot.lane.b32.xlu1 %v3802_v55, %s3619_s19  ;;  %v3275_v56 = vpop.f32.mrb[1].mxu1 }
 0x2df   : > { %v605_v56 = vld [vmem:[%s4173_s6 + $0x10] sm:$0xff] }
 0x350   : > { %v609_v57 = vpop.permute.xlu1 %608 }
 0x351   : > { %3277 = vmatpush3.xpose.msk.msra.mxu0 %vm610_vm3, %v609_v57 }
 0x352   : > { %3306 = vmatprep.subr.mxu0 %v3617_v20 }
 0x354   : > { %3279 = vmatmul.mubr.msk.f32.vlgmr.msra.gmra.mrb[2].mxu0 %vm610_vm3, %v3802_v55 }
 0x355   : > { %3308 = vmatprep.mubr.msk.f32.mxu0 %vm3616_vm0, %v3617_v20 }
 0x427   : > { %v681_v60 = vpop.f32.mrb[2].mxu0 }
 0x428   : > { %v682_v61 = vadd.f32 %v681_v60, %v3816_v59  ;;  %v3280_v62 = vpop.f32.mrb[3].mxu0 }
 0x42a   : > { %v685_v63 = vsel %vm610_vm3, %v682_v61, -inf }
 0x42b   : > { %686 = vmax.xlane.f32.xlu1 %v685_v63 }
 0x43c   : > { %774 = vrot.lane.b32.xlu1 %v3802_v55, %s3620_s22 }
 0x440   : > { %772 = vrot.lane.b32.xlu1 %v3802_v55, %s3621_s23 }
 0x444   : > { %1083 = vrot.lane.b32.xlu1 %v3802_v55, %s3622_s24 }
 0x4b8   : > { %v687_v0 = vpop.xlane.xlu1 %686 }
 0x4b9   : > { %v688_v1 = vsub.f32 %v682_v61, %v687_v0 }
 0x4bb   : > { %v689_v2 = vmul.f32 1.442695, %v688_v1  ;;  %v497_v1 = vld [vmem:[%s4170_s3 + $0x18] sm:$0xff] }
 0x4bc   : > { %v775_v6 = vpop.permute.xlu1 %774 }
 0x4bd   : > { %3566 = vpow2.f32 %v689_v2  ;;  %v3909_v2 = vadd.f32 %v3742_v21, %v497_v1 }
 0x4c0   : > { %v773_v9 = vpop.permute.xlu1 %772 }
 0x4c4   : > { %v1084_v12 = vpop.permute.xlu1 %1083 }
 0x4c7   : > { %v3567_v3 = vpop.eup %3566 }
 0x4c8   : > { %v691_v4 = vsel %vm610_vm3, %v3567_v3, 0.0 }
 0x4c9   : > { %692 = vadd.xlane.f32.xlu0 %v691_v4 }
 0x4df   : > { %696 = vrot.lane.b32.xlu0 %v3802_v55, %s3623_s25 }
 0x4e3   : > { %1085 = vrot.lane.b32.xlu0 %v3802_v55, %s3624_s26 }
 0x556   : > { %v693_v7 = vpop.xlane.xlu0 %692 }
 0x557   : > { %3568 = vrcp.f32 %v693_v7 }
 0x55a   : > { %v697_v8 = vpop.permute.xlu0 %696 }
 0x55b   : > { %3282 = vmatpush3.msra.mxu1 %v697_v8 }
 0x55c   : > { %3286 = vmatprep.subr.mxu1 %v3617_v20 }
 0x55e   : > { %v1086_v10 = vpop.permute.xlu0 %1085 }
 0x55f   : > { %3307 = vmatpush3.xpose.msk.msra.mxu0 %vm610_vm3, %v1086_v10 }
 0x560   : > { %3316 = vmatprep.subr.mxu0 %v3617_v20 }
 0x561   : > { %v3569_v11 = vpop.eup %3568 }
 0x562   : > { %v695_v13 = vmul.f32 %v3569_v11, %v3567_v3  ;;  %3309 = vmatmul.mubr.msk.f32.vlgmr.msra.gmra.mrb[4].mxu0 %vm610_vm3, %v1084_v12 }
 0x563   : > { %3318 = vmatprep.mubr.msk.f32.mxu0 %vm3616_vm0, %v3617_v20  ;;  %3317 = vmatpush3.msra.mxu0 %v605_v56 }
 0x564   : > { %3284 = vmatmul.mubr.msk.f32.vlgmr.msra.gmra.mrb[2].mxu1 %vm610_vm3, %v695_v13  ;;  %3326 = vmatprep.subr.mxu0 %v3617_v20  ;;  %v606_v13 = vld [vmem:[%s4173_s6 + $0x18] sm:$0xff] }
 0x565   : > { %3287 = vmatpush3.xpose.msk.msra.mxu1 %vm610_vm3, %v775_v6  ;;  %3288 = vmatprep.mubr.msk.f32.mxu1 %vm3616_vm0, %v3617_v20 }
 0x566   : > { %3291 = vmatprep.subr.mxu1 %v3617_v20 }
 0x568   : > { %3289 = vmatmul.mubr.msk.f32.vlgmr.msra.gmra.mrb[4].mxu1 %vm610_vm3, %v773_v9 }
 0x569   : > { %3293 = vmatprep.mubr.msk.f32.mxu1 %vm3616_vm0, %v3617_v20 }
 0x635   : > { %v1157_v14 = vpop.f32.mrb[4].mxu0 }
 0x636   : > { %v3310_v16 = vpop.f32.mrb[5].mxu0  ;;  %v1158_v33 = vadd.f32 %v1157_v14, %v3864_v31 }
 0x637   : > { %v768_v17 = vpop.f32.mrb[2].mxu1 }
 0x638   : > { %v3285_v18 = vpop.f32.mrb[3].mxu1  ;;  %v1161_v35 = vsel %vm610_vm3, %v1158_v33, -inf }
 0x63b   : > { %v846_v22 = vpop.f32.mrb[4].mxu1 }
 0x63c   : > { %v847_v23 = vadd.f32 %v846_v22, %v3849_v19  ;;  %v3290_v24 = vpop.f32.mrb[5].mxu1 }
 0x63e   : > { %v850_v25 = vsel %vm610_vm3, %v847_v23, -inf }
 0x63f   : > { %851 = vmax.xlane.f32.xlu0 %v850_v25 }
 0x655   : > { %861 = vrot.lane.b32.xlu0 %v3802_v55, %s3625_s30 }
 0x659   : > { %1324 = vrot.lane.b32.xlu0 %v3802_v55, %s4181_s12 }
 0x65d   : > { %1322 = vrot.lane.b32.xlu0 %v3802_v55, %s4182_s13 }
 0x6cc   : > { %v852_v26 = vpop.xlane.xlu0 %851 }
 0x6cd   : > { %v853_v27 = vsub.f32 %v847_v23, %v852_v26 }
 0x6cf   : > { %v854_v28 = vmul.f32 1.442695, %v853_v27 }
 0x6d0   : > { %v862_v29 = vpop.permute.xlu0 %861 }
 0x6d1   : > { %3570 = vpow2.f32 %v854_v28  ;;  %3292 = vmatpush3.msra.mxu1 %v862_v29 }
 0x6d2   : > { %3296 = vmatprep.subr.mxu1 %v3617_v20 }
 0x6d4   : > { %v1325_v53 = vpop.permute.xlu0 %1324 }
 0x6d8   : > { %v1323_v54 = vpop.permute.xlu0 %1322 }
 0x6db   : > { %v3571_v32 = vpop.eup %3570 }
 0x6dc   : > { %v856_v34 = vsel %vm610_vm3, %v3571_v32, 0.0 }
 0x6dd   : > { %857 = vadd.xlane.f32.xlu1 %v856_v34  ;;  %v1581_v34 = vld [vmem:[%s4175_s8 + $0x18] sm:$0xff] }
 0x6e1   : > { %1162 = vmax.xlane.f32.xlu1 %v1161_v35 }
 0x76a   : > { %v858_v36 = vpop.xlane.xlu1 %857 }
 0x76b   : > { %3572 = vrcp.f32 %v858_v36  ;;  %v1656_v36 = vld [vmem:[%s4176_s9] sm:$0xff] }
 0x76e   : > { %v1163_v37 = vpop.xlane.xlu1 %1162 }
 0x76f   : > { %v1164_v39 = vsub.f32 %v1158_v33, %v1163_v37  ;;  %v1657_v37 = vld [vmem:[%s4176_s9 + $0x8] sm:$0xff] }
 0x771   : > { %v1165_v40 = vmul.f32 1.442695, %v1164_v39  ;;  %v1658_v39 = vld [vmem:[%s4176_s9 + $0x10] sm:$0xff] }
 0x773   : > { %3574 = vpow2.f32 %v1165_v40  ;;  %v3504_v40 = vpack.c.bf16 %v1657_v37, %v1656_v36 }
 0x775   : > { %v3573_v41 = vpop.eup %3572 }
 0x776   : > { %v860_v42 = vmul.f32 %v3573_v41, %v3571_v32  ;;  %v1579_v32 = vld [vmem:[%s4175_s8 + $0x8] sm:$0xff]  ;;  %v1659_v41 = vld [vmem:[%s4176_s9 + $0x18] sm:$0xff] }
 0x777   : > { %v3498_v33 = vpack.c.bf16 %v1579_v32, %v1578_v30 }
 0x778   : > { %3294 = vmatmul.mubr.msk.f32.vlgmr.msra.gmra.mrb[6].mxu1 %vm610_vm3, %v860_v42  ;;  %v3507_v42 = vpack.c.bf16 %v1659_v41, %v1658_v39  ;;  %v3089_v41 = vld [vmem:[%s4173_s6 + $0x28] sm:$0xff] }
 0x779   : > { %3298 = vmatprep.mubr.msk.f32.mxu1 %vm3616_vm0, %v3617_v20  ;;  %3297 = vmatpush3.msra.mxu1 %v604_v45 }
 0x77a   : > { %3301 = vmatprep.subr.mxu1 %v3617_v20 }
 0x77d   : > { %v3575_v43 = vpop.eup %3574 }
 0x77e   : > { %v1167_v44 = vsel %vm610_vm3, %v3575_v43, 0.0 }
 0x77f   : > { %1168 = vadd.xlane.f32.xlu1 %v1167_v44  ;;  %v1661_v44 = vld [vmem:[%s4176_s9 + $0x28] sm:$0xff] }
 0x790   : > { %1172 = vrot.lane.b32.xlu1 %v3802_v55, %s4183_s16 }
 0x80c   : > { %v1169_v46 = vpop.xlane.xlu1 %1168 }
 0x80d   : > { %3576 = vrcp.f32 %v1169_v46 }
 0x810   : > { %v1173_v51 = vpop.permute.xlu1 %1172 }
 0x817   : > { %v3577_v50 = vpop.eup %3576 }
 0x818   : > { %v1171_v52 = vmul.f32 %v3577_v50, %v3575_v43  ;;  %v1660_v43 = vld [vmem:[%s4176_s9 + $0x20] sm:$0xff] }
 0x819   : > { %v3510_v45 = vpack.c.bf16 %v1661_v44, %v1660_v43  ;;  %v3078_v50 = vld [vmem:[%s4174_s7] ss:$0 sm:$0xff] }
 0x84b   : > { %v933_v48 = vpop.f32.mrb[6].mxu1 }
 0x84c   : > { %v3295_v49 = vpop.f32.mrb[7].mxu1  ;;  %3299 = vmatmul.mubr.msk.f32.vlgmr.msra.gmra.mrb[8].mxu1 %vm610_vm3, %v933_v48 }
 0x84d   : > { %3302 = vmatpush3.msra.mxu1 %v603_v47  ;;  %3303 = vmatprep.mubr.msk.f32.mxu1 %vm3616_vm0, %v3617_v20 }
 0x84e   : > { %3311 = vmatprep.subr.mxu1 %v3617_v20 }
 0x850   : > { %3304 = vmatmul.mubr.msk.f32.vlgmr.msra.gmra.mrb[10].mxu1 %vm610_vm3, %v768_v17 }
 0x851   : > { %3312 = vmatpush3.msra.mxu1 %v1173_v51  ;;  %3313 = vmatprep.mubr.msk.f32.mxu1 %vm3616_vm0, %v3617_v20 }
 0x852   : > { %3321 = vmatprep.subr.mxu1 %v3617_v20 }
 0x854   : > { %3314 = vmatmul.mubr.msk.f32.vlgmr.msra.gmra.mrb[12].mxu1 %vm610_vm3, %v1171_v52 }
 0x855   : > { %3323 = vmatprep.mubr.msk.f32.mxu1 %vm3616_vm0, %v3617_v20 }
 0x858   : > { %3322 = vmatpush3.xpose.msk.msra.mxu1 %vm610_vm3, %v1325_v53  ;;  %v1662_v53 = vld [vmem:[%s4176_s9 + $0x30] sm:$0xff] }
 0x859   : > { %3331 = vmatprep.subr.mxu1 %v3617_v20 }
 0x85b   : > { %3324 = vmatmul.mubr.msk.f32.vlgmr.msra.gmra.mrb[14].mxu1 %vm610_vm3, %v1323_v54  ;;  %v1663_v54 = vld [vmem:[%s4176_s9 + $0x38] sm:$0xff] }
 0x85c   : > { %3333 = vmatprep.mubr.msk.f32.mxu1 %vm3616_vm0, %v3617_v20  ;;  %3332 = vmatpush3.msra.mxu1 %v606_v13  ;;  %v3513_v56 = vpack.c.bf16 %v1663_v54, %v1662_v53  ;;  %v3082_v13 = vld [vmem:[%s4171_s4 + $0x1] ss:$0 sm:$0xff] }
 0x85d   : > { %3503 = vmatprep.subr.bf16.mxu1 %v3615_v5 }
 0x91f   : > { %v1006_v57 = vpop.f32.mrb[8].mxu1 }
 0x920   : > { %v3300_v58 = vpop.f32.mrb[9].mxu1 }
 0x923   : > { %v1079_v60 = vpop.f32.mrb[10].mxu1 }
 0x924   : > { %v1080_v61 = vadd.f32 %v1079_v60, %v1006_v57  ;;  %v3305_v62 = vpop.f32.mrb[11].mxu1 }
 0x927   : > { %v1244_v63 = vpop.f32.mrb[12].mxu1 }
 0x928   : > { %v3315_v0 = vpop.f32.mrb[13].mxu1  ;;  %3319 = vmatmul.mubr.msk.f32.vlgmr.msra.gmra.mrb[6].mxu0 %vm610_vm3, %v1244_v63 }
 0x929   : > { %3328 = vmatprep.mubr.msk.f32.mxu0 %vm3616_vm0, %v3617_v20 }
 0x92e   : > { %v1396_v3 = vpop.f32.mrb[14].mxu1 }
 0x92f   : > { %v1397_v4 = vadd.f32 %v1396_v3, %v3909_v2  ;;  %v3325_v6 = vpop.f32.mrb[15].mxu1  ;;  %v3083_v3 = vld [vmem:[%s4172_s5 + $0x20] sm:$0xff] }
 0x931   : > { %v1400_v7 = vsel %vm610_vm3, %v1397_v4, -inf }
 0x932   : > { %1401 = vmax.xlane.f32.xlu0 %v1400_v7  ;;  %v3085_v7 = vld [vmem:[%s4172_s5 + $0x30] sm:$0xff] }
 0x948   : > { %1411 = vrot.lane.b32.xlu0 %v3802_v55, %s4180_s28 }
 0x9bf   : > { %v1402_v8 = vpop.xlane.xlu0 %1401 }
 0x9c0   : > { %v1403_v9 = vsub.f32 %v1397_v4, %v1402_v8  ;;  %v3084_v4 = vld [vmem:[%s4172_s5 + $0x28] sm:$0xff]  ;;  %v3086_v8 = vld [vmem:[%s4172_s5 + $0x38] sm:$0xff] }
 0x9c1   : > { %v3516_v6 = vpack.c.bf16 %v3084_v4, %v3083_v3 }
 0x9c2   : > { %v1404_v10 = vmul.f32 1.442695, %v1403_v9  ;;  %v3519_v9 = vpack.c.bf16 %v3086_v8, %v3085_v7 }
 0x9c3   : > { %v1412_v11 = vpop.permute.xlu0 %1411 }
 0x9c4   : > { %3578 = vpow2.f32 %v1404_v10  ;;  %3327 = vmatpush3.msra.mxu0 %v1412_v11 }
 0x9c5   : > { %3497 = vmatprep.subr.bf16.mxu0 %v3615_v5 }
 0x9ce   : > { %v3579_v21 = vpop.eup %3578 }
 0x9cf   : > { %v1406_v12 = vsel %vm610_vm3, %v3579_v21, 0.0 }
 0x9d0   : > { %1407 = vadd.xlane.f32.xlu1 %v1406_v12 }
 0x9fb   : > { %v1317_v55 = vpop.f32.mrb[6].mxu0 }
 0x9fc   : > { %v1321_v14 = vadd.f32 %v1317_v55, %v1080_v61  ;;  %v3320_v15 = vpop.f32.mrb[7].mxu0 }
 0xa5d   : > { %v1408_v16 = vpop.xlane.xlu1 %1407 }
 0xa5e   : > { %3580 = vrcp.f32 %v1408_v16 }
 0xa68   : > { %v3581_v17 = vpop.eup %3580 }
 0xa69   : > { %v1410_v18 = vmul.f32 %v3581_v17, %v3579_v21 }
 0xa6b   : > { %3329 = vmatmul.mubr.msk.f32.vlgmr.msra.gmra.mrb[8].mxu0 %vm610_vm3, %v1410_v18 }
 0xa6c   : > { %3344 = vmatprep.mubr.msk.f32.mxu0 %vm3616_vm0, %v3617_v20  ;;  %3499 = vmatpush3.bf16.msra.mxu0 %v3498_v33 }
 0xa6d   : > { %3500 = vmatprep.subr.bf16.mxu0 %v3615_v5 }
 0xb3e   : > { %v1483_v22 = vpop.f32.mrb[8].mxu0 }
 0xb3f   : > { %v3330_v23 = vpop.f32.mrb[9].mxu0  ;;  %3334 = vmatmul.mubr.msk.f32.vlgmr.msra.gmra.mrb[16].mxu1 %vm610_vm3, %v1483_v22 }
 0xb40   : > { %3363 = vmatprep.mubr.msk.f32.mxu1 %vm3616_vm0, %v3617_v20  ;;  %3505 = vmatpush3.bf16.msra.mxu1 %v3504_v40 }
 0xb41   : > { %3506 = vmatprep.subr.bf16.mxu1 %v3615_v5 }
 0xb44   : > { %3508 = vmatpush3.bf16.msra.mxu1 %v3507_v42 }
 0xb45   : > { %3509 = vmatprep.subr.bf16.mxu1 %v3615_v5 }
 0xb48   : > { %3511 = vmatpush3.bf16.msra.mxu1 %v3510_v45 }
 0xb49   : > { %3512 = vmatprep.subr.bf16.mxu1 %v3615_v5 }
 0xb4c   : > { %3514 = vmatpush3.bf16.msra.mxu1 %v3513_v56 }
 0xb4d   : > { %3382 = vmatprep.subr.mxu1 %v3617_v20 }
 0xc12   : > { %v1556_v24 = vpop.f32.mrb[16].mxu1 }
 0xc13   : > { %v1560_v25 = vadd.f32 %v1556_v24, %v1321_v14  ;;  %v3335_v26 = vpop.f32.mrb[17].mxu1 }
 0xc15   : > { %v1561_v27 = vadd.f32 %v1560_v25, %v3776_v38  ;;  %v1580_v38 = vld [vmem:[%s4175_s8 + $0x10] sm:$0xff] }
 0xc16   : > { %v3501_v35 = vpack.c.bf16 %v1581_v34, %v1580_v38 }
 0xc17   : > { %v1563_v28 = vmul.f32 %v1561_v27, %v1561_v27 }
 0xc18   : > { %3502 = vmatpush3.bf16.msra.mxu0 %v3501_v35 }
 0xc19   : > { %v1564_v29 = vsel %vm510_vm2, %v1563_v28, 0.0  ;;  %3515 = vmatprep.subr.bf16.mxu0 %v3615_v5 }
 0xc1a   : > { %1565 = vadd.xlane.f32.xlu1 %v1564_v29 }
 0xca7   : > { %v1566_v46 = vpop.xlane.xlu1 %1565 }
 0xca8   : > { %v1567_v47 = vmul.f32 0.03125, %v1566_v46 }
 0xcaa   : > { %v1568_v48 = vadd.f32 1e-06, %v1567_v47 }
 0xcac   : > { %3582 = vrsqrt.f32 %v1568_v48 }
 0xcb6   : > { %v3583_v49 = vpop.eup %3582 }
 0xcb7   : > { %v1570_v51 = vmul.f32 %v3583_v49, %v1561_v27  ;;  %v3088_v49 = vld [vmem:[%s4173_s6 + $0x20] sm:$0xff] }
 0xcb9   : > { %v1577_v52 = vmul.f32 %v3078_v50, %v1570_v51 }
 0xcbb   : > { %3345 = vmatmul.mubr.msk.f32.vlgmr.msra.gmra.mrb[10].mxu0 %vm510_vm2, %v1577_v52 }
 0xcbc   : > { %3374 = vmatprep.mubr.msk.f32.mxu0 %vm3616_vm0, %v3617_v20  ;;  %3517 = vmatpush3.bf16.msra.mxu0 %v3516_v6 }
 0xcbd   : > { %3518 = vmatprep.subr.bf16.mxu0 %v3615_v5 }
 0xcc0   : > { %3520 = vmatpush3.bf16.msra.mxu0 %v3519_v9 }
 0xcc1   : > { %3377 = vmatprep.subr.mxu0 %v3617_v20 }
 0xd8e   : > { %v1651_v57 = vpop.f32.mrb[10].mxu0 }
 0xd8f   : > { %v1655_v58 = vmax.f32 %v1651_v57, 0.0  ;;  %v3346_v60 = vpop.f32.mrb[11].mxu0 }
 0xd91   : > { %3364 = vmatmul.mubr.msk.f32.vlgmr.msra.gmra.mrb[18].mxu1 %vm1664_vm4, %v1655_v58 }
 0xd92   : > { %3384 = vmatprep.mubr.msk.f32.mxu1 %vm3616_vm0, %v3617_v20 }
 0xe64   : > { %v1734_v61 = vpop.f32.mrb[18].mxu1 }
 0xe65   : > { %v3980_v62 = vadd.f32 %v1734_v61, %v1561_v27  ;;  %v3365_v63 = vpop.f32.mrb[19].mxu1 }
 0xe67   : > { %v1741_v0 = vmul.f32 %v3980_v62, %v3980_v62 }
 0xe69   : > { %v1742_v1 = vsel %vm510_vm2, %v1741_v0, 0.0 }
 0xe6a   : > { %1743 = vadd.xlane.f32.xlu1 %v1742_v1 }
 0xef7   : > { %v1744_v10 = vpop.xlane.xlu1 %1743 }
 0xef8   : > { %v1745_v11 = vmul.f32 0.03125, %v1744_v10 }
 0xefa   : > { %v1746_v21 = vadd.f32 1e-06, %v1745_v11 }
 0xefc   : > { %3584 = vrsqrt.f32 %v1746_v21 }
 0xf06   : > { %v3585_v12 = vpop.eup %3584 }
 0xf07   : > { %v1748_v55 = vmul.f32 %v3585_v12, %v3980_v62 }
 0xf09   : > { %v1755_v14 = vmul.f32 %v3082_v13, %v1748_v55 }
 0xf0b   : > { %3375 = vmatmul.mubr.msk.f32.vlgmr.msra.gmra.mrb[12].mxu0 %vm510_vm2, %v1755_v14  ;;  %v3090_v14 = vld [vmem:[%s4173_s6 + $0x30] sm:$0xff] }
 0xf0c   : > { %3379 = vmatprep.mubr.msk.f32.mxu0 %vm3616_vm0, %v3617_v20 }
 0xfde   : > { %v4006_v15 = vpop.f32.mrb[12].mxu0 }
 0xfdf   : > { %2005 = vrot.lane.b32.xlu0 %v4006_v15, %s3620_s22  ;;  %1840 = vrot.lane.b32.xlu1 %v4006_v15, %s3619_s19  ;;  %v3376_v16 = vpop.f32.mrb[13].mxu0 }
 0xfe3   : > { %2003 = vrot.lane.b32.xlu0 %v4006_v15, %s3621_s23 }
0x1051   : > { %v1841_v17 = vpop.permute.xlu1 %1840  ;;  %v2006_v18 = vpop.permute.xlu0 %2005 }
0x1052   : > { %3378 = vmatpush3.xpose.msk.msra.mxu0 %vm610_vm3, %v1841_v17 }
0x1053   : > { %3387 = vmatprep.subr.mxu0 %v3617_v20 }
0x1055   : > { %3380 = vmatmul.mubr.msk.f32.vlgmr.msra.gmra.mrb[14].mxu0 %vm610_vm3, %v4006_v15  ;;  %v2004_v22 = vpop.permute.xlu0 %2003 }
0x1056   : > { %3388 = vmatpush3.xpose.msk.msra.mxu0 %vm610_vm3, %v2006_v18  ;;  %3389 = vmatprep.mubr.msk.f32.mxu0 %vm3616_vm0, %v3617_v20 }
0x1057   : > { %3397 = vmatprep.subr.mxu0 %v3617_v20 }
0x1059   : > { %3390 = vmatmul.mubr.msk.f32.vlgmr.msra.gmra.mrb[16].mxu0 %vm610_vm3, %v2004_v22 }
0x105a   : > { %3399 = vmatprep.mubr.msk.f32.mxu0 %vm3616_vm0, %v3617_v20  ;;  %3398 = vmatpush3.msra.mxu0 %v3089_v41 }
0x105b   : > { %3407 = vmatprep.subr.mxu0 %v3617_v20 }
0x1128   : > { %v1912_v23 = vpop.f32.mrb[14].mxu0 }
0x1129   : > { %v1913_v24 = vadd.f32 %v1912_v23, %v3816_v59  ;;  %v3381_v25 = vpop.f32.mrb[15].mxu0 }
0x112b   : > { %v1916_v26 = vsel %vm610_vm3, %v1913_v24, -inf }
0x112c   : > { %1917 = vmax.xlane.f32.xlu0 %v1916_v26  ;;  %v2077_v27 = vpop.f32.mrb[16].mxu0 }
0x112d   : > { %v2078_v28 = vadd.f32 %v2077_v27, %v3849_v19  ;;  %v3391_v29 = vpop.f32.mrb[17].mxu0 }
0x112f   : > { %v2081_v30 = vsel %vm610_vm3, %v2078_v28, -inf }
0x1130   : > { %2082 = vmax.xlane.f32.xlu1 %v2081_v30  ;;  %v3091_v30 = vld [vmem:[%s4173_s6 + $0x38] sm:$0xff] }
0x1141   : > { %1927 = vrot.lane.b32.xlu1 %v4006_v15, %s3623_s25  ;;  %s4184_s25 = smov 48  }
0x1145   : > { %2316 = vrot.lane.b32.xlu1 %v4006_v15, %s3624_s26  ;;  %s4185_s26 = smov 104  }
0x1149   : > { %2314 = vrot.lane.b32.xlu1 %v4006_v15, %s3622_s24 }
0x11b9   : > { %v1918_v59 = vpop.xlane.xlu0 %1917 }
0x11ba   : > { %v1919_v32 = vsub.f32 %v1913_v24, %v1918_v59 }
0x11bc   : > { %v1920_v33 = vmul.f32 1.442695, %v1919_v32 }
0x11bd   : > { %v2083_v38 = vpop.xlane.xlu1 %2082 }
0x11be   : > { %3586 = vpow2.f32 %v1920_v33  ;;  %v2084_v34 = vsub.f32 %v2078_v28, %v2083_v38 }
0x11c0   : > { %v2085_v19 = vmul.f32 1.442695, %v2084_v34 }
0x11c1   : > { %v1928_v35 = vpop.permute.xlu1 %1927 }
0x11c2   : > { %3588 = vpow2.f32 %v2085_v19  ;;  %3383 = vmatpush3.msra.mxu1 %v1928_v35 }
0x11c3   : > { %3392 = vmatprep.subr.mxu1 %v3617_v20 }
0x11c5   : > { %v2317_v52 = vpop.permute.xlu1 %2316 }
0x11c8   : > { %v3587_v36 = vpop.eup %3586 }
0x11c9   : > { %v1922_v37 = vsel %vm610_vm3, %v3587_v36, 0.0  ;;  %v2315_v56 = vpop.permute.xlu1 %2314 }
0x11ca   : > { %1923 = vadd.xlane.f32.xlu0 %v1922_v37 }
0x11cc   : > { %v3589_v39 = vpop.eup %3588 }
0x11cd   : > { %v2087_v40 = vsel %vm610_vm3, %v3589_v39, 0.0 }
0x11ce   : > { %2088 = vadd.xlane.f32.xlu0 %v2087_v40 }
0x11e4   : > { %2092 = vrot.lane.b32.xlu0 %v4006_v15, %s3625_s30  ;;  %s4186_s30 = smov 72  }
0x1257   : > { %v1924_v42 = vpop.xlane.xlu0 %1923 }
0x1258   : > { %3590 = vrcp.f32 %v1924_v42 }
0x125b   : > { %v2089_v43 = vpop.xlane.xlu0 %2088 }
0x125c   : > { %3592 = vrcp.f32 %v2089_v43  ;;  %v3110_v43 = vld [vmem:[%s4175_s8 + $0x20] sm:$0xff] }
0x125f   : > { %v2093_v46 = vpop.permute.xlu0 %2092 }
0x1262   : > { %v3591_v44 = vpop.eup %3590 }
0x1263   : > { %v1926_v45 = vmul.f32 %v3591_v44, %v3587_v36  ;;  %v3111_v44 = vld [vmem:[%s4175_s8 + $0x28] sm:$0xff] }
0x1265   : > { %3385 = vmatmul.mubr.msk.f32.vlgmr.msra.gmra.mrb[20].mxu1 %vm610_vm3, %v1926_v45  ;;  %v3522_v45 = vpack.c.bf16 %v3111_v44, %v3110_v43 }
0x1266   : > { %v3593_v47 = vpop.eup %3592  ;;  %3393 = vmatpush3.msra.mxu1 %v2093_v46  ;;  %3394 = vmatprep.mubr.msk.f32.mxu1 %vm3616_vm0, %v3617_v20 }
0x1267   : > { %v2091_v48 = vmul.f32 %v3593_v47, %v3589_v39  ;;  %3402 = vmatprep.subr.mxu1 %v3617_v20  ;;  %v3115_v47 = vld [vmem:[%s4176_s9 + $0x40] sm:$0xff] }
0x1269   : > { %3395 = vmatmul.mubr.msk.f32.vlgmr.msra.gmra.mrb[22].mxu1 %vm610_vm3, %v2091_v48  ;;  %v3116_v48 = vld [vmem:[%s4176_s9 + $0x48] sm:$0xff] }
0x126a   : > { %3404 = vmatprep.mubr.msk.f32.mxu1 %vm3616_vm0, %v3617_v20  ;;  %3403 = vmatpush3.msra.mxu1 %v3088_v49  ;;  %v3117_v49 = vld [vmem:[%s4176_s9 + $0x50] sm:$0xff] }
0x126b   : > { %3412 = vmatprep.subr.mxu1 %v3617_v20 }
0x1338   : > { %v1999_v50 = vpop.f32.mrb[20].mxu1 }
0x1339   : > { %v3386_v51 = vpop.f32.mrb[21].mxu1  ;;  %3405 = vmatmul.mubr.msk.f32.vlgmr.msra.gmra.mrb[24].mxu1 %vm610_vm3, %v1999_v50  ;;  %v3528_v50 = vpack.c.bf16 %v3116_v48, %v3115_v47 }
0x133a   : > { %3414 = vmatprep.mubr.msk.f32.mxu1 %vm3616_vm0, %v3617_v20  ;;  %v3118_v51 = vld [vmem:[%s4176_s9 + $0x58] sm:$0xff] }
0x133c   : > { %v2164_v53 = vpop.f32.mrb[22].mxu1 }
0x133d   : > { %v3396_v54 = vpop.f32.mrb[23].mxu1  ;;  %3400 = vmatmul.mubr.msk.f32.vlgmr.msra.gmra.mrb[18].mxu0 %vm610_vm3, %v2164_v53  ;;  %v3119_v53 = vld [vmem:[%s4176_s9 + $0x60] sm:$0xff] }
0x133e   : > { %3408 = vmatpush3.xpose.msk.msra.mxu0 %vm610_vm3, %v2317_v52  ;;  %3409 = vmatprep.mubr.msk.f32.mxu0 %vm3616_vm0, %v3617_v20  ;;  %v3531_v52 = vpack.c.bf16 %v3118_v51, %v3117_v49  ;;  %v3120_v54 = vld [vmem:[%s4176_s9 + $0x68] sm:$0xff] }
0x133f   : > { %3417 = vmatprep.subr.mxu0 %v3617_v20 }
0x1341   : > { %3410 = vmatmul.mubr.msk.f32.vlgmr.msra.gmra.mrb[20].mxu0 %vm610_vm3, %v2315_v56  ;;  %v3534_v56 = vpack.c.bf16 %v3120_v54, %v3119_v53 }
0x1342   : > { %3419 = vmatprep.mubr.msk.f32.mxu0 %vm3616_vm0, %v3617_v20  ;;  %3418 = vmatpush3.msra.mxu0 %v3090_v14 }
0x1343   : > { %3427 = vmatprep.subr.mxu0 %v3617_v20 }
0x140c   : > { %v2310_v57 = vpop.f32.mrb[24].mxu1 }
0x140d   : > { %v3406_v58 = vpop.f32.mrb[25].mxu1 }
0x1410   : > { %v2237_v60 = vpop.f32.mrb[18].mxu0 }
0x1411   : > { %v2311_v61 = vadd.f32 %v2310_v57, %v2237_v60  ;;  %v3401_v63 = vpop.f32.mrb[19].mxu0 }
0x1412   : > { %v3109_v63 = vld [vmem:[%s4174_s7 + $0x1] ss:$0 sm:$0xff] }
0x1414   : > { %v2388_v0 = vpop.f32.mrb[20].mxu0 }
0x1415   : > { %v2389_v1 = vadd.f32 %v2388_v0, %v3864_v31  ;;  %v3411_v3 = vpop.f32.mrb[21].mxu0 }
0x1416   : > { %v3121_v3 = vld [vmem:[%s4176_s9 + $0x70] sm:$0xff] }
0x1417   : > { %v2392_v4 = vsel %vm610_vm3, %v2389_v1, -inf }
0x1418   : > { %2393 = vmax.xlane.f32.xlu0 %v2392_v4 }
0x142e   : > { %2403 = vrot.lane.b32.xlu0 %v4006_v15, %s4184_s25 }
0x1432   : > { %2553 = vrot.lane.b32.xlu0 %v4006_v15, %s4185_s26 }
0x14a5   : > { %v2394_v6 = vpop.xlane.xlu0 %2393 }
0x14a6   : > { %v2395_v7 = vsub.f32 %v2389_v1, %v2394_v6 }
0x14a8   : > { %v2396_v8 = vmul.f32 1.442695, %v2395_v7 }
0x14a9   : > { %v2404_v9 = vpop.permute.xlu0 %2403 }
0x14aa   : > { %3594 = vpow2.f32 %v2396_v8  ;;  %3413 = vmatpush3.msra.mxu1 %v2404_v9 }
0x14ab   : > { %3422 = vmatprep.subr.mxu1 %v3617_v20 }
0x14ad   : > { %v2554_v55 = vpop.permute.xlu0 %2553 }
0x14b4   : > { %v3595_v10 = vpop.eup %3594 }
0x14b5   : > { %v2398_v31 = vsel %vm610_vm3, %v3595_v10, 0.0 }
0x14b6   : > { %2399 = vadd.xlane.f32.xlu1 %v2398_v31 }
0x14c7   : > { %2555 = vrot.lane.b32.xlu1 %v4006_v15, %s4186_s30  ;;  %s4188_s30 = sshll.u32 %s4190_s18, 3 }
0x1543   : > { %v2400_v11 = vpop.xlane.xlu1 %2399 }
0x1544   : > { %3596 = vrcp.f32 %v2400_v11 }
0x1547   : > { %v2556_v13 = vpop.permute.xlu1 %2555 }
0x154e   : > { %v3597_v21 = vpop.eup %3596 }
0x154f   : > { %v2402_v12 = vmul.f32 %v3597_v21, %v3595_v10 }
0x1551   : > { %3415 = vmatmul.mubr.msk.f32.vlgmr.msra.gmra.mrb[26].mxu1 %vm610_vm3, %v2402_v12 }
0x1552   : > { %3423 = vmatpush3.xpose.msk.msra.mxu1 %vm610_vm3, %v2556_v13  ;;  %3424 = vmatprep.mubr.msk.f32.mxu1 %vm3616_vm0, %v3617_v20 }
0x1553   : > { %3432 = vmatprep.subr.mxu1 %v3617_v20 }
0x1555   : > { %3425 = vmatmul.mubr.msk.f32.vlgmr.msra.gmra.mrb[28].mxu1 %vm610_vm3, %v2554_v55 }
0x1556   : > { %3434 = vmatprep.mubr.msk.f32.mxu1 %vm3616_vm0, %v3617_v20  ;;  %3433 = vmatpush3.msra.mxu1 %v3091_v30 }
0x1557   : > { %3527 = vmatprep.subr.bf16.mxu1 %v3615_v5 }
0x1624   : > { %v2475_v16 = vpop.f32.mrb[26].mxu1 }
0x1625   : > { %v3416_v17 = vpop.f32.mrb[27].mxu1  ;;  %3420 = vmatmul.mubr.msk.f32.vlgmr.msra.gmra.mrb[22].mxu0 %vm610_vm3, %v2475_v16  ;;  %v3124_v16 = vld [vmem:[%s4177_s10] ss:$0 sm:$0xff] }
0x1626   : > { %3429 = vmatprep.mubr.msk.f32.mxu0 %vm3616_vm0, %v3617_v20 }
0x1628   : > { %v2627_v18 = vpop.f32.mrb[28].mxu1 }
0x1629   : > { %v2628_v22 = vadd.f32 %v2627_v18, %v3909_v2  ;;  %v3426_v23 = vpop.f32.mrb[29].mxu1 }
0x162b   : > { %v2631_v24 = vsel %vm610_vm3, %v2628_v22, -inf }
0x162c   : > { %2632 = vmax.xlane.f32.xlu1 %v2631_v24 }
0x16b9   : > { %v2633_v25 = vpop.xlane.xlu1 %2632 }
0x16ba   : > { %v2634_v26 = vsub.f32 %v2628_v22, %v2633_v25 }
0x16bc   : > { %v2635_v27 = vmul.f32 1.442695, %v2634_v26 }
0x16be   : > { %3598 = vpow2.f32 %v2635_v27 }
0x16c8   : > { %v3599_v28 = vpop.eup %3598 }
0x16c9   : > { %v2637_v29 = vsel %vm610_vm3, %v3599_v28, 0.0 }
0x16ca   : > { %2638 = vadd.xlane.f32.xlu0 %v2637_v29 }
0x16e0   : > { %2642 = vrot.lane.b32.xlu0 %v4006_v15, %s4187_s15  ;;  %s395_s15 = scalar_lea.vmem %s4178_s11, %s4188_s30 }
0x16f8   : > { %v2548_v2 = vpop.f32.mrb[22].mxu0 }
0x16f9   : > { %v2552_v59 = vadd.f32 %v2548_v2, %v2311_v61  ;;  %v3421_v32 = vpop.f32.mrb[23].mxu0 }
0x1757   : > { %v2639_v33 = vpop.xlane.xlu0 %2638 }
0x1758   : > { %3600 = vrcp.f32 %v2639_v33 }
0x175b   : > { %v2643_v38 = vpop.permute.xlu0 %2642 }
0x175c   : > { %3428 = vmatpush3.msra.mxu0 %v2643_v38 }
0x175d   : > { %3521 = vmatprep.subr.bf16.mxu0 %v3615_v5 }
0x1762   : > { %v3601_v34 = vpop.eup %3600 }
0x1763   : > { %v2641_v19 = vmul.f32 %v3601_v34, %v3599_v28 }
0x1765   : > { %3430 = vmatmul.mubr.msk.f32.vlgmr.msra.gmra.mrb[24].mxu0 %vm610_vm3, %v2641_v19 }
0x1766   : > { %3445 = vmatprep.mubr.msk.f32.mxu0 %vm3616_vm0, %v3617_v20  ;;  %3523 = vmatpush3.bf16.msra.mxu0 %v3522_v45 }
0x1767   : > { %3524 = vmatprep.subr.bf16.mxu0 %v3615_v5 }
0x1838   : > { %v2714_v15 = vpop.f32.mrb[24].mxu0 }
0x1839   : > { %v3431_v35 = vpop.f32.mrb[25].mxu0  ;;  %3435 = vmatmul.mubr.msk.f32.vlgmr.msra.gmra.mrb[30].mxu1 %vm610_vm3, %v2714_v15 }
0x183a   : > { %3464 = vmatprep.mubr.msk.f32.mxu1 %vm3616_vm0, %v3617_v20  ;;  %v3112_v20 = vld [vmem:[%s4175_s8 + $0x30] sm:$0xff]  ;;  %3529 = vmatpush3.bf16.msra.mxu1 %v3528_v50 }
0x183b   : > { %3530 = vmatprep.subr.bf16.mxu1 %v3615_v5 }
0x183e   : > { %3532 = vmatpush3.bf16.msra.mxu1 %v3531_v52 }
0x183f   : > { %3533 = vmatprep.subr.bf16.mxu1 %v3615_v5 }
0x1842   : > { %3535 = vmatpush3.bf16.msra.mxu1 %v3534_v56 }
0x1843   : > { %3536 = vmatprep.subr.bf16.mxu1 %v3615_v5  ;;  %v3122_v5 = vld [vmem:[%s4176_s9 + $0x78] sm:$0xff] }
0x1844   : > { %v3537_v4 = vpack.c.bf16 %v3122_v5, %v3121_v3 }
0x1846   : > { %3538 = vmatpush3.bf16.msra.mxu1 %v3537_v4 }
0x190c   : > { %v2787_v36 = vpop.f32.mrb[30].mxu1 }
0x190d   : > { %v2791_v37 = vadd.f32 %v2787_v36, %v2552_v59  ;;  %v3436_v39 = vpop.f32.mrb[31].mxu1 }
0x190f   : > { %v2792_v40 = vadd.f32 %v2791_v37, %v3980_v62  ;;  %v3113_v62 = vld [vmem:[%s4175_s8 + $0x38] sm:$0xff] }
0x1910   : > { %v3525_v46 = vpack.c.bf16 %v3113_v62, %v3112_v20 }
0x1911   : > { %v2795_v41 = vmul.f32 %v2792_v40, %v2792_v40 }
0x1912   : > { %3526 = vmatpush3.bf16.msra.mxu0 %v3525_v46 }
0x1913   : > { %v2796_v42 = vsel %vm510_vm2, %v2795_v41, 0.0 }
0x1914   : > { %2797 = vadd.xlane.f32.xlu1 %v2796_v42 }
0x19a1   : > { %v2798_v57 = vpop.xlane.xlu1 %2797 }
0x19a2   : > { %v2799_v58 = vmul.f32 0.03125, %v2798_v57 }
0x19a4   : > { %v2800_v60 = vadd.f32 1e-06, %v2799_v58 }
0x19a6   : > { %3602 = vrsqrt.f32 %v2800_v60 }
0x19b0   : > { %v3603_v61 = vpop.eup %3602 }
0x19b1   : > { %v2802_v0 = vmul.f32 %v3603_v61, %v2792_v40 }
0x19b3   : > { %v2809_v1 = vmul.f32 %v3109_v63, %v2802_v0 }
0x19b5   : > { %3446 = vmatmul.mubr.msk.f32.vlgmr.msra.gmra.mrb[26].mxu0 %vm510_vm2, %v2809_v1 }
0x1a88   : > { %v2884_v6 = vpop.f32.mrb[26].mxu0 }
0x1a89   : > { %v2888_v7 = vmax.f32 %v2884_v6, 0.0  ;;  %v3447_v8 = vpop.f32.mrb[27].mxu0 }
0x1a8b   : > { %3465 = vmatmul.mubr.msk.f32.vlgmr.msra.gmra.mrb[32].mxu1 %vm1664_vm4, %v2888_v7 }
0x1b5e   : > { %v2967_v9 = vpop.f32.mrb[32].mxu1 }
0x1b5f   : > { %v2971_v10 = vadd.f32 %v2967_v9, %v2792_v40  ;;  %v3466_v31 = vpop.f32.mrb[33].mxu1 }
0x1b61   : > { %v2973_v11 = vmul.f32 %v2971_v10, %v2971_v10 }
0x1b63   : > { %v2974_v21 = vsel %vm510_vm2, %v2973_v11, 0.0 }
0x1b64   : > { %2975 = vadd.xlane.f32.xlu1 %v2974_v21 }
0x1bf1   : > { %v2976_v12 = vpop.xlane.xlu1 %2975 }
0x1bf2   : > { %v2977_v13 = vmul.f32 0.03125, %v2976_v12 }
0x1bf4   : > { %v2978_v55 = vadd.f32 1e-06, %v2977_v13 }
0x1bf6   : > { %3604 = vrsqrt.f32 %v2978_v55 }
0x1c00   : > { %v3605_v14 = vpop.eup %3604 }
0x1c01   : > { %v2980_v17 = vmul.f32 %v3605_v14, %v2971_v10 }
0x1c03   : > { %v2987_v18 = vmul.f32 %v3124_v16, %v2980_v17 }
0x1c05   : > { %2988 = vst.msk [vmem:[%s395_s15] sm:$0xff] %vm510_vm2, %v2987_v18 }
0x1c06 PF: > { %s21_s17 = sadd.s32 1, %s3612_s17  }
0x1c07   : > { %p18_p4 = scmp.ge.s32.totalorder %s21_s17, 4  }
0x1c09   :  { %20 = sbr.rel (!%p18_p4) target bundleno = 1 (0x1), region = 103 }

// kernel: simctg_t5_forward.3
= control target key start
LH: loop header
LB: loop body
LE: loop exit
PB: predicated region body
PF: predicated region fallthrough
CT: control target
= control target key end

     0   :  { %s7883_s0 = inlined_call_operand.vmem [shape: s32[16,1], index: 0, kind: input, shape index: {}]   ;;  %s7884_s1 = inlined_call_operand.vmem [shape: f32[2,1,8], index: 1, kind: input, shape index: {}]   ;;  %s7885_s2 = inlined_call_operand.vmem [shape: f32[16,32], index: 2, kind: input, shape index: {}]   ;;  %s7886_s3 = inlined_call_operand.vmem [shape: f32[128,32], index: 3, kind: input, shape index: {}]   ;;  %s7887_s4 = inlined_call_operand.vmem [shape: f32[4,8,8], index: 4, kind: input, shape index: {}]   ;;  %s7888_s5 = inlined_call_operand.vmem [shape: f32[2,1,32], index: 5, kind: input, shape index: {}]   ;;  %s7889_s6 = inlined_call_operand.vmem [shape: f32[2,32,96], index: 6, kind: input, shape index: {}]   ;;  %s7890_s7 = inlined_call_operand.vmem [shape: f32[2,32,32], index: 7, kind: input, shape index: {}]   ;;  %s7891_s8 = inlined_call_operand.vmem [shape: f32[2,1,32], index: 8, kind: input, shape index: {}]   ;;  %s7892_s9 = inlined_call_operand.vmem [shape: f32[2,32,32], index: 9, kind: input, shape index: {}]   ;;  %s7893_s10 = inlined_call_operand.vmem [shape: f32[2,32,64], index: 10, kind: input, shape index: {}]   ;;  %s7894_s11 = inlined_call_operand.vmem [shape: f32[2,32,32], index: 11, kind: input, shape index: {}]   ;;  %s7895_s12 = inlined_call_operand.vmem [shape: f32[2,1,32], index: 12, kind: input, shape index: {}]   ;;  %s7896_s13 = inlined_call_operand.vmem [shape: f32[2,32,64], index: 13, kind: input, shape index: {}]   ;;  %s7897_s14 = inlined_call_operand.vmem [shape: f32[2,64,32], index: 14, kind: input, shape index: {}]   ;;  %s7898_s15 = inlined_call_operand.vmem [shape: f32[1,32], index: 15, kind: input, shape index: {}]   ;;  %s7899_s16 = inlined_call_operand.hbm [shape: f32[16,32], index: 16, kind: output, shape index: {0}]   ;;  %s7900_s17 = inlined_call_operand.hbm [shape: f32[16,128], index: 17, kind: output, shape index: {1}]  }
   0x1   :  { %7927 = sst [smem:[#allocation14_spill]] %s7883_s0 }
   0x2   :  { %7928 = sst [smem:[#allocation15_spill]] %s7884_s1 }
   0x3   :  { %7929 = sst [smem:[#allocation16_spill]] %s7885_s2 }
   0x4   :  { %7930 = sst [smem:[#allocation17_spill]] %s7886_s3 }
   0x5   :  { %7931 = sst [smem:[#allocation18_spill]] %s7887_s4 }
   0x6   :  { %7932 = sst [smem:[#allocation19_spill]] %s7899_s16 }
   0x7   :  { %7933 = sst [smem:[#allocation20_spill]] %s7900_s17 }
   0x8   :  { %23 = vsyncpa [#allocation3], 0 }
   0x9   :  { %25 = vsyncpa [#allocation3 + $0x1], 0 }
   0xa   :  { %26 = vsyncpa [#allocation5], 0 }
   0xb   :  { %28 = vsyncpa [#allocation5 + $0x1], 0  ;;  %s6942_s24 = smov 0   ;;  %s6944_s25 = smov 0  }
   0xc   :  { %s6946_s26 = smov 0   ;;  %s6948_s27 = smov 0  }
   0xd LB: > { %7934 = sst [smem:[#allocation8_spill]] %s6820_s24  ;;  %s6963_s28 = sadd.s32 4294967295, %s6832_s27   ;;  %s6832_s27 = sphi %s6948_s27, %s7963_s27   ;;  %s6828_s26 = sphi %s6946_s26, %s7965_s26   ;;  %s6824_s25 = sphi %s6944_s25, %s7967_s25   ;;  %s6820_s24 = sphi %s6942_s24, %s7966_s24  }
   0xe   : > { %7935 = sst [smem:[#allocation9_spill]] %s6828_s26  ;;  %s5698_s29 = sadd.s32 4294967294, %s6832_s27  }
   0xf   : > { %7936 = sst [smem:[#allocation10_spill]] %s6832_s27  ;;  %s6967_s0 = sadd.s32 1, %s6832_s27  }
  0x10   : > { %7937 = sst [smem:[#allocation11_spill]] %s6967_s0  ;;  %s392_s30 = sadd.s32 1, %s6828_s26 }
  0x11   : > { %s389_s18 = ssub.s32 %s6832_s27, %s6967_s0  ;;  %p402_p0 = scmp.ne.s32.totalorder %s6828_s26, %s6824_s25 }
  0x12   : > { %p390_p1 = scmp.eq.s32.totalorder %s389_s18, 0  ;;  %p403_p2 = scmp.eq.s32.totalorder %s6963_s28, 1 }
  0x13   : > { %p408_p3 = scmp.ne.s32.totalorder %s6824_s25, %s6820_s24  ;;  %p409_p4 = scmp.eq.s32.totalorder %s5698_s29, 1 }
  0x14   : > { %s6978_s19 = scalar_select %p390_p1, %s6828_s26, %s392_s30  }
  0x15   : > { %p6980_p5 = por %p403_p2, %p402_p0  ;;  %p6984_p6 = por %p409_p4, %p408_p3 }
  0x16   : > { %7938 = sst [smem:[#allocation12_spill]] %s6978_s19  ;;  %p5701_p7 = scmp.ge.s32.totalorder %s6832_s27, 1 }
  0x17   : > { %s7940_s20 = scalar_select %p6984_p6, 1, 0 }
  0x18   : > { %p512_p8 = scmp.lt.s32.totalorder %s6832_s27, 3 }
  0x19   : > { %7941 = sst [smem:[#allocation13_spill]] %s7940_s20 }
  0x1a   : > { %p513_p9 = pnand %p5701_p7, %p512_p8 }
  0x1b   : > { %p575_p10 = scmp.lt.s32.totalorder (!%p513_p9), %s6963_s28, 1  ;;  %s7942_s3 = sld [smem:[#allocation17_spill]] (!%p513_p9)  ;;  %v603_v3 = vlaneseq (!%p513_p9)  ;;  %v6834_v4 = vmov (!%p513_p9), 0   ;;  %v6835_v5 = vmov (!%p513_p9), 0.0|0.0   ;;  %vm6836_vm0 = vmmov (!%p513_p9), 0   ;;  %v707_v42 = vld [vmem:[%s7889_s6] sm:$0xff] (!%p513_p9) }
  0x1c   : > { %516 = sbr.rel (%p513_p9) target bundleno = 12870 (0x3246), region = 84  ;;  %6659 = vset.pattern.permute.xlu0 (!%p513_p9), %v6834_v4  ;;  %6471 = vmatprep.subr.bf16.mxu1 (!%p513_p9), %v6835_v5  ;;  %s7943_s30 = sld [smem:[#allocation15_spill]] (!%p513_p9)  ;;  %v6837_v20 = vmov (!%p513_p9), 0.0   ;;  %v6838_v37 = vmov (!%p513_p9), 1.0   ;;  %vm691_vm2 = vcmask (!%p513_p9), 261120   ;;  %v708_v43 = vld [vmem:[%s7889_s6 + $0x8] sm:$0xff] (!%p513_p9) }
  0x1d   : > { %v1919_v8 = vshrl.u32 (!%p513_p9), %v603_v3, 7  ;;  %s7944_s17 = sld [smem:[#allocation14_spill]] (!%p513_p9)  ;;  %6067 = vmatprep.mubr.msk.f32.mxu1 (!%p513_p9), %vm6836_vm0, %v6837_v20  ;;  %6081 = vmatprep.subr.mxu0 (!%p513_p9), %v6837_v20  ;;  %v604_v35 = vand.u32 (!%p513_p9), 127, %v603_v3  ;;  %v6496_v44 = vpack.c.bf16 (!%p513_p9), %v708_v43, %v707_v42  ;;  %v709_v45 = vld [vmem:[%s7889_s6 + $0x10] sm:$0xff] (!%p513_p9)  ;;  %v710_v46 = vld [vmem:[%s7889_s6 + $0x18] sm:$0xff] (!%p513_p9)  ;;  %s7923_s24 = smov (!%p513_p9), 96   ;;  %vm6569_vm5 = vmpackc.low (!%p513_p9), %vm691_vm2, %vm691_vm2 }
  0x1e   : > { %6083 = vmatprep.mubr.msk.f32.mxu0 (!%p513_p9), %vm6836_vm0, %v6837_v20  ;;  %v6499_v47 = vpack.c.bf16 (!%p513_p9), %v710_v46, %v709_v45  ;;  %v5708_v52 = vld [vmem:[%s7888_s5] ss:$0 sm:$0xff] (!%p513_p9)  ;;  %vm791_vm3 = vcmask (!%p513_p9), 64512   ;;  %s7945_s4 = sld [smem:[#allocation18_spill]] (!%p513_p9)  ;;  %s7925_s26 = smov (!%p513_p9), 120   ;;  %vm2978_vm4 = vcmask (!%p513_p9), 523264  }
  0x1f   : > { %v1920_v15 = vsub.s32 (!%p513_p9), 0, %v1919_v8  ;;  %s7921_s19 = smov (!%p513_p9), 112   ;;  %s7909_s0 = smov (!%p513_p9), 64  }
  0x20   : > { %s7917_s20 = smov (!%p513_p9), 80   ;;  %s7915_s27 = smov (!%p513_p9), 104  }
  0x21   : > { %v586_v0 = vld [vmem:[%s7942_s3] sm:$0xff] (!%p513_p9)  ;;  %v587_v1 = vld [vmem:[%s7942_s3 + $0x8] sm:$0xff] (!%p513_p9)  ;;  %v588_v2 = vld [vmem:[%s7942_s3 + $0x10] sm:$0xff] (!%p513_p9)  ;;  %s7912_s29 = smov (!%p513_p9), 48   ;;  %s7946_s2 = sld [smem:[#allocation16_spill]] (!%p513_p9) }
  0x22   : > { %v7001_v6 = vpack.c.bf16 (!%p513_p9), %v587_v1, %v586_v0  ;;  %v589_v7 = vld [vmem:[%s7942_s3 + $0x18] sm:$0xff] (!%p513_p9)  ;;  %v590_v10 = vld [vmem:[%s7942_s3 + $0x20] sm:$0xff] (!%p513_p9)  ;;  %v591_v11 = vld [vmem:[%s7942_s3 + $0x28] sm:$0xff] (!%p513_p9)  ;;  %s7954_s23 = smov (!%p513_p9), 56  }
  0x23   : > { %s7007_s21 = scalar_select %p575_p10, %s6963_s28, 1  ;;  %v7010_v9 = vpack.c.bf16 %v589_v7, %v588_v2  ;;  %v7030_v16 = vpack.c.bf16 %v591_v11, %v590_v10  ;;  %v592_v18 = vld [vmem:[%s7942_s3 + $0x30] sm:$0xff]  ;;  %v593_v19 = vld [vmem:[%s7942_s3 + $0x38] sm:$0xff]  ;;  %v594_v23 = vld [vmem:[%s7942_s3 + $0x40] sm:$0xff] }
  0x24   : > { %6473 = vmatpush3.bf16.msra.mxu1 %v7001_v6  ;;  %v7047_v22 = vpack.c.bf16 %v593_v19, %v592_v18  ;;  %v595_v24 = vld [vmem:[%s7942_s3 + $0x48] sm:$0xff]  ;;  %v596_v26 = vld [vmem:[%s7942_s3 + $0x50] sm:$0xff]  ;;  %v597_v27 = vld [vmem:[%s7942_s3 + $0x58] sm:$0xff] }
  0x25   : > { %s5704_s22 = sshll.u32 %s7007_s21, 3  ;;  %s581_s18 = scalar_lea.vmem %s7943_s30, %s7007_s21  ;;  %6474 = vmatprep.subr.bf16.mxu1 %v6835_v5  ;;  %v7057_v25 = vpack.c.bf16 %v595_v24, %v594_v23  ;;  %v7067_v28 = vpack.c.bf16 %v597_v27, %v596_v26  ;;  %v598_v29 = vld [vmem:[%s7942_s3 + $0x60] sm:$0xff]  ;;  %v599_v30 = vld [vmem:[%s7942_s3 + $0x68] sm:$0xff]  ;;  %v600_v32 = vld [vmem:[%s7942_s3 + $0x70] sm:$0xff] }
  0x26   : > { %s578_s16 = scalar_lea.vmem %s7944_s17, %s5704_s22  ;;  %v686_v12 = vld [vmem:[%s581_s18] sm:$0x1]  ;;  %v7077_v31 = vpack.c.bf16 %v599_v30, %v598_v29  ;;  %v601_v33 = vld [vmem:[%s7942_s3 + $0x78] sm:$0xff]  ;;  %s7919_s18 = smov 88   ;;  %v7165_v23 = vld [vmem:[%s7945_s4 + $0x8] sm:$0xff] }
  0x27   : > { %v602_v13 = vld [vmem:[%s578_s16] sm:$0xff]  ;;  %v687_v14 = vsub.f32 1.0, %v686_v12  ;;  %v7087_v34 = vpack.c.bf16 %v601_v33, %v600_v32  ;;  %s7910_s16 = smov 56   ;;  %s7913_s17 = smov 72  }
  0x28   : > { %606 = vperm.xlu0 %6659, %v602_v13   ;;  %6476 = vmatpush3.bf16.msra.mxu1 %v7010_v9  ;;  %v7133_v58 = vld [vmem:[%s7945_s4] sm:$0xff]  ;;  %s7956_s21 = smov 48  }
  0x29   : > { %v688_v17 = vmul.f32 -1e+09, %v687_v14  ;;  %6477 = vmatprep.subr.bf16.mxu1 %v6835_v5 }
  0x2b   : > { %v7044_v21 = vrot.slane %v688_v17, %v1920_v15 }
  0x2c   : > { %6479 = vmatpush3.bf16.msra.mxu1 %v7030_v16 }
  0x2d   : > { %6480 = vmatprep.subr.bf16.mxu1 %v6835_v5 }
  0x30   : > { %6482 = vmatpush3.bf16.msra.mxu1 %v7047_v22 }
  0x31   : > { %6483 = vmatprep.subr.bf16.mxu1 %v6835_v5 }
  0x34   : > { %6485 = vmatpush3.bf16.msra.mxu1 %v7057_v25 }
  0x35   : > { %6486 = vmatprep.subr.bf16.mxu1 %v6835_v5 }
  0x38   : > { %6488 = vmatpush3.bf16.msra.mxu1 %v7067_v28 }
  0x39   : > { %6489 = vmatprep.subr.bf16.mxu1 %v6835_v5 }
  0x3c   : > { %6491 = vmatpush3.bf16.msra.mxu1 %v7077_v31 }
  0x3d   : > { %6492 = vmatprep.subr.bf16.mxu1 %v6835_v5 }
  0x40   : > { %6494 = vmatpush3.bf16.msra.mxu1 %v7087_v34 }
  0x41   : > { %6495 = vmatprep.subr.bf16.mxu1 %v6835_v5 }
  0xa7   : > { %v607_v36 = vpop.permute.xlu0 %606 }
  0xa8   : > { %vm608_vm1 = vcmp.eq.s32.totalorder %v604_v35, %v607_v36  ;;  %v7179_v36 = vld [vmem:[%s7945_s4 + $0x10] sm:$0xff] }
  0xa9   : > { %6068 = vmatmul.mubr.msk.f32.vlgmr.msra.gmra.mrb[0].mxu1 %vm608_vm1, %v6838_v37 }
  0xaa   : > { %6078 = vmatprep.mubr.msk.f32.mxu1 %vm6836_vm0, %v6837_v20  ;;  %6497 = vmatpush3.bf16.msra.mxu1 %v6496_v44 }
  0xab   : > { %6498 = vmatprep.subr.bf16.mxu1 %v6835_v5 }
  0xae   : > { %6500 = vmatpush3.bf16.msra.mxu1 %v6499_v47 }
  0xaf   : > { %6086 = vmatprep.subr.mxu1 %v6837_v20 }
 0x17c   : > { %v7094_v38 = vpop.f32.mrb[0].mxu1 }
 0x17d   : > { %v6069_v39 = vpop.f32.mrb[1].mxu1  ;;  %v690_v40 = vmul.f32 %v7094_v38, %v7094_v38 }
 0x17f   : > { %v692_v41 = vsel %vm691_vm2, %v690_v40, 0.0 }
 0x180   : > { %693 = vadd.xlane.f32.xlu0 %v692_v41 }
 0x20d   : > { %v694_v48 = vpop.xlane.xlu0 %693 }
 0x20e   : > { %v696_v49 = vmul.f32 0.03125, %v694_v48 }
 0x210   : > { %v697_v50 = vadd.f32 1e-06, %v696_v49 }
 0x212   : > { %6660 = vrsqrt.f32 %v697_v50  ;;  %v785_v50 = vld [vmem:[%s7890_s7 + $0x8] sm:$0xff] }
 0x21c   : > { %v6661_v51 = vpop.eup %6660 }
 0x21d   : > { %v699_v53 = vmul.f32 %v6661_v51, %v7094_v38 }
 0x21f   : > { %v706_v54 = vmul.f32 %v5708_v52, %v699_v53  ;;  %v784_v52 = vld [vmem:[%s7890_s7] sm:$0xff] }
 0x221   : > { %6079 = vmatmul.mubr.msk.f32.vlgmr.msra.gmra.mrb[2].mxu1 %vm691_vm2, %v706_v54 }
 0x222   : > { %6088 = vmatprep.mubr.msk.f32.mxu1 %vm6836_vm0, %v6837_v20 }
 0x2f4   : > { %v7120_v55 = vpop.f32.mrb[2].mxu1 }
 0x2f5   : > { %789 = vrot.lane.b32.xlu1 %v7120_v55, %s7923_s24  ;;  %v6080_v56 = vpop.f32.mrb[3].mxu1  ;;  %s7953_s24 = smov 120  }
 0x367   : > { %v790_v57 = vpop.permute.xlu1 %789 }
 0x368   : > { %6082 = vmatpush3.xpose.msk.msra.mxu0 %vm791_vm3, %v790_v57 }
 0x369   : > { %6111 = vmatprep.subr.mxu0 %v6837_v20 }
 0x36b   : > { %6084 = vmatmul.mubr.msk.f32.vlgmr.msra.gmra.mrb[0].mxu0 %vm791_vm3, %v7120_v55 }
 0x36c   : > { %6113 = vmatprep.mubr.msk.f32.mxu0 %vm6836_vm0, %v6837_v20 }
 0x43e   : > { %v862_v59 = vpop.f32.mrb[0].mxu0 }
 0x43f   : > { %v863_v60 = vadd.f32 %v862_v59, %v7133_v58  ;;  %v6085_v61 = vpop.f32.mrb[1].mxu0 }
 0x441   : > { %v866_v62 = vsel %vm791_vm3, %v863_v60, -inf }
 0x442   : > { %867 = vmax.xlane.f32.xlu1 %v866_v62  ;;  %v786_v62 = vld [vmem:[%s7890_s7 + $0x10] sm:$0xff] }
 0x453   : > { %955 = vrot.lane.b32.xlu1 %v7120_v55, %s7919_s18  ;;  %s7951_s18 = smov 104  }
 0x457   : > { %953 = vrot.lane.b32.xlu1 %v7120_v55, %s7925_s26 }
 0x45b   : > { %1264 = vrot.lane.b32.xlu1 %v7120_v55, %s7921_s19  ;;  %s6850_s19 = smov [#allocation2]  }
 0x4cf   : > { %v868_v63 = vpop.xlane.xlu1 %867 }
 0x4d0   : > { %v869_v0 = vsub.f32 %v863_v60, %v868_v63 }
 0x4d2   : > { %v870_v1 = vmul.f32 1.442695, %v869_v0 }
 0x4d3   : > { %v956_v4 = vpop.permute.xlu1 %955 }
 0x4d4   : > { %6662 = vpow2.f32 %v870_v1 }
 0x4d7   : > { %v954_v10 = vpop.permute.xlu1 %953 }
 0x4db   : > { %v1265_v13 = vpop.permute.xlu1 %1264 }
 0x4de   : > { %v6663_v2 = vpop.eup %6662 }
 0x4df   : > { %v872_v3 = vsel %vm791_vm3, %v6663_v2, 0.0 }
 0x4e0   : > { %873 = vadd.xlane.f32.xlu0 %v872_v3 }
 0x4f6   : > { %877 = vrot.lane.b32.xlu0 %v7120_v55, %s7909_s0  ;;  %s7911_s0 = smov 40  }
 0x4fa   : > { %1266 = vrot.lane.b32.xlu0 %v7120_v55, %s7917_s20  ;;  %s7950_s20 = smov 80  }
 0x56d   : > { %v874_v7 = vpop.xlane.xlu0 %873 }
 0x56e   : > { %6664 = vrcp.f32 %v874_v7 }
 0x571   : > { %v878_v8 = vpop.permute.xlu0 %877 }
 0x572   : > { %6087 = vmatpush3.msra.mxu1 %v878_v8  ;;  %v7223_v8 = vld [vmem:[%s7945_s4 + $0x18] sm:$0xff] }
 0x573   : > { %6091 = vmatprep.subr.mxu1 %v6837_v20 }
 0x575   : > { %v1267_v11 = vpop.permute.xlu0 %1266 }
 0x576   : > { %6112 = vmatpush3.xpose.msk.msra.mxu0 %vm791_vm3, %v1267_v11 }
 0x577   : > { %6121 = vmatprep.subr.mxu0 %v6837_v20 }
 0x578   : > { %v6665_v12 = vpop.eup %6664 }
 0x579   : > { %v876_v14 = vmul.f32 %v6665_v12, %v6663_v2  ;;  %6114 = vmatmul.mubr.msk.f32.vlgmr.msra.gmra.mrb[2].mxu0 %vm791_vm3, %v1265_v13 }
 0x57a   : > { %6123 = vmatprep.mubr.msk.f32.mxu0 %vm6836_vm0, %v6837_v20  ;;  %6122 = vmatpush3.msra.mxu0 %v786_v62 }
 0x57b   : > { %6089 = vmatmul.mubr.msk.f32.vlgmr.msra.gmra.mrb[4].mxu1 %vm791_vm3, %v876_v14  ;;  %6131 = vmatprep.subr.mxu0 %v6837_v20 }
 0x57c   : > { %6092 = vmatpush3.xpose.msk.msra.mxu1 %vm791_vm3, %v956_v4  ;;  %6093 = vmatprep.mubr.msk.f32.mxu1 %vm6836_vm0, %v6837_v20 }
 0x57d   : > { %6096 = vmatprep.subr.mxu1 %v6837_v20 }
 0x57f   : > { %6094 = vmatmul.mubr.msk.f32.vlgmr.msra.gmra.mrb[6].mxu1 %vm791_vm3, %v954_v10 }
 0x580   : > { %6098 = vmatprep.mubr.msk.f32.mxu1 %vm6836_vm0, %v6837_v20 }
 0x64c   : > { %v1338_v15 = vpop.f32.mrb[2].mxu0 }
 0x64d   : > { %v6115_v17 = vpop.f32.mrb[3].mxu0  ;;  %v1339_v39 = vadd.f32 %v1338_v15, %v7179_v36 }
 0x64e   : > { %v949_v18 = vpop.f32.mrb[4].mxu1 }
 0x64f   : > { %v6090_v19 = vpop.f32.mrb[5].mxu1  ;;  %v1342_v41 = vsel %vm791_vm3, %v1339_v39, -inf }
 0x652   : > { %v1027_v24 = vpop.f32.mrb[6].mxu1 }
 0x653   : > { %v1028_v26 = vadd.f32 %v1027_v24, %v7165_v23  ;;  %v6095_v27 = vpop.f32.mrb[7].mxu1 }
 0x655   : > { %v1031_v29 = vsel %vm791_vm3, %v1028_v26, -inf }
 0x656   : > { %1032 = vmax.xlane.f32.xlu0 %v1031_v29 }
 0x66c   : > { %1042 = vrot.lane.b32.xlu0 %v7120_v55, %s7910_s16  ;;  %s585_s16 = scalar_lea.vmem %s7946_s2, %s5704_s22  ;;  %s7952_s22 = smov 72  }
 0x670   : > { %1505 = vrot.lane.b32.xlu0 %v7120_v55, %s7913_s17  ;;  %s7947_s17 = smov 96  }
 0x674   : > { %1503 = vrot.lane.b32.xlu0 %v7120_v55, %s7915_s27  ;;  %s7948_s27 = smov 112  }
 0x6e3   : > { %v1033_v30 = vpop.xlane.xlu0 %1032 }
 0x6e4   : > { %v1034_v32 = vsub.f32 %v1028_v26, %v1033_v30  ;;  %v787_v26 = vld [vmem:[%s7890_s7 + $0x18] sm:$0xff] }
 0x6e6   : > { %v1035_v33 = vmul.f32 1.442695, %v1034_v32 }
 0x6e7   : > { %v1043_v35 = vpop.permute.xlu0 %1042 }
 0x6e8   : > { %6666 = vpow2.f32 %v1035_v33  ;;  %6097 = vmatpush3.msra.mxu1 %v1043_v35 }
 0x6e9   : > { %6101 = vmatprep.subr.mxu1 %v6837_v20 }
 0x6eb   : > { %v1506_v60 = vpop.permute.xlu0 %1505 }
 0x6ef   : > { %v1504_v61 = vpop.permute.xlu0 %1503 }
 0x6f2   : > { %v6667_v37 = vpop.eup %6666 }
 0x6f3   : > { %v1037_v40 = vsel %vm791_vm3, %v6667_v37, 0.0 }
 0x6f4   : > { %1038 = vadd.xlane.f32.xlu1 %v1037_v40 }
 0x6f8   : > { %1343 = vmax.xlane.f32.xlu1 %v1342_v41 }
 0x781   : > { %v1039_v42 = vpop.xlane.xlu1 %1038 }
 0x782   : > { %6668 = vrcp.f32 %v1039_v42 }
 0x785   : > { %v1344_v43 = vpop.xlane.xlu1 %1343 }
 0x786   : > { %v1345_v44 = vsub.f32 %v1339_v39, %v1344_v43 }
 0x788   : > { %v1346_v45 = vmul.f32 1.442695, %v1345_v44 }
 0x78a   : > { %6670 = vpow2.f32 %v1346_v45  ;;  %v1836_v45 = vld [vmem:[%s7893_s10] sm:$0xff] }
 0x78c   : > { %v6669_v46 = vpop.eup %6668 }
 0x78d   : > { %v1041_v47 = vmul.f32 %v6669_v46, %v6667_v37  ;;  %v1837_v46 = vld [vmem:[%s7893_s10 + $0x8] sm:$0xff] }
 0x78f   : > { %6099 = vmatmul.mubr.msk.f32.vlgmr.msra.gmra.mrb[8].mxu1 %vm791_vm3, %v1041_v47  ;;  %v6508_v47 = vpack.c.bf16 %v1837_v46, %v1836_v45  ;;  %v1914_v45 = vld [vmem:[%s7894_s11 + $0x8] sm:$0xff] }
 0x790   : > { %6103 = vmatprep.mubr.msk.f32.mxu1 %vm6836_vm0, %v6837_v20  ;;  %6102 = vmatpush3.msra.mxu1 %v785_v50 }
 0x791   : > { %6106 = vmatprep.subr.mxu1 %v6837_v20 }
 0x794   : > { %v6671_v48 = vpop.eup %6670 }
 0x795   : > { %v1348_v49 = vsel %vm791_vm3, %v6671_v48, 0.0 }
 0x796   : > { %1349 = vadd.xlane.f32.xlu1 %v1348_v49  ;;  %v1838_v49 = vld [vmem:[%s7893_s10 + $0x10] sm:$0xff] }
 0x7a7   : > { %1353 = vrot.lane.b32.xlu1 %v7120_v55, %s7912_s29  ;;  %s7949_s29 = smov 88  }
 0x823   : > { %v1350_v51 = vpop.xlane.xlu1 %1349 }
 0x824   : > { %6672 = vrcp.f32 %v1350_v51  ;;  %v1839_v51 = vld [vmem:[%s7893_s10 + $0x18] sm:$0xff] }
 0x827   : > { %v1354_v57 = vpop.permute.xlu1 %1353 }
 0x82e   : > { %v6673_v56 = vpop.eup %6672 }
 0x82f   : > { %v1352_v59 = vmul.f32 %v6673_v56, %v6671_v48  ;;  %v1760_v48 = vld [vmem:[%s7892_s9 + $0x8] sm:$0xff]  ;;  %v1762_v56 = vld [vmem:[%s7892_s9 + $0x18] sm:$0xff] }
 0x862   : > { %v1114_v53 = vpop.f32.mrb[8].mxu1 }
 0x863   : > { %v6100_v54 = vpop.f32.mrb[9].mxu1  ;;  %6104 = vmatmul.mubr.msk.f32.vlgmr.msra.gmra.mrb[10].mxu1 %vm791_vm3, %v1114_v53  ;;  %v7271_v53 = vld [vmem:[%s585_s16] sm:$0xff] }
 0x864   : > { %6107 = vmatpush3.msra.mxu1 %v784_v52  ;;  %6108 = vmatprep.mubr.msk.f32.mxu1 %vm6836_vm0, %v6837_v20  ;;  %v6511_v52 = vpack.c.bf16 %v1839_v51, %v1838_v49  ;;  %v1761_v54 = vld [vmem:[%s7892_s9 + $0x10] sm:$0xff]  ;;  %v1913_v49 = vld [vmem:[%s7894_s11] sm:$0xff] }
 0x865   : > { %6116 = vmatprep.subr.mxu1 %v6837_v20 }
 0x867   : > { %6109 = vmatmul.mubr.msk.f32.vlgmr.msra.gmra.mrb[12].mxu1 %vm791_vm3, %v949_v18 }
 0x868   : > { %6117 = vmatpush3.msra.mxu1 %v1354_v57  ;;  %6118 = vmatprep.mubr.msk.f32.mxu1 %vm6836_vm0, %v6837_v20  ;;  %v6505_v57 = vpack.c.bf16 %v1762_v56, %v1761_v54 }
 0x869   : > { %6126 = vmatprep.subr.mxu1 %v6837_v20 }
 0x86b   : > { %6119 = vmatmul.mubr.msk.f32.vlgmr.msra.gmra.mrb[14].mxu1 %vm791_vm3, %v1352_v59 }
 0x86c   : > { %6128 = vmatprep.mubr.msk.f32.mxu1 %vm6836_vm0, %v6837_v20 }
 0x86f   : > { %6127 = vmatpush3.xpose.msk.msra.mxu1 %vm791_vm3, %v1506_v60 }
 0x870   : > { %6136 = vmatprep.subr.mxu1 %v6837_v20 }
 0x872   : > { %6129 = vmatmul.mubr.msk.f32.vlgmr.msra.gmra.mrb[16].mxu1 %vm791_vm3, %v1504_v61 }
 0x873   : > { %6138 = vmatprep.mubr.msk.f32.mxu1 %vm6836_vm0, %v6837_v20  ;;  %6137 = vmatpush3.msra.mxu1 %v787_v26 }
 0x874   : > { %6507 = vmatprep.subr.bf16.mxu1 %v6835_v5 }
 0x936   : > { %v1187_v63 = vpop.f32.mrb[10].mxu1 }
 0x937   : > { %v6105_v0 = vpop.f32.mrb[11].mxu1 }
 0x93a   : > { %v1260_v1 = vpop.f32.mrb[12].mxu1 }
 0x93b   : > { %v1261_v2 = vadd.f32 %v1260_v1, %v1187_v63  ;;  %v6110_v3 = vpop.f32.mrb[13].mxu1  ;;  %v5726_v63 = vld [vmem:[%s7891_s8] ss:$0 sm:$0xff] }
 0x93e   : > { %v1425_v4 = vpop.f32.mrb[14].mxu1 }
 0x93f   : > { %v6120_v7 = vpop.f32.mrb[15].mxu1  ;;  %6124 = vmatmul.mubr.msk.f32.vlgmr.msra.gmra.mrb[4].mxu0 %vm791_vm3, %v1425_v4 }
 0x940   : > { %6133 = vmatprep.mubr.msk.f32.mxu0 %vm6836_vm0, %v6837_v20 }
 0x945   : > { %v1577_v10 = vpop.f32.mrb[16].mxu1 }
 0x946   : > { %v1578_v11 = vadd.f32 %v1577_v10, %v7223_v8  ;;  %v6130_v12 = vpop.f32.mrb[17].mxu1 }
 0x948   : > { %v1581_v13 = vsel %vm791_vm3, %v1578_v11, -inf }
 0x949   : > { %1582 = vmax.xlane.f32.xlu0 %v1581_v13 }
 0x95f   : > { %1592 = vrot.lane.b32.xlu0 %v7120_v55, %s7911_s0  ;;  %s7955_s0 = smov 64  }
 0x9d6   : > { %v1583_v14 = vpop.xlane.xlu0 %1582 }
 0x9d7   : > { %v1584_v15 = vsub.f32 %v1578_v11, %v1583_v14 }
 0x9d9   : > { %v1585_v17 = vmul.f32 1.442695, %v1584_v15 }
 0x9da   : > { %v1593_v18 = vpop.permute.xlu0 %1592 }
 0x9db   : > { %6674 = vpow2.f32 %v1585_v17  ;;  %6132 = vmatpush3.msra.mxu0 %v1593_v18 }
 0x9dc   : > { %6501 = vmatprep.subr.bf16.mxu0 %v6835_v5 }
 0x9e5   : > { %v6675_v19 = vpop.eup %6674 }
 0x9e6   : > { %v1587_v24 = vsel %vm791_vm3, %v6675_v19, 0.0 }
 0x9e7   : > { %1588 = vadd.xlane.f32.xlu1 %v1587_v24 }
 0xa12   : > { %v1498_v55 = vpop.f32.mrb[4].mxu0 }
 0xa13   : > { %v1502_v27 = vadd.f32 %v1498_v55, %v1261_v2  ;;  %v6125_v29 = vpop.f32.mrb[5].mxu0 }
 0xa74   : > { %v1589_v30 = vpop.xlane.xlu1 %1588 }
 0xa75   : > { %6676 = vrcp.f32 %v1589_v30 }
 0xa7f   : > { %v6677_v32 = vpop.eup %6676 }
 0xa80   : > { %v1591_v33 = vmul.f32 %v6677_v32, %v6675_v19 }
 0xa82   : > { %6134 = vmatmul.mubr.msk.f32.vlgmr.msra.gmra.mrb[6].mxu0 %vm791_vm3, %v1591_v33 }
 0xa83   : > { %6149 = vmatprep.mubr.msk.f32.mxu0 %vm6836_vm0, %v6837_v20 }
 0xb55   : > { %v1664_v35 = vpop.f32.mrb[6].mxu0 }
 0xb56   : > { %v6135_v37 = vpop.f32.mrb[7].mxu0  ;;  %6139 = vmatmul.mubr.msk.f32.vlgmr.msra.gmra.mrb[18].mxu1 %vm791_vm3, %v1664_v35 }
 0xb57   : > { %6160 = vmatprep.mubr.msk.f32.mxu1 %vm6836_vm0, %v6837_v20  ;;  %6509 = vmatpush3.bf16.msra.mxu1 %v6508_v47 }
 0xb58   : > { %6510 = vmatprep.subr.bf16.mxu1 %v6835_v5 }
 0xb5b   : > { %6512 = vmatpush3.bf16.msra.mxu1 %v6511_v52 }
 0xb5c   : > { %6168 = vmatprep.subr.mxu1 %v6837_v20 }
 0xb5e   : > { %6161 = vmatmul.mubr.msk.f32.vlgmr.msra.gmra.mrb[20].mxu1 %vm691_vm2, %v7271_v53 }
 0xb5f   : > { %6170 = vmatprep.mubr.msk.f32.mxu1 %vm6836_vm0, %v6837_v20 }
 0xc29   : > { %v1737_v39 = vpop.f32.mrb[18].mxu1 }
 0xc2a   : > { %v1741_v40 = vadd.f32 %v1737_v39, %v1502_v27  ;;  %v6140_v41 = vpop.f32.mrb[19].mxu1 }
 0xc2c   : > { %v7242_v42 = vadd.f32 %v1741_v40, %v7094_v38  ;;  %v1759_v38 = vld [vmem:[%s7892_s9] sm:$0xff] }
 0xc2d   : > { %v6502_v50 = vpack.c.bf16 %v1760_v48, %v1759_v38 }
 0xc2e   : > { %v1744_v43 = vmul.f32 %v7242_v42, %v7242_v42 }
 0xc2f   : > { %6503 = vmatpush3.bf16.msra.mxu0 %v6502_v50 }
 0xc30   : > { %v1745_v44 = vsel %vm691_vm2, %v1744_v43, 0.0  ;;  %6504 = vmatprep.subr.bf16.mxu0 %v6835_v5 }
 0xc31   : > { %1746 = vadd.xlane.f32.xlu1 %v1745_v44  ;;  %v7293_v2 = vpop.f32.mrb[20].mxu1 }
 0xc32   : > { %v6162_v3 = vpop.f32.mrb[21].mxu1 }
 0xc33   : > { %6506 = vmatpush3.bf16.msra.mxu0 %v6505_v57 }
 0xc34   : > { %6163 = vmatprep.subr.mxu0 %v6837_v20 }
 0xc42   : > { %2088 = vrot.lane.b32.xlu1 %v7293_v2, %s7925_s26 }
 0xcbe   : > { %v1747_v59 = vpop.xlane.xlu1 %1746 }
 0xcbf   : > { %v1748_v60 = vmul.f32 0.03125, %v1747_v59 }
 0xcc1   : > { %v1749_v61 = vadd.f32 1e-06, %v1748_v60 }
 0xcc2   : > { %v2089_v4 = vpop.permute.xlu1 %2088 }
 0xcc3   : > { %6678 = vrsqrt.f32 %v1749_v61 }
 0xccd   : > { %v6679_v62 = vpop.eup %6678 }
 0xcce   : > { %v1751_v0 = vmul.f32 %v6679_v62, %v7242_v42 }
 0xcd0   : > { %v1758_v1 = vmul.f32 %v5726_v63, %v1751_v0 }
 0xcd2   : > { %6150 = vmatmul.mubr.msk.f32.vlgmr.msra.gmra.mrb[8].mxu0 %vm691_vm2, %v1758_v1 }
 0xcd3   : > { %6165 = vmatprep.mubr.msk.f32.mxu0 %vm6836_vm0, %v6837_v20  ;;  %6164 = vmatpush3.xpose.msk.msra.mxu0 %vm791_vm3, %v7293_v2 }
 0xcd4   : > { %6173 = vmatprep.subr.mxu0 %v6837_v20 }
 0xda5   : > { %v7300_v7 = vpop.f32.mrb[8].mxu0 }
 0xda6   : > { %2086 = vrot.lane.b32.xlu0 %v7300_v7, %s7925_s26  ;;  %v6151_v10 = vpop.f32.mrb[9].mxu0  ;;  %6166 = vmatmul.mubr.msk.f32.vlgmr.msra.gmra.mrb[10].mxu0 %vm791_vm3, %v7300_v7  ;;  %s6742_s26 = sshll.u32 %s6850_s19, 4  ;;  %s6743_s26 = int_to_ptr.vmem [resolvable:$false] %s6742_s26 }
 0xda7   : > { %6174 = vmatpush3.xpose.msk.msra.mxu0 %vm791_vm3, %v2089_v4  ;;  %6175 = vmatprep.mubr.msk.f32.mxu0 %vm6836_vm0, %v6837_v20  ;;  %s6744_s4 = scalar_lea.vmem %s6743_s26, 256 }
 0xda8   : > { %6183 = vmatprep.subr.mxu0 %v6837_v20 }
 0xe18   : > { %v2087_v11 = vpop.permute.xlu0 %2086 }
 0xe19   : > { %6176 = vmatmul.mubr.msk.f32.vlgmr.msra.gmra.mrb[12].mxu0 %vm791_vm3, %v2087_v11 }
 0xe1a   : > { %6185 = vmatprep.mubr.msk.f32.mxu0 %vm6836_vm0, %v6837_v20  ;;  %6184 = vmatpush3.msra.mxu0 %v1914_v45 }
 0xe1b   : > { %6193 = vmatprep.subr.mxu0 %v6837_v20 }
 0xe79   : > { %v1995_v12 = vpop.f32.mrb[10].mxu0 }
 0xe7a   : > { %v1996_v13 = vadd.f32 %v1995_v12, %v7044_v21  ;;  %v6167_v14 = vpop.f32.mrb[11].mxu0 }
 0xe7c   : > { %v1999_v15 = vsel %vm791_vm3, %v1996_v13, -inf }
 0xe7d   : > { %2000 = vmax.xlane.f32.xlu0 %v1999_v15 }
 0xeec   : > { %v2160_v17 = vpop.f32.mrb[12].mxu0 }
 0xeed   : > { %v2161_v18 = vadd.f32 %v2160_v17, %v7044_v21  ;;  %v6177_v19 = vpop.f32.mrb[13].mxu0 }
 0xeef   : > { %v2164_v24 = vsel %vm791_vm3, %v2161_v18, -inf }
 0xef0   : > { %2165 = vmax.xlane.f32.xlu1 %v2164_v24 }
 0xf01   : > { %2010 = vrot.lane.b32.xlu1 %v7293_v2, %s7947_s17 }
 0xf05   : > { %2399 = vrot.lane.b32.xlu1 %v7293_v2, %s7948_s27 }
 0xf09   : > { %2397 = vrot.lane.b32.xlu1 %v7300_v7, %s7948_s27 }
 0xf0a   : > { %v2001_v26 = vpop.xlane.xlu0 %2000 }
 0xf0b   : > { %v2002_v55 = vsub.f32 %v1996_v13, %v2001_v26  ;;  %v1915_v26 = vld [vmem:[%s7894_s11 + $0x10] sm:$0xff] }
 0xf0d   : > { %v2003_v27 = vmul.f32 1.442695, %v2002_v55 }
 0xf0f   : > { %6680 = vpow2.f32 %v2003_v27 }
 0xf19   : > { %v6681_v29 = vpop.eup %6680 }
 0xf1a   : > { %v2005_v30 = vsel %vm791_vm3, %v6681_v29, 0.0 }
 0xf1b   : > { %2006 = vadd.xlane.f32.xlu0 %v2005_v30 }
 0xf7d   : > { %v2166_v32 = vpop.xlane.xlu1 %2165 }
 0xf7e   : > { %v2167_v33 = vsub.f32 %v2161_v18, %v2166_v32 }
 0xf80   : > { %v2168_v35 = vmul.f32 1.442695, %v2167_v33 }
 0xf81   : > { %v2011_v37 = vpop.permute.xlu1 %2010 }
 0xf82   : > { %6682 = vpow2.f32 %v2168_v35  ;;  %6169 = vmatpush3.msra.mxu1 %v2011_v37 }
 0xf83   : > { %6178 = vmatprep.subr.mxu1 %v6837_v20 }
 0xf85   : > { %v2400_v52 = vpop.permute.xlu1 %2399 }
 0xf89   : > { %v2398_v57 = vpop.permute.xlu1 %2397 }
 0xf8c   : > { %v6683_v39 = vpop.eup %6682 }
 0xf8d   : > { %v2170_v40 = vsel %vm791_vm3, %v6683_v39, 0.0 }
 0xf8e   : > { %2171 = vadd.xlane.f32.xlu0 %v2170_v40 }
 0xfa4   : > { %2175 = vrot.lane.b32.xlu0 %v7293_v2, %s7949_s29 }
 0xfa8   : > { %v2007_v41 = vpop.xlane.xlu0 %2006 }
 0xfa9   : > { %6684 = vrcp.f32 %v2007_v41 }
 0xfb3   : > { %v6685_v43 = vpop.eup %6684 }
 0xfb4   : > { %v2009_v44 = vmul.f32 %v6685_v43, %v6681_v29  ;;  %v1916_v43 = vld [vmem:[%s7894_s11 + $0x18] sm:$0xff] }
 0xfb6   : > { %6171 = vmatmul.mubr.msk.f32.vlgmr.msra.gmra.mrb[22].mxu1 %vm791_vm3, %v2009_v44 }
 0xfb7   : > { %6180 = vmatprep.mubr.msk.f32.mxu1 %vm6836_vm0, %v6837_v20 }
0x101b   : > { %v2172_v46 = vpop.xlane.xlu0 %2171 }
0x101c   : > { %6686 = vrcp.f32 %v2172_v46 }
0x101f   : > { %v2176_v47 = vpop.permute.xlu0 %2175 }
0x1020   : > { %6179 = vmatpush3.msra.mxu1 %v2176_v47 }
0x1021   : > { %6188 = vmatprep.subr.mxu1 %v6837_v20 }
0x1026   : > { %v6687_v38 = vpop.eup %6686 }
0x1027   : > { %v2174_v48 = vmul.f32 %v6687_v38, %v6683_v39 }
0x1029   : > { %6181 = vmatmul.mubr.msk.f32.vlgmr.msra.gmra.mrb[24].mxu1 %vm791_vm3, %v2174_v48 }
0x102a   : > { %6189 = vmatpush3.msra.mxu1 %v1913_v49  ;;  %6190 = vmatprep.mubr.msk.f32.mxu1 %vm6836_vm0, %v6837_v20 }
0x102b   : > { %6198 = vmatprep.subr.mxu1 %v6837_v20 }
0x1089   : > { %v2082_v50 = vpop.f32.mrb[22].mxu1 }
0x108a   : > { %v6172_v51 = vpop.f32.mrb[23].mxu1  ;;  %6191 = vmatmul.mubr.msk.f32.vlgmr.msra.gmra.mrb[26].mxu1 %vm791_vm3, %v2082_v50 }
0x108b   : > { %6200 = vmatprep.mubr.msk.f32.mxu1 %vm6836_vm0, %v6837_v20 }
0x10fc   : > { %v2247_v54 = vpop.f32.mrb[24].mxu1 }
0x10fd   : > { %v6182_v56 = vpop.f32.mrb[25].mxu1  ;;  %6186 = vmatmul.mubr.msk.f32.vlgmr.msra.gmra.mrb[14].mxu0 %vm791_vm3, %v2247_v54 }
0x10fe   : > { %6194 = vmatpush3.xpose.msk.msra.mxu0 %vm791_vm3, %v2400_v52  ;;  %6195 = vmatprep.mubr.msk.f32.mxu0 %vm6836_vm0, %v6837_v20 }
0x10ff   : > { %6203 = vmatprep.subr.mxu0 %v6837_v20 }
0x1101   : > { %6196 = vmatmul.mubr.msk.f32.vlgmr.msra.gmra.mrb[16].mxu0 %vm791_vm3, %v2398_v57 }
0x1102   : > { %6205 = vmatprep.mubr.msk.f32.mxu0 %vm6836_vm0, %v6837_v20  ;;  %6204 = vmatpush3.msra.mxu0 %v1915_v26 }
0x1103   : > { %6213 = vmatprep.subr.mxu0 %v6837_v20 }
0x115d   : > { %v2393_v59 = vpop.f32.mrb[26].mxu1 }
0x115e   : > { %v6192_v60 = vpop.f32.mrb[27].mxu1 }
0x115f   : > { %v2892_v60 = vld [vmem:[%s7896_s13] sm:$0xff] }
0x11d0   : > { %v2320_v61 = vpop.f32.mrb[14].mxu0 }
0x11d1   : > { %v2394_v62 = vadd.f32 %v2393_v59, %v2320_v61  ;;  %v6187_v63 = vpop.f32.mrb[15].mxu0  ;;  %v2893_v61 = vld [vmem:[%s7896_s13 + $0x8] sm:$0xff] }
0x11d2   : > { %v2895_v63 = vld [vmem:[%s7896_s13 + $0x18] sm:$0xff] }
0x11d4   : > { %v2471_v0 = vpop.f32.mrb[16].mxu0 }
0x11d5   : > { %v2472_v1 = vadd.f32 %v2471_v0, %v7044_v21  ;;  %v6197_v3 = vpop.f32.mrb[17].mxu0 }
0x11d6   : > { %v2971_v3 = vld [vmem:[%s7897_s14 + $0x8] sm:$0xff] }
0x11d7   : > { %v2475_v4 = vsel %vm791_vm3, %v2472_v1, -inf }
0x11d8   : > { %2476 = vmax.xlane.f32.xlu0 %v2475_v4  ;;  %v2972_v4 = vld [vmem:[%s7897_s14 + $0x10] sm:$0xff] }
0x11ee   : > { %2486 = vrot.lane.b32.xlu0 %v7293_v2, %s7950_s20 }
0x11f2   : > { %2636 = vrot.lane.b32.xlu0 %v7300_v7, %s7951_s18 }
0x1265   : > { %v2477_v10 = vpop.xlane.xlu0 %2476 }
0x1266   : > { %v2478_v11 = vsub.f32 %v2472_v1, %v2477_v10  ;;  %v2970_v1 = vld [vmem:[%s7897_s14] sm:$0xff] }
0x1267   : > { %v6520_v10 = vpack.c.bf16 %v2971_v3, %v2970_v1 }
0x1268   : > { %v2479_v12 = vmul.f32 1.442695, %v2478_v11  ;;  %v2973_v11 = vld [vmem:[%s7897_s14 + $0x18] sm:$0xff] }
0x1269   : > { %v2487_v13 = vpop.permute.xlu0 %2486 }
0x126a   : > { %6688 = vpow2.f32 %v2479_v12  ;;  %6199 = vmatpush3.msra.mxu1 %v2487_v13  ;;  %v6523_v12 = vpack.c.bf16 %v2973_v11, %v2972_v4  ;;  %v2974_v13 = vld [vmem:[%s7897_s14 + $0x20] sm:$0xff] }
0x126b   : > { %6208 = vmatprep.subr.mxu1 %v6837_v20 }
0x126d   : > { %v2637_v24 = vpop.permute.xlu0 %2636 }
0x1274   : > { %v6689_v14 = vpop.eup %6688 }
0x1275   : > { %v2481_v15 = vsel %vm791_vm3, %v6689_v14, 0.0 }
0x1276   : > { %2482 = vadd.xlane.f32.xlu1 %v2481_v15 }
0x1287   : > { %2638 = vrot.lane.b32.xlu1 %v7293_v2, %s7951_s18 }
0x1303   : > { %v2483_v17 = vpop.xlane.xlu1 %2482 }
0x1304   : > { %6690 = vrcp.f32 %v2483_v17 }
0x1307   : > { %v2639_v7 = vpop.permute.xlu1 %2638 }
0x130e   : > { %v6691_v18 = vpop.eup %6690 }
0x130f   : > { %v2485_v19 = vmul.f32 %v6691_v18, %v6689_v14  ;;  %v2975_v14 = vld [vmem:[%s7897_s14 + $0x28] sm:$0xff] }
0x1310   : > { %v6526_v15 = vpack.c.bf16 %v2975_v14, %v2974_v13 }
0x1311   : > { %6201 = vmatmul.mubr.msk.f32.vlgmr.msra.gmra.mrb[28].mxu1 %vm791_vm3, %v2485_v19 }
0x1312   : > { %6209 = vmatpush3.xpose.msk.msra.mxu1 %vm791_vm3, %v2639_v7  ;;  %6210 = vmatprep.mubr.msk.f32.mxu1 %vm6836_vm0, %v6837_v20 }
0x1313   : > { %6218 = vmatprep.subr.mxu1 %v6837_v20 }
0x1315   : > { %6211 = vmatmul.mubr.msk.f32.vlgmr.msra.gmra.mrb[30].mxu1 %vm791_vm3, %v2637_v24  ;;  %v5745_v24 = vld [vmem:[%s7895_s12] ss:$0 sm:$0xff] }
0x1316   : > { %6220 = vmatprep.mubr.msk.f32.mxu1 %vm6836_vm0, %v6837_v20  ;;  %6219 = vmatpush3.msra.mxu1 %v1916_v43 }
0x1317   : > { %6519 = vmatprep.subr.bf16.mxu1 %v6835_v5 }
0x13e4   : > { %v2558_v55 = vpop.f32.mrb[28].mxu1 }
0x13e5   : > { %v6202_v27 = vpop.f32.mrb[29].mxu1  ;;  %6206 = vmatmul.mubr.msk.f32.vlgmr.msra.gmra.mrb[18].mxu0 %vm791_vm3, %v2558_v55 }
0x13e6   : > { %6215 = vmatprep.mubr.msk.f32.mxu0 %vm6836_vm0, %v6837_v20  ;;  %v2976_v27 = vld [vmem:[%s7897_s14 + $0x30] sm:$0xff] }
0x13e8   : > { %v2710_v29 = vpop.f32.mrb[30].mxu1 }
0x13e9   : > { %v2711_v30 = vadd.f32 %v2710_v29, %v7044_v21  ;;  %v6212_v32 = vpop.f32.mrb[31].mxu1  ;;  %v2977_v29 = vld [vmem:[%s7897_s14 + $0x38] sm:$0xff] }
0x13eb   : > { %v2714_v33 = vsel %vm791_vm3, %v2711_v30, -inf }
0x13ec   : > { %2715 = vmax.xlane.f32.xlu1 %v2714_v33 }
0x1479   : > { %v2716_v35 = vpop.xlane.xlu1 %2715 }
0x147a   : > { %v2717_v37 = vsub.f32 %v2711_v30, %v2716_v35  ;;  %v6529_v30 = vpack.c.bf16 %v2977_v29, %v2976_v27 }
0x147c   : > { %v2718_v39 = vmul.f32 1.442695, %v2717_v37 }
0x147e   : > { %6692 = vpow2.f32 %v2718_v39 }
0x1488   : > { %v6693_v40 = vpop.eup %6692 }
0x1489   : > { %v2720_v41 = vsel %vm791_vm3, %v6693_v40, 0.0 }
0x148a   : > { %2721 = vadd.xlane.f32.xlu0 %v2720_v41 }
0x14a0   : > { %2725 = vrot.lane.b32.xlu0 %v7293_v2, %s7952_s22 }
0x14b8   : > { %v2631_v44 = vpop.f32.mrb[18].mxu0 }
0x14b9   : > { %v2635_v45 = vadd.f32 %v2631_v44, %v2394_v62  ;;  %v6207_v46 = vpop.f32.mrb[19].mxu0  ;;  %v6514_v62 = vpack.c.bf16 %v2893_v61, %v2892_v60  ;;  %v5750_v44 = vld [vmem:[%s7889_s6 + $0x20] sm:$0xff] }
0x1517   : > { %v2722_v47 = vpop.xlane.xlu0 %2721 }
0x1518   : > { %6694 = vrcp.f32 %v2722_v47  ;;  %v5752_v47 = vld [vmem:[%s7889_s6 + $0x30] sm:$0xff] }
0x151b   : > { %v2726_v38 = vpop.permute.xlu0 %2725 }
0x151c   : > { %6214 = vmatpush3.msra.mxu0 %v2726_v38  ;;  %v5753_v38 = vld [vmem:[%s7889_s6 + $0x38] sm:$0xff] }
0x151d   : > { %6513 = vmatprep.subr.bf16.mxu0 %v6835_v5 }
0x1522   : > { %v6695_v48 = vpop.eup %6694 }
0x1523   : > { %v2724_v49 = vmul.f32 %v6695_v48, %v6693_v40  ;;  %v6535_v48 = vpack.c.bf16 %v5753_v38, %v5752_v47 }
0x1525   : > { %6216 = vmatmul.mubr.msk.f32.vlgmr.msra.gmra.mrb[20].mxu0 %vm791_vm3, %v2724_v49 }
0x1526   : > { %6231 = vmatprep.mubr.msk.f32.mxu0 %vm6836_vm0, %v6837_v20  ;;  %6515 = vmatpush3.bf16.msra.mxu0 %v6514_v62 }
0x1527   : > { %6516 = vmatprep.subr.bf16.mxu0 %v6835_v5 }
0x15f8   : > { %v2797_v2 = vpop.f32.mrb[20].mxu0 }
0x15f9   : > { %v6217_v50 = vpop.f32.mrb[21].mxu0  ;;  %6221 = vmatmul.mubr.msk.f32.vlgmr.msra.gmra.mrb[32].mxu1 %vm791_vm3, %v2797_v2 }
0x15fa   : > { %6250 = vmatprep.mubr.msk.f32.mxu1 %vm6836_vm0, %v6837_v20  ;;  %6521 = vmatpush3.bf16.msra.mxu1 %v6520_v10 }
0x15fb   : > { %6522 = vmatprep.subr.bf16.mxu1 %v6835_v5 }
0x15fe   : > { %6524 = vmatpush3.bf16.msra.mxu1 %v6523_v12 }
0x15ff   : > { %6525 = vmatprep.subr.bf16.mxu1 %v6835_v5 }
0x1602   : > { %6527 = vmatpush3.bf16.msra.mxu1 %v6526_v15 }
0x1603   : > { %6528 = vmatprep.subr.bf16.mxu1 %v6835_v5 }
0x1606   : > { %6530 = vmatpush3.bf16.msra.mxu1 %v6529_v30 }
0x1607   : > { %6269 = vmatprep.subr.mxu1 %v6837_v20 }
0x16cc   : > { %v2870_v51 = vpop.f32.mrb[32].mxu1 }
0x16cd   : > { %v2874_v52 = vadd.f32 %v2870_v51, %v2635_v45  ;;  %v6222_v54 = vpop.f32.mrb[33].mxu1  ;;  %v5751_v45 = vld [vmem:[%s7889_s6 + $0x28] sm:$0xff] }
0x16ce   : > { %v6532_v46 = vpack.c.bf16 %v5751_v45, %v5750_v44 }
0x16cf   : > { %v2875_v56 = vadd.f32 %v2874_v52, %v7242_v42  ;;  %v2894_v42 = vld [vmem:[%s7896_s13 + $0x10] sm:$0xff]  ;;  %v5749_v52 = vld [vmem:[%s7888_s5 + $0x1] ss:$0 sm:$0xff] }
0x16d0   : > { %v6517_v0 = vpack.c.bf16 %v2895_v63, %v2894_v42 }
0x16d1   : > { %v2877_v57 = vmul.f32 %v2875_v56, %v2875_v56 }
0x16d2   : > { %6518 = vmatpush3.bf16.msra.mxu0 %v6517_v0 }
0x16d3   : > { %v2878_v59 = vsel %vm691_vm2, %v2877_v57, 0.0  ;;  %6531 = vmatprep.subr.bf16.mxu0 %v6835_v5 }
0x16d4   : > { %2879 = vadd.xlane.f32.xlu1 %v2878_v59 }
0x1761   : > { %v2880_v17 = vpop.xlane.xlu1 %2879 }
0x1762   : > { %v2881_v18 = vmul.f32 0.03125, %v2880_v17 }
0x1764   : > { %v2882_v19 = vadd.f32 1e-06, %v2881_v18 }
0x1766   : > { %6696 = vrsqrt.f32 %v2882_v19 }
0x1770   : > { %v6697_v7 = vpop.eup %6696 }
0x1771   : > { %v2884_v26 = vmul.f32 %v6697_v7, %v2875_v56 }
0x1773   : > { %v2891_v55 = vmul.f32 %v5745_v24, %v2884_v26 }
0x1775   : > { %6232 = vmatmul.mubr.msk.f32.vlgmr.msra.gmra.mrb[22].mxu0 %vm691_vm2, %v2891_v55 }
0x1776   : > { %6261 = vmatprep.mubr.msk.f32.mxu0 %vm6836_vm0, %v6837_v20  ;;  %6533 = vmatpush3.bf16.msra.mxu0 %v6532_v46 }
0x1777   : > { %6534 = vmatprep.subr.bf16.mxu0 %v6835_v5 }
0x177a   : > { %6536 = vmatpush3.bf16.msra.mxu0 %v6535_v48 }
0x177b   : > { %6264 = vmatprep.subr.mxu0 %v6837_v20 }
0x1848   : > { %v2965_v32 = vpop.f32.mrb[22].mxu0 }
0x1849   : > { %v2969_v33 = vmax.f32 %v2965_v32, 0.0  ;;  %v6233_v35 = vpop.f32.mrb[23].mxu0 }
0x184b   : > { %6251 = vmatmul.mubr.msk.f32.vlgmr.msra.gmra.mrb[34].mxu1 %vm2978_vm4, %v2969_v33 }
0x184c   : > { %6271 = vmatprep.mubr.msk.f32.mxu1 %vm6836_vm0, %v6837_v20 }
0x191e   : > { %v3048_v37 = vpop.f32.mrb[34].mxu1 }
0x191f   : > { %v7448_v39 = vadd.f32 %v3048_v37, %v2875_v56  ;;  %v6252_v40 = vpop.f32.mrb[35].mxu1  ;;  %v5755_v37 = vld [vmem:[%s7890_s7 + $0x20] sm:$0xff] }
0x1921   : > { %v3055_v41 = vmul.f32 %v7448_v39, %v7448_v39 }
0x1923   : > { %v3056_v43 = vsel %vm691_vm2, %v3055_v41, 0.0 }
0x1924   : > { %3057 = vadd.xlane.f32.xlu1 %v3056_v43 }
0x19b1   : > { %v3058_v49 = vpop.xlane.xlu1 %3057 }
0x19b2   : > { %v3059_v2 = vmul.f32 0.03125, %v3058_v49 }
0x19b4   : > { %v3060_v50 = vadd.f32 1e-06, %v3059_v2 }
0x19b6   : > { %6698 = vrsqrt.f32 %v3060_v50 }
0x19c0   : > { %v6699_v51 = vpop.eup %6698 }
0x19c1   : > { %v3062_v54 = vmul.f32 %v6699_v51, %v7448_v39 }
0x19c3   : > { %v3069_v56 = vmul.f32 %v5749_v52, %v3062_v54 }
0x19c5   : > { %6262 = vmatmul.mubr.msk.f32.vlgmr.msra.gmra.mrb[24].mxu0 %vm691_vm2, %v3069_v56 }
0x19c6   : > { %6266 = vmatprep.mubr.msk.f32.mxu0 %vm6836_vm0, %v6837_v20 }
0x1a98   : > { %v7474_v57 = vpop.f32.mrb[24].mxu0 }
0x1a99   : > { %3319 = vrot.lane.b32.xlu0 %v7474_v57, %s7949_s29  ;;  %3154 = vrot.lane.b32.xlu1 %v7474_v57, %s7947_s17  ;;  %v6263_v59 = vpop.f32.mrb[25].mxu0 }
0x1a9d   : > { %3317 = vrot.lane.b32.xlu0 %v7474_v57, %s7953_s24 }
0x1b0b   : > { %v3155_v60 = vpop.permute.xlu1 %3154  ;;  %v3320_v61 = vpop.permute.xlu0 %3319 }
0x1b0c   : > { %6265 = vmatpush3.xpose.msk.msra.mxu0 %vm791_vm3, %v3155_v60 }
0x1b0d   : > { %6274 = vmatprep.subr.mxu0 %v6837_v20 }
0x1b0f   : > { %6267 = vmatmul.mubr.msk.f32.vlgmr.msra.gmra.mrb[26].mxu0 %vm791_vm3, %v7474_v57  ;;  %v3318_v62 = vpop.permute.xlu0 %3317 }
0x1b10   : > { %6275 = vmatpush3.xpose.msk.msra.mxu0 %vm791_vm3, %v3320_v61  ;;  %6276 = vmatprep.mubr.msk.f32.mxu0 %vm6836_vm0, %v6837_v20 }
0x1b11   : > { %6284 = vmatprep.subr.mxu0 %v6837_v20 }
0x1b13   : > { %6277 = vmatmul.mubr.msk.f32.vlgmr.msra.gmra.mrb[28].mxu0 %vm791_vm3, %v3318_v62 }
0x1b14   : > { %6286 = vmatprep.mubr.msk.f32.mxu0 %vm6836_vm0, %v6837_v20 }
0x1be2   : > { %v3226_v42 = vpop.f32.mrb[26].mxu0 }
0x1be3   : > { %v3227_v63 = vadd.f32 %v3226_v42, %v7133_v58  ;;  %v6268_v0 = vpop.f32.mrb[27].mxu0 }
0x1be5   : > { %v3230_v1 = vsel %vm791_vm3, %v3227_v63, -inf }
0x1be6   : > { %3231 = vmax.xlane.f32.xlu1 %v3230_v1  ;;  %v3391_v3 = vpop.f32.mrb[28].mxu0 }
0x1be7   : > { %v3392_v4 = vadd.f32 %v3391_v3, %v7165_v23  ;;  %v6278_v10 = vpop.f32.mrb[29].mxu0  ;;  %v5756_v23 = vld [vmem:[%s7890_s7 + $0x28] sm:$0xff] }
0x1be8   : > { %6285 = vmatpush3.msra.mxu0 %v5756_v23 }
0x1be9   : > { %v3395_v11 = vsel %vm791_vm3, %v3392_v4, -inf  ;;  %6294 = vmatprep.subr.mxu0 %v6837_v20 }
0x1bea   : > { %3396 = vmax.xlane.f32.xlu0 %v3395_v11 }
0x1c73   : > { %v3232_v12 = vpop.xlane.xlu1 %3231 }
0x1c74   : > { %v3233_v13 = vsub.f32 %v3227_v63, %v3232_v12 }
0x1c76   : > { %v3234_v14 = vmul.f32 1.442695, %v3233_v13 }
0x1c77   : > { %v3397_v15 = vpop.xlane.xlu0 %3396 }
0x1c78   : > { %6700 = vpow2.f32 %v3234_v14  ;;  %v3398_v17 = vsub.f32 %v3392_v4, %v3397_v15  ;;  %v5757_v4 = vld [vmem:[%s7890_s7 + $0x30] sm:$0xff] }
0x1c7a   : > { %v3399_v18 = vmul.f32 1.442695, %v3398_v17 }
0x1c7c   : > { %6702 = vpow2.f32 %v3399_v18 }
0x1c82   : > { %v6701_v58 = vpop.eup %6700 }
0x1c83   : > { %v3236_v19 = vsel %vm791_vm3, %v6701_v58, 0.0 }
0x1c84   : > { %3237 = vadd.xlane.f32.xlu0 %v3236_v19 }
0x1c86   : > { %v6703_v7 = vpop.eup %6702 }
0x1c87   : > { %v3401_v24 = vsel %vm791_vm3, %v6703_v7, 0.0 }
0x1c88   : > { %3402 = vadd.xlane.f32.xlu1 %v3401_v24 }
0x1c99   : > { %3406 = vrot.lane.b32.xlu1 %v7474_v57, %s7954_s23  ;;  %s7957_s23 = smov 40  }
0x1c9a   : > { %3241 = vrot.lane.b32.xlu0 %v7474_v57, %s7955_s0 }
0x1c9d   : > { %3630 = vrot.lane.b32.xlu1 %v7474_v57, %s7950_s20 }
0x1c9e   : > { %3628 = vrot.lane.b32.xlu0 %v7474_v57, %s7948_s27 }
0x1d11   : > { %v3238_v26 = vpop.xlane.xlu0 %3237 }
0x1d12   : > { %6704 = vrcp.f32 %v3238_v26 }
0x1d15   : > { %v3403_v55 = vpop.xlane.xlu1 %3402  ;;  %v3242_v27 = vpop.permute.xlu0 %3241 }
0x1d16   : > { %6706 = vrcp.f32 %v3403_v55  ;;  %6270 = vmatpush3.msra.mxu1 %v3242_v27 }
0x1d17   : > { %6279 = vmatprep.subr.mxu1 %v6837_v20 }
0x1d19   : > { %v3407_v32 = vpop.permute.xlu1 %3406  ;;  %v3629_v46 = vpop.permute.xlu0 %3628 }
0x1d1c   : > { %v6705_v29 = vpop.eup %6704 }
0x1d1d   : > { %v3240_v30 = vmul.f32 %v6705_v29, %v6701_v58  ;;  %v3631_v44 = vpop.permute.xlu1 %3630 }
0x1d1f   : > { %6272 = vmatmul.mubr.msk.f32.vlgmr.msra.gmra.mrb[36].mxu1 %vm791_vm3, %v3240_v30 }
0x1d20   : > { %v6707_v33 = vpop.eup %6706  ;;  %6280 = vmatpush3.msra.mxu1 %v3407_v32  ;;  %6281 = vmatprep.mubr.msk.f32.mxu1 %vm6836_vm0, %v6837_v20 }
0x1d21   : > { %v3405_v35 = vmul.f32 %v6707_v33, %v6703_v7  ;;  %6289 = vmatprep.subr.mxu1 %v6837_v20 }
0x1d23   : > { %6282 = vmatmul.mubr.msk.f32.vlgmr.msra.gmra.mrb[38].mxu1 %vm791_vm3, %v3405_v35 }
0x1d24   : > { %6291 = vmatprep.mubr.msk.f32.mxu1 %vm6836_vm0, %v6837_v20  ;;  %6290 = vmatpush3.msra.mxu1 %v5755_v37 }
0x1d25   : > { %6299 = vmatprep.subr.mxu1 %v6837_v20 }
0x1df2   : > { %v3313_v40 = vpop.f32.mrb[36].mxu1 }
0x1df3   : > { %v6273_v41 = vpop.f32.mrb[37].mxu1  ;;  %6292 = vmatmul.mubr.msk.f32.vlgmr.msra.gmra.mrb[40].mxu1 %vm791_vm3, %v3313_v40 }
0x1df4   : > { %6301 = vmatprep.mubr.msk.f32.mxu1 %vm6836_vm0, %v6837_v20 }
0x1df6   : > { %v3478_v43 = vpop.f32.mrb[38].mxu1 }
0x1df7   : > { %v6283_v45 = vpop.f32.mrb[39].mxu1  ;;  %6287 = vmatmul.mubr.msk.f32.vlgmr.msra.gmra.mrb[30].mxu0 %vm791_vm3, %v3478_v43 }
0x1df8   : > { %6295 = vmatpush3.xpose.msk.msra.mxu0 %vm791_vm3, %v3631_v44  ;;  %6296 = vmatprep.mubr.msk.f32.mxu0 %vm6836_vm0, %v6837_v20  ;;  %v5782_v44 = vld [vmem:[%s7893_s10 + $0x20] sm:$0xff]  ;;  %v5783_v45 = vld [vmem:[%s7893_s10 + $0x28] sm:$0xff] }
0x1df9   : > { %6304 = vmatprep.subr.mxu0 %v6837_v20 }
0x1dfb   : > { %6297 = vmatmul.mubr.msk.f32.vlgmr.msra.gmra.mrb[32].mxu0 %vm791_vm3, %v3629_v46  ;;  %v6544_v46 = vpack.c.bf16 %v5783_v45, %v5782_v44  ;;  %v5787_v44 = vld [vmem:[%s7894_s11 + $0x20] sm:$0xff] }
0x1dfc   : > { %6306 = vmatprep.mubr.msk.f32.mxu0 %vm6836_vm0, %v6837_v20  ;;  %6305 = vmatpush3.msra.mxu0 %v5757_v4 }
0x1dfd   : > { %6314 = vmatprep.subr.mxu0 %v6837_v20 }
0x1ec6   : > { %v3624_v47 = vpop.f32.mrb[40].mxu1 }
0x1ec7   : > { %v6293_v38 = vpop.f32.mrb[41].mxu1 }
0x1ec8   : > { %v5784_v38 = vld [vmem:[%s7893_s10 + $0x30] sm:$0xff] }
0x1eca   : > { %v3551_v48 = vpop.f32.mrb[30].mxu0 }
0x1ecb   : > { %v3625_v49 = vadd.f32 %v3624_v47, %v3551_v48  ;;  %v6288_v2 = vpop.f32.mrb[31].mxu0  ;;  %v5778_v47 = vld [vmem:[%s7892_s9 + $0x28] sm:$0xff] }
0x1ece   : > { %v3702_v50 = vpop.f32.mrb[32].mxu0 }
0x1ecf   : > { %v3703_v51 = vadd.f32 %v3702_v50, %v7179_v36  ;;  %v6298_v52 = vpop.f32.mrb[33].mxu0  ;;  %v5779_v50 = vld [vmem:[%s7892_s9 + $0x30] sm:$0xff] }
0x1ed1   : > { %v3706_v54 = vsel %vm791_vm3, %v3703_v51, -inf }
0x1ed2   : > { %3707 = vmax.xlane.f32.xlu1 %v3706_v54 }
0x1ee3   : > { %3869 = vrot.lane.b32.xlu1 %v7474_v57, %s7952_s22 }
0x1ee7   : > { %3867 = vrot.lane.b32.xlu1 %v7474_v57, %s7951_s18 }
0x1f5f   : > { %v3708_v56 = vpop.xlane.xlu1 %3707 }
0x1f60   : > { %v3709_v59 = vsub.f32 %v3703_v51, %v3708_v56  ;;  %v5780_v51 = vld [vmem:[%s7892_s9 + $0x38] sm:$0xff] }
0x1f61   : > { %v6541_v52 = vpack.c.bf16 %v5780_v51, %v5779_v50 }
0x1f62   : > { %v3710_v60 = vmul.f32 1.442695, %v3709_v59 }
0x1f63   : > { %v3870_v0 = vpop.permute.xlu1 %3869 }
0x1f64   : > { %6708 = vpow2.f32 %v3710_v60 }
0x1f67   : > { %v3868_v3 = vpop.permute.xlu1 %3867 }
0x1f6e   : > { %v6709_v61 = vpop.eup %6708 }
0x1f6f   : > { %v3712_v62 = vsel %vm791_vm3, %v6709_v61, 0.0 }
0x1f70   : > { %3713 = vadd.xlane.f32.xlu0 %v3712_v62 }
0x1f86   : > { %3717 = vrot.lane.b32.xlu0 %v7474_v57, %s7956_s21 }
0x1ffd   : > { %v3714_v36 = vpop.xlane.xlu0 %3713 }
0x1ffe   : > { %6710 = vrcp.f32 %v3714_v36 }
0x2001   : > { %v3718_v42 = vpop.permute.xlu0 %3717 }
0x2002   : > { %6300 = vmatpush3.msra.mxu1 %v3718_v42 }
0x2003   : > { %6309 = vmatprep.subr.mxu1 %v6837_v20 }
0x2008   : > { %v6711_v63 = vpop.eup %6710 }
0x2009   : > { %v3716_v1 = vmul.f32 %v6711_v63, %v6709_v61  ;;  %v5776_v61 = vld [vmem:[%s7891_s8 + $0x1] ss:$0 sm:$0xff] }
0x200b   : > { %6302 = vmatmul.mubr.msk.f32.vlgmr.msra.gmra.mrb[42].mxu1 %vm791_vm3, %v3716_v1 }
0x200c   : > { %6310 = vmatpush3.xpose.msk.msra.mxu1 %vm791_vm3, %v3870_v0  ;;  %6311 = vmatprep.mubr.msk.f32.mxu1 %vm6836_vm0, %v6837_v20 }
0x200d   : > { %6319 = vmatprep.subr.mxu1 %v6837_v20 }
0x200f   : > { %6312 = vmatmul.mubr.msk.f32.vlgmr.msra.gmra.mrb[44].mxu1 %vm791_vm3, %v3868_v3 }
0x2010   : > { %6321 = vmatprep.mubr.msk.f32.mxu1 %vm6836_vm0, %v6837_v20 }
0x20de   : > { %v3789_v10 = vpop.f32.mrb[42].mxu1 }
0x20df   : > { %v6303_v11 = vpop.f32.mrb[43].mxu1  ;;  %6307 = vmatmul.mubr.msk.f32.vlgmr.msra.gmra.mrb[34].mxu0 %vm791_vm3, %v3789_v10 }
0x20e0   : > { %6316 = vmatprep.mubr.msk.f32.mxu0 %vm6836_vm0, %v6837_v20 }
0x20e2   : > { %v3941_v12 = vpop.f32.mrb[44].mxu1 }
0x20e3   : > { %v3942_v13 = vadd.f32 %v3941_v12, %v7223_v8  ;;  %v6313_v14 = vpop.f32.mrb[45].mxu1  ;;  %v5758_v8 = vld [vmem:[%s7890_s7 + $0x38] sm:$0xff] }
0x20e4   : > { %6320 = vmatpush3.msra.mxu1 %v5758_v8 }
0x20e5   : > { %v3945_v15 = vsel %vm791_vm3, %v3942_v13, -inf  ;;  %6543 = vmatprep.subr.bf16.mxu1 %v6835_v5 }
0x20e6   : > { %3946 = vmax.xlane.f32.xlu0 %v3945_v15 }
0x20fc   : > { %3956 = vrot.lane.b32.xlu0 %v7474_v57, %s7957_s23 }
0x2173   : > { %v3947_v17 = vpop.xlane.xlu0 %3946 }
0x2174   : > { %v3948_v18 = vsub.f32 %v3942_v13, %v3947_v17 }
0x2176   : > { %v3949_v58 = vmul.f32 1.442695, %v3948_v18 }
0x2177   : > { %v3957_v19 = vpop.permute.xlu0 %3956 }
0x2178   : > { %6712 = vpow2.f32 %v3949_v58  ;;  %6315 = vmatpush3.msra.mxu0 %v3957_v19 }
0x2179   : > { %6537 = vmatprep.subr.bf16.mxu0 %v6835_v5 }
0x2182   : > { %v6713_v7 = vpop.eup %6712 }
0x2183   : > { %v3951_v24 = vsel %vm791_vm3, %v6713_v7, 0.0 }
0x2184   : > { %3952 = vadd.xlane.f32.xlu1 %v3951_v24 }
0x21b2   : > { %v3862_v57 = vpop.f32.mrb[34].mxu0 }
0x21b3   : > { %v3866_v23 = vadd.f32 %v3862_v57, %v3625_v49  ;;  %v6308_v26 = vpop.f32.mrb[35].mxu0  ;;  %v5785_v49 = vld [vmem:[%s7893_s10 + $0x38] sm:$0xff] }
0x21b4   : > { %v6547_v2 = vpack.c.bf16 %v5785_v49, %v5784_v38 }
0x2211   : > { %v3953_v55 = vpop.xlane.xlu1 %3952 }
0x2212   : > { %6714 = vrcp.f32 %v3953_v55 }
0x221c   : > { %v6715_v27 = vpop.eup %6714 }
0x221d   : > { %v3955_v29 = vmul.f32 %v6715_v27, %v6713_v7 }
0x221f   : > { %6317 = vmatmul.mubr.msk.f32.vlgmr.msra.gmra.mrb[36].mxu0 %vm791_vm3, %v3955_v29 }
0x2220   : > { %6332 = vmatprep.mubr.msk.f32.mxu0 %vm6836_vm0, %v6837_v20 }
0x22f2   : > { %v4028_v30 = vpop.f32.mrb[36].mxu0 }
0x22f3   : > { %v6318_v32 = vpop.f32.mrb[37].mxu0  ;;  %6322 = vmatmul.mubr.msk.f32.vlgmr.msra.gmra.mrb[46].mxu1 %vm791_vm3, %v4028_v30 }
0x22f4   : > { %6343 = vmatprep.mubr.msk.f32.mxu1 %vm6836_vm0, %v6837_v20  ;;  %6545 = vmatpush3.bf16.msra.mxu1 %v6544_v46 }
0x22f5   : > { %6546 = vmatprep.subr.bf16.mxu1 %v6835_v5 }
0x22f8   : > { %6548 = vmatpush3.bf16.msra.mxu1 %v6547_v2 }
0x22f9   : > { %6351 = vmatprep.subr.mxu1 %v6837_v20 }
0x22fb   : > { %6344 = vmatmul.mubr.msk.f32.vlgmr.msra.gmra.mrb[48].mxu1 %vm691_vm2, %v7271_v53 }
0x22fc   : > { %6353 = vmatprep.mubr.msk.f32.mxu1 %vm6836_vm0, %v6837_v20 }
0x23c6   : > { %v4101_v33 = vpop.f32.mrb[46].mxu1 }
0x23c7   : > { %v4105_v35 = vadd.f32 %v4101_v33, %v3866_v23  ;;  %v6323_v37 = vpop.f32.mrb[47].mxu1  ;;  %v5788_v33 = vld [vmem:[%s7894_s11 + $0x28] sm:$0xff] }
0x23c9   : > { %v7576_v40 = vadd.f32 %v4105_v35, %v7448_v39  ;;  %v5777_v39 = vld [vmem:[%s7892_s9 + $0x20] sm:$0xff] }
0x23ca   : > { %v6538_v48 = vpack.c.bf16 %v5778_v47, %v5777_v39 }
0x23cb   : > { %v4109_v41 = vmul.f32 %v7576_v40, %v7576_v40 }
0x23cc   : > { %6539 = vmatpush3.bf16.msra.mxu0 %v6538_v48 }
0x23cd   : > { %v4110_v43 = vsel %vm691_vm2, %v4109_v41, 0.0  ;;  %6540 = vmatprep.subr.bf16.mxu0 %v6835_v5 }
0x23ce   : > { %4111 = vadd.xlane.f32.xlu1 %v4110_v43  ;;  %v7620_v53 = vpop.f32.mrb[48].mxu1 }
0x23cf   : > { %v6345_v42 = vpop.f32.mrb[49].mxu1 }
0x23d0   : > { %6542 = vmatpush3.bf16.msra.mxu0 %v6541_v52 }
0x23d1   : > { %6346 = vmatprep.subr.mxu0 %v6837_v20 }
0x23df   : > { %4447 = vrot.lane.b32.xlu1 %v7620_v53, %s7953_s24 }
0x245b   : > { %v4112_v54 = vpop.xlane.xlu1 %4111 }
0x245c   : > { %v4113_v56 = vmul.f32 0.03125, %v4112_v54 }
0x245e   : > { %v4114_v59 = vadd.f32 1e-06, %v4113_v56 }
0x245f   : > { %v4448_v63 = vpop.permute.xlu1 %4447 }
0x2460   : > { %6716 = vrsqrt.f32 %v4114_v59 }
0x246a   : > { %v6717_v60 = vpop.eup %6716 }
0x246b   : > { %v4116_v62 = vmul.f32 %v6717_v60, %v7576_v40 }
0x246d   : > { %v4123_v36 = vmul.f32 %v5776_v61, %v4116_v62 }
0x246f   : > { %6333 = vmatmul.mubr.msk.f32.vlgmr.msra.gmra.mrb[38].mxu0 %vm691_vm2, %v4123_v36 }
0x2470   : > { %6348 = vmatprep.mubr.msk.f32.mxu0 %vm6836_vm0, %v6837_v20  ;;  %6347 = vmatpush3.xpose.msk.msra.mxu0 %vm791_vm3, %v7620_v53 }
0x2471   : > { %6356 = vmatprep.subr.mxu0 %v6837_v20 }
0x2542   : > { %v7627_v0 = vpop.f32.mrb[38].mxu0 }
0x2543   : > { %4445 = vrot.lane.b32.xlu0 %v7627_v0, %s7953_s24  ;;  %v6334_v1 = vpop.f32.mrb[39].mxu0  ;;  %6349 = vmatmul.mubr.msk.f32.vlgmr.msra.gmra.mrb[40].mxu0 %vm791_vm3, %v7627_v0 }
0x2544   : > { %6357 = vmatpush3.xpose.msk.msra.mxu0 %vm791_vm3, %v4448_v63  ;;  %6358 = vmatprep.mubr.msk.f32.mxu0 %vm6836_vm0, %v6837_v20 }
0x2545   : > { %6366 = vmatprep.subr.mxu0 %v6837_v20 }
0x25b5   : > { %v4446_v3 = vpop.permute.xlu0 %4445 }
0x25b6   : > { %6359 = vmatmul.mubr.msk.f32.vlgmr.msra.gmra.mrb[42].mxu0 %vm791_vm3, %v4446_v3 }
0x25b7   : > { %6368 = vmatprep.mubr.msk.f32.mxu0 %vm6836_vm0, %v6837_v20  ;;  %6367 = vmatpush3.msra.mxu0 %v5788_v33 }
0x25b8   : > { %6376 = vmatprep.subr.mxu0 %v6837_v20 }
0x2616   : > { %v4354_v4 = vpop.f32.mrb[40].mxu0 }
0x2617   : > { %v4355_v10 = vadd.f32 %v4354_v4, %v7044_v21  ;;  %v6350_v11 = vpop.f32.mrb[41].mxu0 }
0x2619   : > { %v4358_v12 = vsel %vm791_vm3, %v4355_v10, -inf }
0x261a   : > { %4359 = vmax.xlane.f32.xlu0 %v4358_v12  ;;  %v5789_v12 = vld [vmem:[%s7894_s11 + $0x30] sm:$0xff] }
0x2689   : > { %v4519_v13 = vpop.f32.mrb[42].mxu0 }
0x268a   : > { %v4520_v14 = vadd.f32 %v4519_v13, %v7044_v21  ;;  %v6360_v15 = vpop.f32.mrb[43].mxu0 }
0x268c   : > { %v4523_v17 = vsel %vm791_vm3, %v4520_v14, -inf }
0x268d   : > { %4524 = vmax.xlane.f32.xlu1 %v4523_v17 }
0x269e   : > { %4369 = vrot.lane.b32.xlu1 %v7620_v53, %s7947_s17  ;;  %s7797_s17 = sand.u32 1, %s6824_s25  }
0x269f   : > { %s5555_s30 = scalar_lea.sflag [#allocation3], %s7797_s17 }
0x26a2   : > { %4758 = vrot.lane.b32.xlu1 %v7620_v53, %s7948_s27 }
0x26a6   : > { %4756 = vrot.lane.b32.xlu1 %v7627_v0, %s7948_s27  ;;  %s5702_s27 = sshll.u32 %s7797_s17, 3 }
0x26a7   : > { %v4360_v18 = vpop.xlane.xlu0 %4359 }
0x26a8   : > { %v4361_v58 = vsub.f32 %v4355_v10, %v4360_v18 }
0x26aa   : > { %v4362_v19 = vmul.f32 1.442695, %v4361_v58 }
0x26ac   : > { %6718 = vpow2.f32 %v4362_v19 }
0x26b6   : > { %v6719_v7 = vpop.eup %6718 }
0x26b7   : > { %v4364_v24 = vsel %vm791_vm3, %v6719_v7, 0.0 }
0x26b8   : > { %4365 = vadd.xlane.f32.xlu0 %v4364_v24 }
0x271a   : > { %v4525_v8 = vpop.xlane.xlu1 %4524 }
0x271b   : > { %v4526_v57 = vsub.f32 %v4520_v14, %v4525_v8 }
0x271d   : > { %v4527_v23 = vmul.f32 1.442695, %v4526_v57 }
0x271e   : > { %v4370_v26 = vpop.permute.xlu1 %4369 }
0x271f   : > { %6720 = vpow2.f32 %v4527_v23  ;;  %6352 = vmatpush3.msra.mxu1 %v4370_v26  ;;  %v5790_v23 = vld [vmem:[%s7894_s11 + $0x38] sm:$0xff] }
0x2720   : > { %6361 = vmatprep.subr.mxu1 %v6837_v20 }
0x2722   : > { %v4759_v39 = vpop.permute.xlu1 %4758 }
0x2726   : > { %v4757_v48 = vpop.permute.xlu1 %4756 }
0x2729   : > { %v6721_v55 = vpop.eup %6720 }
0x272a   : > { %v4529_v27 = vsel %vm791_vm3, %v6721_v55, 0.0 }
0x272b   : > { %4530 = vadd.xlane.f32.xlu0 %v4529_v27 }
0x2741   : > { %4534 = vrot.lane.b32.xlu0 %v7620_v53, %s7949_s29 }
0x2745   : > { %v4366_v29 = vpop.xlane.xlu0 %4365 }
0x2746   : > { %6722 = vrcp.f32 %v4366_v29 }
0x2750   : > { %v6723_v30 = vpop.eup %6722 }
0x2751   : > { %v4368_v32 = vmul.f32 %v6723_v30, %v6719_v7 }
0x2753   : > { %6354 = vmatmul.mubr.msk.f32.vlgmr.msra.gmra.mrb[50].mxu1 %vm791_vm3, %v4368_v32 }
0x2754   : > { %6363 = vmatprep.mubr.msk.f32.mxu1 %vm6836_vm0, %v6837_v20 }
0x27b8   : > { %v4531_v35 = vpop.xlane.xlu0 %4530 }
0x27b9   : > { %6724 = vrcp.f32 %v4531_v35 }
0x27bc   : > { %v4535_v37 = vpop.permute.xlu0 %4534 }
0x27bd   : > { %6362 = vmatpush3.msra.mxu1 %v4535_v37 }
0x27be   : > { %6371 = vmatprep.subr.mxu1 %v6837_v20 }
0x27c3   : > { %v6725_v41 = vpop.eup %6724 }
0x27c4   : > { %v4533_v43 = vmul.f32 %v6725_v41, %v6721_v55 }
0x27c6   : > { %6364 = vmatmul.mubr.msk.f32.vlgmr.msra.gmra.mrb[52].mxu1 %vm791_vm3, %v4533_v43 }
0x27c7   : > { %6372 = vmatpush3.msra.mxu1 %v5787_v44  ;;  %6373 = vmatprep.mubr.msk.f32.mxu1 %vm6836_vm0, %v6837_v20 }
0x27c8   : > { %6381 = vmatprep.subr.mxu1 %v6837_v20 }
0x2826   : > { %v4441_v45 = vpop.f32.mrb[50].mxu1 }
0x2827   : > { %v6355_v46 = vpop.f32.mrb[51].mxu1  ;;  %6374 = vmatmul.mubr.msk.f32.vlgmr.msra.gmra.mrb[54].mxu1 %vm791_vm3, %v4441_v45 }
0x2828   : > { %6383 = vmatprep.mubr.msk.f32.mxu1 %vm6836_vm0, %v6837_v20  ;;  %v5809_v46 = vld [vmem:[%s7896_s13 + $0x20] sm:$0xff] }
0x2899   : > { %v4606_v47 = vpop.f32.mrb[52].mxu1 }
0x289a   : > { %v6365_v38 = vpop.f32.mrb[53].mxu1  ;;  %6369 = vmatmul.mubr.msk.f32.vlgmr.msra.gmra.mrb[44].mxu0 %vm791_vm3, %v4606_v47 }
0x289b   : > { %6377 = vmatpush3.xpose.msk.msra.mxu0 %vm791_vm3, %v4759_v39  ;;  %6378 = vmatprep.mubr.msk.f32.mxu0 %vm6836_vm0, %v6837_v20  ;;  %v5810_v39 = vld [vmem:[%s7896_s13 + $0x28] sm:$0xff]  ;;  %v5812_v38 = vld [vmem:[%s7896_s13 + $0x38] sm:$0xff] }
0x289c   : > { %6386 = vmatprep.subr.mxu0 %v6837_v20  ;;  %v6550_v47 = vpack.c.bf16 %v5810_v39, %v5809_v46 }
0x289e   : > { %6379 = vmatmul.mubr.msk.f32.vlgmr.msra.gmra.mrb[46].mxu0 %vm791_vm3, %v4757_v48 }
0x289f   : > { %6388 = vmatprep.mubr.msk.f32.mxu0 %vm6836_vm0, %v6837_v20  ;;  %6387 = vmatpush3.msra.mxu0 %v5789_v12 }
0x28a0   : > { %6396 = vmatprep.subr.mxu0 %v6837_v20 }
0x28fa   : > { %v4752_v49 = vpop.f32.mrb[54].mxu1 }
0x28fb   : > { %v6375_v2 = vpop.f32.mrb[55].mxu1 }
0x28fc   : > { %v5815_v2 = vld [vmem:[%s7897_s14 + $0x48] sm:$0xff] }
0x296d   : > { %v4679_v50 = vpop.f32.mrb[44].mxu0 }
0x296e   : > { %v4753_v51 = vadd.f32 %v4752_v49, %v4679_v50  ;;  %v6370_v52 = vpop.f32.mrb[45].mxu0  ;;  %v5814_v49 = vld [vmem:[%s7897_s14 + $0x40] sm:$0xff]  ;;  %v5816_v50 = vld [vmem:[%s7897_s14 + $0x50] sm:$0xff] }
0x296f   : > { %v5817_v52 = vld [vmem:[%s7897_s14 + $0x58] sm:$0xff] }
0x2971   : > { %v4830_v54 = vpop.f32.mrb[46].mxu0 }
0x2972   : > { %v4831_v56 = vadd.f32 %v4830_v54, %v7044_v21  ;;  %v6380_v59 = vpop.f32.mrb[47].mxu0  ;;  %v6559_v54 = vpack.c.bf16 %v5817_v52, %v5816_v50 }
0x2973   : > { %v5819_v59 = vld [vmem:[%s7897_s14 + $0x68] sm:$0xff] }
0x2974   : > { %v4834_v60 = vsel %vm791_vm3, %v4831_v56, -inf }
0x2975   : > { %4835 = vmax.xlane.f32.xlu0 %v4834_v60 }
0x298b   : > { %4845 = vrot.lane.b32.xlu0 %v7620_v53, %s7950_s20  ;;  %s567_s20 = scalar_lea.vmem [#allocation2], %s5702_s27 }
0x298c   : > { %s5573_s3 = sshll.u32 %s567_s20, 4  ;;  %s5574_s3 = int_to_ptr.vmem [resolvable:$true] %s5573_s3 }
0x298d   : > { %s6738_s21 = scalar_lea.vmem %s5574_s3, 128  ;;  %p6745_p0 = scmp.lt.s32.totalorder %s5574_s3, %s6743_s26 }
0x298e   : > { %p6739_p11 = scmp.ne.s32.totalorder %s5574_s3, %s6738_s21  ;;  %p6746_p1 = scmp.lt.s32.totalorder %s6744_s4, %s6738_s21 }
0x298f   : > { %4995 = vrot.lane.b32.xlu0 %v7627_v0, %s7951_s18 }
0x2990   : > { %p6740_p12 = pnand %p6739_p11, %p6980_p5  ;;  %p6747_p2 = por %p6746_p1, %p6745_p0 }
0x2992   : > { %p6741_p13 = pneg %p6740_p12 }
0x2994   : > { %p6748_p3 = pnand %p6747_p2, %p6741_p13 }
0x2a02   : > { %v4836_v61 = vpop.xlane.xlu0 %4835 }
0x2a03   : > { %v4837_v62 = vsub.f32 %v4831_v56, %v4836_v61  ;;  %v5818_v56 = vld [vmem:[%s7897_s14 + $0x60] sm:$0xff] }
0x2a04   : > { %v6562_v60 = vpack.c.bf16 %v5819_v59, %v5818_v56 }
0x2a05   : > { %v4838_v36 = vmul.f32 1.442695, %v4837_v62 }
0x2a06   : > { %v4846_v42 = vpop.permute.xlu0 %4845 }
0x2a07   : > { %6726 = vpow2.f32 %v4838_v36  ;;  %6382 = vmatpush3.msra.mxu1 %v4846_v42 }
0x2a08   : > { %6391 = vmatprep.subr.mxu1 %v6837_v20 }
0x2a0a   : > { %v4996_v11 = vpop.permute.xlu0 %4995 }
0x2a11   : > { %v6727_v63 = vpop.eup %6726 }
0x2a12   : > { %v4840_v1 = vsel %vm791_vm3, %v6727_v63, 0.0 }
0x2a13   : > { %4841 = vadd.xlane.f32.xlu1 %v4840_v1 }
0x2a24   : > { %4997 = vrot.lane.b32.xlu1 %v7620_v53, %s7951_s18  ;;  %s5843_s18 = sshll.u32 %s6963_s28, 7 }
0x2aa0   : > { %v4842_v3 = vpop.xlane.xlu1 %4841 }
0x2aa1   : > { %6728 = vrcp.f32 %v4842_v3 }
0x2aa4   : > { %v4998_v0 = vpop.permute.xlu1 %4997 }
0x2aab   : > { %v6729_v4 = vpop.eup %6728 }
0x2aac   : > { %v4844_v10 = vmul.f32 %v6729_v4, %v6727_v63  ;;  %v5808_v63 = vld [vmem:[%s7895_s12 + $0x1] ss:$0 sm:$0xff]  ;;  %v5820_v4 = vld [vmem:[%s7897_s14 + $0x70] sm:$0xff] }
0x2aae   : > { %6384 = vmatmul.mubr.msk.f32.vlgmr.msra.gmra.mrb[56].mxu1 %vm791_vm3, %v4844_v10  ;;  %v5821_v10 = vld [vmem:[%s7897_s14 + $0x78] sm:$0xff] }
0x2aaf   : > { %6392 = vmatpush3.xpose.msk.msra.mxu1 %vm791_vm3, %v4998_v0  ;;  %6393 = vmatprep.mubr.msk.f32.mxu1 %vm6836_vm0, %v6837_v20  ;;  %v6565_v0 = vpack.c.bf16 %v5821_v10, %v5820_v4 }
0x2ab0   : > { %6401 = vmatprep.subr.mxu1 %v6837_v20 }
0x2ab2   : > { %6394 = vmatmul.mubr.msk.f32.vlgmr.msra.gmra.mrb[58].mxu1 %vm791_vm3, %v4996_v11 }
0x2ab3   : > { %6403 = vmatprep.mubr.msk.f32.mxu1 %vm6836_vm0, %v6837_v20  ;;  %6402 = vmatpush3.msra.mxu1 %v5790_v23 }
0x2ab4   : > { %6555 = vmatprep.subr.bf16.mxu1 %v6835_v5 }
0x2b81   : > { %v4917_v13 = vpop.f32.mrb[56].mxu1 }
0x2b82   : > { %v6385_v14 = vpop.f32.mrb[57].mxu1  ;;  %6389 = vmatmul.mubr.msk.f32.vlgmr.msra.gmra.mrb[48].mxu0 %vm791_vm3, %v4917_v13 }
0x2b83   : > { %6398 = vmatprep.mubr.msk.f32.mxu0 %vm6836_vm0, %v6837_v20 }
0x2b85   : > { %v5069_v15 = vpop.f32.mrb[58].mxu1 }
0x2b86   : > { %v5070_v17 = vadd.f32 %v5069_v15, %v7044_v21  ;;  %v6395_v18 = vpop.f32.mrb[59].mxu1 }
0x2b88   : > { %v5073_v58 = vsel %vm791_vm3, %v5070_v17, -inf }
0x2b89   : > { %5074 = vmax.xlane.f32.xlu1 %v5073_v58 }
0x2c16   : > { %v5075_v19 = vpop.xlane.xlu1 %5074 }
0x2c17   : > { %v5076_v7 = vsub.f32 %v5070_v17, %v5075_v19 }
0x2c19   : > { %v5077_v24 = vmul.f32 1.442695, %v5076_v7 }
0x2c1b   : > { %6730 = vpow2.f32 %v5077_v24 }
0x2c25   : > { %v6731_v8 = vpop.eup %6730 }
0x2c26   : > { %v5079_v57 = vsel %vm791_vm3, %v6731_v8, 0.0 }
0x2c27   : > { %5080 = vadd.xlane.f32.xlu0 %v5079_v57 }
0x2c3d   : > { %5084 = vrot.lane.b32.xlu0 %v7620_v53, %s7952_s22  ;;  %s7958_s22 = sld [smem:[#allocation19_spill]] }
0x2c43   : > { %s7813_s2 = scalar_lea.hbm %s7958_s22, %s5843_s18 }
0x2c55   : > { %v4990_v21 = vpop.f32.mrb[48].mxu0 }
0x2c56   : > { %v4994_v26 = vadd.f32 %v4990_v21, %v4753_v51  ;;  %v6390_v55 = vpop.f32.mrb[49].mxu0  ;;  %v6556_v51 = vpack.c.bf16 %v5815_v2, %v5814_v49 }
0x2cb4   : > { %v5081_v27 = vpop.xlane.xlu0 %5080 }
0x2cb5   : > { %6732 = vrcp.f32 %v5081_v27 }
0x2cb8   : > { %v5085_v29 = vpop.permute.xlu0 %5084 }
0x2cb9   : > { %6397 = vmatpush3.msra.mxu0 %v5085_v29 }
0x2cba   : > { %6549 = vmatprep.subr.bf16.mxu0 %v6835_v5 }
0x2cbf   : > { %v6733_v30 = vpop.eup %6732 }
0x2cc0   : > { %v5083_v32 = vmul.f32 %v6733_v30, %v6731_v8 }
0x2cc2   : > { %6399 = vmatmul.mubr.msk.f32.vlgmr.msra.gmra.mrb[50].mxu0 %vm791_vm3, %v5083_v32 }
0x2cc3   : > { %6414 = vmatprep.mubr.msk.f32.mxu0 %vm6836_vm0, %v6837_v20  ;;  %6551 = vmatpush3.bf16.msra.mxu0 %v6550_v47 }
0x2cc4   : > { %6552 = vmatprep.subr.bf16.mxu0 %v6835_v5 }
0x2d95   : > { %v5156_v53 = vpop.f32.mrb[50].mxu0 }
0x2d96   : > { %v6400_v33 = vpop.f32.mrb[51].mxu0  ;;  %6404 = vmatmul.mubr.msk.f32.vlgmr.msra.gmra.mrb[60].mxu1 %vm791_vm3, %v5156_v53 }
0x2d97   : > { %6433 = vmatprep.mubr.msk.f32.mxu1 %vm6836_vm0, %v6837_v20  ;;  %6557 = vmatpush3.bf16.msra.mxu1 %v6556_v51 }
0x2d98   : > { %6558 = vmatprep.subr.bf16.mxu1 %v6835_v5 }
0x2d9b   : > { %6560 = vmatpush3.bf16.msra.mxu1 %v6559_v54 }
0x2d9c   : > { %6561 = vmatprep.subr.bf16.mxu1 %v6835_v5 }
0x2d9f   : > { %6563 = vmatpush3.bf16.msra.mxu1 %v6562_v60 }
0x2da0   : > { %6564 = vmatprep.subr.bf16.mxu1 %v6835_v5 }
0x2da3   : > { %6566 = vmatpush3.bf16.msra.mxu1 %v6565_v0 }
0x2e69   : > { %v5229_v35 = vpop.f32.mrb[60].mxu1 }
0x2e6a   : > { %v5233_v37 = vadd.f32 %v5229_v35, %v4994_v26  ;;  %v6405_v41 = vpop.f32.mrb[61].mxu1 }
0x2e6c   : > { %v7723_v43 = vadd.f32 %v5233_v37, %v7576_v40  ;;  %v5811_v40 = vld [vmem:[%s7896_s13 + $0x30] sm:$0xff] }
0x2e6d   : > { %v6553_v48 = vpack.c.bf16 %v5812_v38, %v5811_v40 }
0x2e6e   : > { %v5237_v44 = vmul.f32 %v7723_v43, %v7723_v43 }
0x2e6f   : > { %6554 = vmatpush3.bf16.msra.mxu0 %v6553_v48 }
0x2e70   : > { %v5238_v45 = vsel %vm691_vm2, %v5237_v44, 0.0  ;;  %6567 = vmatprep.subr.bf16.mxu0 %v6835_v5 }
0x2e71   : > { %5239 = vadd.xlane.f32.xlu1 %v5238_v45 }
0x2efe   : > { %v5240_v61 = vpop.xlane.xlu1 %5239 }
0x2eff   : > { %v5241_v62 = vmul.f32 0.03125, %v5240_v61 }
0x2f01   : > { %v5242_v36 = vadd.f32 1e-06, %v5241_v62 }
0x2f03   : > { %6734 = vrsqrt.f32 %v5242_v36 }
0x2f0d   : > { %v6735_v42 = vpop.eup %6734 }
0x2f0e   : > { %v5244_v1 = vmul.f32 %v6735_v42, %v7723_v43 }
0x2f10   : > { %v5251_v3 = vmul.f32 %v5808_v63, %v5244_v1 }
0x2f12   : > { %6415 = vmatmul.mubr.msk.f32.vlgmr.msra.gmra.mrb[52].mxu0 %vm691_vm2, %v5251_v3 }
0x2f13   : > { %6468 = vmatprep.mubr.msk.f32.mxu0 %vm6836_vm0, %v6837_v20  ;;  %6570 = vmatpush3.bf16.xpose.msk.msra.mxu0 %vm6569_vm5, %v7001_v6 }
0x2f14   : > { %6571 = vmatprep.subr.bf16.mxu0 %v6835_v5 }
0x2f1b   : > { %6574 = vmatpush3.bf16.xpose.msk.msra.mxu0 %vm6569_vm5, %v7010_v9 }
0x2f1c   : > { %6575 = vmatprep.subr.bf16.mxu0 %v6835_v5 }
0x2f23   : > { %6578 = vmatpush3.bf16.xpose.msk.msra.mxu0 %vm6569_vm5, %v7030_v16 }
0x2f24   : > { %6579 = vmatprep.subr.bf16.mxu0 %v6835_v5 }
0x2f2b   : > { %6582 = vmatpush3.bf16.xpose.msk.msra.mxu0 %vm6569_vm5, %v7047_v22 }
0x2f2c   : > { %6583 = vmatprep.subr.bf16.mxu0 %v6835_v5 }
0x2f33   : > { %6586 = vmatpush3.bf16.xpose.msk.msra.mxu0 %vm6569_vm5, %v7057_v25 }
0x2f34   : > { %6587 = vmatprep.subr.bf16.mxu0 %v6835_v5 }
0x2f3b   : > { %6590 = vmatpush3.bf16.xpose.msk.msra.mxu0 %vm6569_vm5, %v7067_v28 }
0x2f3c   : > { %6591 = vmatprep.subr.bf16.mxu0 %v6835_v5 }
0x2f43   : > { %6594 = vmatpush3.bf16.xpose.msk.msra.mxu0 %vm6569_vm5, %v7077_v31  ;;  %v5823_v31 = vld [vmem:[%s7898_s15] ss:$0 sm:$0xff] }
0x2f44   : > { %6595 = vmatprep.subr.bf16.mxu0 %v6835_v5 }
0x2f4b   : > { %6598 = vmatpush3.bf16.xpose.msk.msra.mxu0 %vm6569_vm5, %v7087_v34 }
0x2fe5   : > { %v5326_v11 = vpop.f32.mrb[52].mxu0 }
0x2fe6   : > { %v5330_v12 = vmax.f32 %v5326_v11, 0.0  ;;  %v6416_v13 = vpop.f32.mrb[53].mxu0 }
0x2fe8   : > { %6434 = vmatmul.mubr.msk.f32.vlgmr.msra.gmra.mrb[62].mxu1 %vm2978_vm4, %v5330_v12 }
0x30bb   : > { %v5409_v6 = vpop.f32.mrb[62].mxu1 }
0x30bc   : > { %v5413_v9 = vadd.f32 %v5409_v6, %v7723_v43  ;;  %v6435_v16 = vpop.f32.mrb[63].mxu1 }
0x30be   : > { %v5415_v20 = vmul.f32 %v5413_v9, %v5413_v9 }
0x30c0   : > { %v5416_v22 = vsel %vm691_vm2, %v5415_v20, 0.0 }
0x30c1   : > { %5417 = vadd.xlane.f32.xlu1 %v5416_v22 }
0x314e   : > { %v5418_v25 = vpop.xlane.xlu1 %5417 }
0x314f   : > { %v5419_v28 = vmul.f32 0.03125, %v5418_v25 }
0x3151   : > { %v5420_v14 = vadd.f32 1e-06, %v5419_v28 }
0x3153   : > { %6736 = vrsqrt.f32 %v5420_v14 }
0x315d   : > { %v6737_v5 = vpop.eup %6736 }
0x315e   : > { %v5422_v34 = vmul.f32 %v6737_v5, %v5413_v9 }
0x3160   : > { %v5429_v15 = vmul.f32 %v5823_v31, %v5422_v34 }
0x3162   : > { %v5431_v17 = vmul.f32 0.17677669, %v5429_v15  ;;  %5430 = vst.msk [vmem:[%s567_s20] sm:$0xff] %vm691_vm2, %v5429_v15 }
0x3164   : > { %6469 = vmatmul.mubr.msk.f32.vlgmr.msra.gmra.mrb[54].mxu0 %vm691_vm2, %v5431_v17 }
0x3165   : > { %6751 = shalt.err (!%p6748_p3)
}
0x3166   : > { %s6752_s23 = scalar_lea.hbm %s7813_s2, 128  ;;  %s6756_s20 = scalar_lea.hbm %s7958_s22, 256 }
0x3167   : > { %p6753_p4 = scmp.ne.s32.totalorder %s7813_s2, %s6752_s23  ;;  %p6757_p9 = scmp.lt.u32.totalorder %s7813_s2, %s7958_s22 }
0x3168   : > { %p6758_p10 = scmp.lt.u32.totalorder %s6756_s20, %s6752_s23  ;;  %p6760_p12 = scmp.lt.u32.totalorder %s6752_s23, %s7813_s2 }
0x3169   : > { %p6754_p7 = pnand %p6753_p4, %p6980_p5 }
0x316a   : > { %p6759_p11 = por %p6758_p10, %p6757_p9 }
0x316b   : > { %p6755_p8 = pneg %p6754_p7 }
0x316c   : > { %p6761_p13 = por %p6760_p12, %p6759_p11 }
0x316e   : > { %p6762_p0 = pnand %p6761_p13, %p6755_p8 }
0x3170   : > { %6765 = shalt.err (!%p6762_p0)
}
0x3171   : > { %6599 = dma.vmem_to_hbm [thread:$0]  (%p6980_p5), %s5574_s3, 128, %s7813_s2, %s5555_s30  }
0x3172   : > { %s574_s21 = scalar_lea.vmem [#allocation4], %s5702_s27  ;;  %s7959_s23 = sld [smem:[#allocation20_spill]] }
0x3173   : > { %s5586_s19 = sshll.u32 %s574_s21, 4  ;;  %s5560_s24 = scalar_lea.sflag [#allocation5], %s7797_s17  ;;  %s7835_s19 = int_to_ptr.vmem [resolvable:$true] %s5586_s19 }
0x3174   : > { %s6766_s20 = scalar_lea.vmem %s7835_s19, 128  ;;  %s6851_s27 = smov [#allocation4]  }
0x3175   : > { %p6767_p1 = scmp.ne.s32.totalorder %s7835_s19, %s6766_s20  ;;  %s6770_s2 = sshll.u32 %s6851_s27, 4  ;;  %s6771_s2 = int_to_ptr.vmem [resolvable:$false] %s6770_s2 }
0x3176   : > { %s6772_s28 = scalar_lea.vmem %s6771_s2, 256  ;;  %p6773_p4 = scmp.lt.s32.totalorder %s7835_s19, %s6771_s2 }
0x3177   : > { %p6768_p2 = pnand %p6767_p1, %p6980_p5  ;;  %p6774_p7 = scmp.lt.s32.totalorder %s6772_s28, %s6766_s20 }
0x3178   : > { %s7842_s29 = scalar_lea.hbm %s7959_s23, %s5843_s18 }
0x3179   : > { %p6769_p3 = pneg %p6768_p2  ;;  %p6775_p8 = por %p6774_p7, %p6773_p4 }
0x317b   : > { %p6776_p9 = pnand %p6775_p8, %p6769_p3 }
0x3237   : > { %v5549_v18 = vpop.f32.mrb[54].mxu0 }
0x3238   : > { %5553 = vst [vmem:[%s574_s21] sm:$0xff] %v5549_v18  ;;  %v6470_v58 = vpop.f32.mrb[55].mxu0 }
0x3239   : > { %6779 = shalt.err (!%p6776_p9)
}
0x323a   : > { %s6780_s17 = scalar_lea.hbm %s7842_s29, 128  ;;  %s6784_s30 = scalar_lea.hbm %s7959_s23, 256 }
0x323b   : > { %p6781_p10 = scmp.ne.s32.totalorder %s7842_s29, %s6780_s17  ;;  %p6785_p13 = scmp.lt.u32.totalorder %s7842_s29, %s7959_s23 }
0x323c   : > { %p6786_p0 = scmp.lt.u32.totalorder %s6784_s30, %s6780_s17  ;;  %p6788_p2 = scmp.lt.u32.totalorder %s6780_s17, %s7842_s29 }
0x323d   : > { %p6782_p11 = pnand %p6781_p10, %p6980_p5 }
0x323e   : > { %p6787_p1 = por %p6786_p0, %p6785_p13 }
0x323f   : > { %p6783_p12 = pneg %p6782_p11 }
0x3240   : > { %p6789_p3 = por %p6788_p2, %p6787_p1 }
0x3242   : > { %p6790_p4 = pnand %p6789_p3, %p6783_p12 }
0x3244   : > { %6793 = shalt.err (!%p6790_p4)
}
0x3245   : > { %6600 = dma.vmem_to_hbm [thread:$0]  (%p6980_p5), %s7835_s19, 128, %s7842_s29, %s5560_s24  }
0x3246 PF: > { %s7960_s21 = sld [smem:[#allocation10_spill]]  ;;  %s7961_s26 = sld [smem:[#allocation8_spill]] }
0x324c   : > { %p6610_p7 = scmp.ge.s32.totalorder %s7960_s21, 2  ;;  %s5598_s20 = sand.u32 1, %s7961_s26  }
0x324d   : > { %s5599_s27 = scalar_lea.sflag [#allocation3], %s5598_s20 }
0x324e   : > { %p6604_p8 = pnand %p6610_p7, %p6984_p6 }
0x3250   : > { %6811 = dma.done.wait (!%p6604_p8), %s5599_s27, 128  }
0x3251   : > { %6813 = vsyncadd (!%p6604_p8), %s5599_s27, 4294967168  ;;  %s5608_s2 = scalar_lea.sflag [#allocation5], %s5598_s20 }
0x3252   : > { %6815 = dma.done.wait (!%p6604_p8), %s5608_s2, 128  }
0x3253   : > { %6817 = vsyncadd (!%p6604_p8), %s5608_s2, 4294967168  ;;  %s7963_s27 = sld [smem:[#allocation11_spill]]  ;;  %s7964_s1 = sld [smem:[#allocation9_spill]] }
0x3254   : > { %s7965_s26 = sld [smem:[#allocation12_spill]]  ;;  %s7966_s24 = smov %s6824_s25 }
0x3259   : > { %p31_p5 = scmp.ge.s32.totalorder %s7963_s27, 4   ;;  %s7967_s25 = smov %s7964_s1 }
0x325b   :  { %33 = sbr.rel (!%p31_p5) target bundleno = 13 (0xd), region = 152 }
0x3262   :  { %5613 = vsyncpa [#allocation3], 1 }
0x3263   :  { %5615 = vsyncpa [#allocation3 + $0x1], 1 }
0x3264   :  { %5616 = vsyncpa [#allocation5], 1 }
0x3265   :  { %5618 = vsyncpa [#allocation5 + $0x1], 1 }

</bundles_post_ra>
